<compile_context>
chip_gen: v6e
topology: v6e:2x2x1
jax: 0.10.0
libtpu: 0.0.40
codegen_flags: <defaults>
</compile_context>

<pallas_src>
import functools

import jax
import jax.numpy as jnp
from jax.experimental import pallas as pl
from jax.experimental.pallas import tpu as pltpu

K_IN = 28 * 28       # 784; used as a full-dim block (no padding needed)
N_HID = 1024
MAX_TILE_B = 512     # rows per grid step cap (VMEM ~16 MiB at this size)


def fc1024_kernel(x_ref, w1_ref, b1_ref, w2_ref, b2_ref, w3_ref, out_ref):
    # Layer 1: 784 -> 1024, bias + ReLU.  bf16 operands, f32 accumulation,
    # single-pass epilogue (only the bf16 intermediate is kept live).
    h1 = jnp.dot(x_ref[...], w1_ref[...], preferred_element_type=jnp.float32)
    h1 = jnp.maximum(h1 + b1_ref[...], 0.0).astype(jnp.bfloat16)
    # Layer 2: 1024 -> 1024, bias + ReLU.
    h2 = jnp.dot(h1, w2_ref[...], preferred_element_type=jnp.float32)
    h2 = jnp.maximum(h2 + b2_ref[...], 0.0).astype(jnp.bfloat16)
    # Logits: 1024 -> n_out_pad (zero-padded past num_classes).  last_mask /
    # last_input_mask are all-ones in the reference module -> plain matmul, no
    # bias.  bf16 output halves the writeback; the wrapper restores f32.
    out_ref[...] = jnp.dot(
        h2, w3_ref[...], preferred_element_type=jnp.float32
    ).astype(out_ref.dtype)


def prepare_params(w1, b1, w2, b2, w3):
    """One-time weight prep (hoisted out of the per-call forward path).

    w* are stored as (in, out) == PyTorch weight.T.  Weights are cast to bf16
    for the MXU; w3's output features are zero-padded to a multiple of 128 so
    the kernel's logit tile is lane-dense (unmasked vector stores).
    """
    num_classes = w3.shape[1]
    n_out_pad = 128 * pl.cdiv(num_classes, 128)
    w3_p = jnp.zeros((N_HID, n_out_pad), jnp.bfloat16)
    w3_p = w3_p.at[:, :num_classes].set(w3.astype(jnp.bfloat16))
    params = {
        "w1": w1.astype(jnp.bfloat16),            # (784, 1024)
        "b1": b1.astype(jnp.float32),             # (1, 1024)  f32 epilogue
        "w2": w2.astype(jnp.bfloat16),            # (1024, 1024)
        "b2": b2.astype(jnp.float32),             # (1, 1024)
        "w3": w3_p,                               # (1024, n_out_pad)
    }
    return params, num_classes


def _choose_tile_b(batch):
    """Rows per grid step: multiple of 16 (bf16 sublanes), <= MAX_TILE_B, and
    >= 2 grid steps for batches large enough to use both v7x TensorCores."""
    b16 = 16 * pl.cdiv(batch, 16)
    if b16 <= 128:
        return b16                      # tiny batch: one step, minimal padding
    half = 16 * pl.cdiv(b16, 32)        # ~half the batch, rounded up to 16
    return min(MAX_TILE_B, half)


@functools.partial(jax.jit, static_argnames=("num_classes",))
def fc1024_forward(x_nchw, params, *, num_classes):
    """x_nchw: (B, 1, 28, 28) f32 -> (B, num_classes) f32 logits."""
    B = x_nchw.shape[0]
    n_out_pad = params["w3"].shape[1]

    # x.view(B, 784, 1, 1) + 1x1 convs on a 1x1 spatial grid == (B,784) matmuls.
    x2d = x_nchw.reshape(B, K_IN).astype(jnp.bfloat16)

    tile_b = _choose_tile_b(B)
    b_pad = tile_b * pl.cdiv(B, tile_b)
    if b_pad != B:
        x2d = jnp.pad(x2d, ((0, b_pad - B), (0, 0)))

    grid = (b_pad // tile_b,)
    flops = 2 * b_pad * (K_IN * N_HID + N_HID * N_HID + N_HID * n_out_pad)
    bytes_accessed = (
        (params["w1"].size + params["w2"].size + params["w3"].size) * 2
        + (params["b1"].size + params["b2"].size) * 4
        + x2d.size * 2 + b_pad * n_out_pad * 2)

    # VMEM budget at tile_b=512 (double-buffered): x 1.6 MiB, w1 3.1 MiB,
    # w2 4 MiB, w3 0.5 MiB, out 0.5 MiB, f32/bf16 intermediates ~6 MiB
    # -> ~16 MiB total.  32 MiB leaves headroom on every generation
    # (v5e/v6e 128 MiB, v7x 64 MiB physical).
    out_padded = pl.pallas_call(
        fc1024_kernel,
        out_shape=jax.ShapeDtypeStruct((b_pad, n_out_pad), jnp.bfloat16),
        grid_spec=pltpu.PrefetchScalarGridSpec(
            num_scalar_prefetch=0,
            grid=grid,
            in_specs=[
                pl.BlockSpec((tile_b, K_IN), lambda i: (i, 0)),        # x tile
                pl.BlockSpec((K_IN, N_HID), lambda i: (0, 0)),         # w1 resident
                pl.BlockSpec((1, N_HID), lambda i: (0, 0)),            # b1
                pl.BlockSpec((N_HID, N_HID), lambda i: (0, 0)),        # w2 resident
                pl.BlockSpec((1, N_HID), lambda i: (0, 0)),            # b2
                pl.BlockSpec((N_HID, n_out_pad), lambda i: (0, 0)),    # w3 (padded)
            ],
            out_specs=pl.BlockSpec((tile_b, n_out_pad), lambda i: (i, 0)),
        ),
        compiler_params=pltpu.CompilerParams(
            dimension_semantics=("parallel",),   # batch steps shard across TCs
            vmem_limit_bytes=32 * 1024 * 1024,
        ),
        cost_estimate=pl.CostEstimate(
            flops=flops, transcendentals=0, bytes_accessed=bytes_accessed),
    )(x2d, params["w1"], params["b1"], params["w2"], params["b2"],
      params["w3"])

    # Drop batch / lane padding; restore f32 logits for downstream consumers.
    return out_padded[:B, :num_classes].astype(jnp.float32)


def init_params(key, num_classes=10):
    k1, k2, k3, k4, k5 = jax.random.split(key, 5)
    scale = 0.02
    # Stored as (in, out) == PyTorch weight.T
    w1 = scale * jax.random.normal(k1, (K_IN, N_HID), jnp.float32)
    b1 = scale * jax.random.normal(k2, (1, N_HID), jnp.float32)
    w2 = scale * jax.random.normal(k3, (N_HID, N_HID), jnp.float32)
    b2 = scale * jax.random.normal(k4, (1, N_HID), jnp.float32)
    w3 = scale * jax.random.normal(k5, (N_HID, num_classes), jnp.float32)
    return w1, b1, w2, b2, w3


def reference_forward(x, w1, b1, w2, b2, w3):
    x2d = x.reshape(x.shape[0], K_IN)
    h = jnp.maximum(x2d @ w1 + b1, 0.0)
    h = jnp.maximum(h @ w2 + b2, 0.0)
    return h @ w3


if __name__ == "__main__":
    key = jax.random.PRNGKey(0)
    kx_root, kp = jax.random.split(key)

    num_classes = 10
    w1, b1, w2, b2, w3 = init_params(kp, num_classes)
    params, n_cls = prepare_params(w1, b1, w2, b2, w3)

    # Small inference-style batch (single grid step, rows padded only to 16)
    # and a larger batch exercising the multi-step "parallel" grid path.
    for B in (2, 160):
        kx = jax.random.fold_in(kx_root, B)
        x = jax.random.normal(kx, (B, 1, 28, 28), jnp.float32)  # NCHW, MNIST-like
        out = jax.block_until_ready(
            fc1024_forward(x, params, num_classes=n_cls))

        # Pure-JAX f32 reference of the same math (loose tol: kernel uses bf16
        # operands / bf16 logits with f32 accumulation).
        ref = reference_forward(x, w1, b1, w2, b2, w3)
        assert out.shape == (B, num_classes)
        assert jnp.allclose(out, ref, atol=2e-2, rtol=2e-2), \
            f"mismatch vs reference at B={B}"

    print("KERNEL_OK")
</pallas_src>

<mosaic_0001>
module attributes {stable_mosaic.version = 11 : i64} {
  func.func @fc1024_kernel(%arg0: i32, %arg1: memref<16x784xbf16, #tpu.memory_space<vmem>>, %arg2: memref<784x1024xbf16, #tpu.memory_space<vmem>>, %arg3: memref<1x1024xf32, #tpu.memory_space<vmem>>, %arg4: memref<1024x1024xbf16, #tpu.memory_space<vmem>>, %arg5: memref<1x1024xf32, #tpu.memory_space<vmem>>, %arg6: memref<1024x128xbf16, #tpu.memory_space<vmem>>, %arg7: memref<16x128xbf16, #tpu.memory_space<vmem>>) attributes {dimension_semantics = [#tpu.dimension_semantics<parallel>], iteration_bounds = array<i64: 1>, scalar_prefetch = 0 : i64, scratch_operands = 0 : i64, tpu.core_type = #tpu.core_type<tc>, window_params = [{transform_indices = @transform_0, window_bounds = array<i64: 16, 784>}, {pipeline_mode = #tpu.pipeline_mode<synchronous>, transform_indices = @transform_1, window_bounds = array<i64: 784, 1024>}, {pipeline_mode = #tpu.pipeline_mode<synchronous>, transform_indices = @transform_2, window_bounds = array<i64: 1, 1024>}, {pipeline_mode = #tpu.pipeline_mode<synchronous>, transform_indices = @transform_3, window_bounds = array<i64: 1024, 1024>}, {pipeline_mode = #tpu.pipeline_mode<synchronous>, transform_indices = @transform_4, window_bounds = array<i64: 1, 1024>}, {pipeline_mode = #tpu.pipeline_mode<synchronous>, transform_indices = @transform_5, window_bounds = array<i64: 1024, 128>}, {transform_indices = @transform_6, window_bounds = array<i64: 16, 128>}]} {
    %c0 = arith.constant 0 : index
    %c0_0 = arith.constant 0 : index
    %0 = vector.load %arg1[%c0, %c0_0] : memref<16x784xbf16, #tpu.memory_space<vmem>>, vector<16x784xbf16>
    %c0_1 = arith.constant 0 : index
    %c0_2 = arith.constant 0 : index
    %1 = vector.load %arg2[%c0_1, %c0_2] : memref<784x1024xbf16, #tpu.memory_space<vmem>>, vector<784x1024xbf16>
    %cst = arith.constant dense<0.000000e+00> : vector<16x1024xf32>
    %2 = tpu.matmul %0, %1, %cst {dimension_numbers = #tpu.dot_dimension_numbers<[1], [0], [0], [1], [0, 0, 1, 1], [], []>} : vector<16x784xbf16>, vector<784x1024xbf16>, vector<16x1024xf32> -> vector<16x1024xf32>
    %c0_3 = arith.constant 0 : index
    %c0_4 = arith.constant 0 : index
    %3 = vector.load %arg3[%c0_3, %c0_4] : memref<1x1024xf32, #tpu.memory_space<vmem>>, vector<1x1024xf32>
    %4 = vector.broadcast %3 : vector<1x1024xf32> to vector<16x1024xf32>
    %5 = arith.addf %2, %4 : vector<16x1024xf32>
    %cst_5 = arith.constant 0.000000e+00 : f32
    %6 = vector.broadcast %cst_5 : f32 to vector<16x1024xf32>
    %7 = arith.maximumf %5, %6 : vector<16x1024xf32>
    %8 = arith.truncf %7 : vector<16x1024xf32> to vector<16x1024xbf16>
    %c0_6 = arith.constant 0 : index
    %c0_7 = arith.constant 0 : index
    %9 = vector.load %arg4[%c0_6, %c0_7] : memref<1024x1024xbf16, #tpu.memory_space<vmem>>, vector<1024x1024xbf16>
    %cst_8 = arith.constant dense<0.000000e+00> : vector<16x1024xf32>
    %10 = tpu.matmul %8, %9, %cst_8 {dimension_numbers = #tpu.dot_dimension_numbers<[1], [0], [0], [1], [0, 0, 1, 1], [], []>} : vector<16x1024xbf16>, vector<1024x1024xbf16>, vector<16x1024xf32> -> vector<16x1024xf32>
    %c0_9 = arith.constant 0 : index
    %c0_10 = arith.constant 0 : index
    %11 = vector.load %arg5[%c0_9, %c0_10] : memref<1x1024xf32, #tpu.memory_space<vmem>>, vector<1x1024xf32>
    %12 = vector.broadcast %11 : vector<1x1024xf32> to vector<16x1024xf32>
    %13 = arith.addf %10, %12 : vector<16x1024xf32>
    %cst_11 = arith.constant 0.000000e+00 : f32
    %14 = vector.broadcast %cst_11 : f32 to vector<16x1024xf32>
    %15 = arith.maximumf %13, %14 : vector<16x1024xf32>
    %16 = arith.truncf %15 : vector<16x1024xf32> to vector<16x1024xbf16>
    %c0_12 = arith.constant 0 : index
    %c0_13 = arith.constant 0 : index
    %17 = vector.load %arg6[%c0_12, %c0_13] : memref<1024x128xbf16, #tpu.memory_space<vmem>>, vector<1024x128xbf16>
    %cst_14 = arith.constant dense<0.000000e+00> : vector<16x128xf32>
    %18 = tpu.matmul %16, %17, %cst_14 {dimension_numbers = #tpu.dot_dimension_numbers<[1], [0], [0], [1], [0, 0, 1, 1], [], []>} : vector<16x1024xbf16>, vector<1024x128xbf16>, vector<16x128xf32> -> vector<16x128xf32>
    %19 = arith.truncf %18 : vector<16x128xf32> to vector<16x128xbf16>
    %c0_15 = arith.constant 0 : index
    %c0_16 = arith.constant 0 : index
    %20 = vector.load %arg7[%c0_15, %c0_16] : memref<16x128xbf16, #tpu.memory_space<vmem>>, vector<16x128xbf16>
    tpu.vector_store %arg7[%c0_15, %c0_16], %19 {strides = array<i32>} : memref<16x128xbf16, #tpu.memory_space<vmem>>, vector<16x128xbf16>,
    return
  }
  func.func @transform_0(%arg0: i32) -> (i32, i32) {
    %c0_i32 = arith.constant 0 : i32
    %c0_i32_0 = arith.constant 0 : i32
    return %arg0, %c0_i32 : i32, i32
  }
  func.func @transform_1(%arg0: i32) -> (i32, i32) {
    %c0_i32 = arith.constant 0 : i32
    %c0_i32_0 = arith.constant 0 : i32
    %c0_i32_1 = arith.constant 0 : i32
    return %c0_i32, %c0_i32_0 : i32, i32
  }
  func.func @transform_2(%arg0: i32) -> (i32, i32) {
    %c0_i32 = arith.constant 0 : i32
    %c0_i32_0 = arith.constant 0 : i32
    %c0_i32_1 = arith.constant 0 : i32
    return %c0_i32, %c0_i32_0 : i32, i32
  }
  func.func @transform_3(%arg0: i32) -> (i32, i32) {
    %c0_i32 = arith.constant 0 : i32
    %c0_i32_0 = arith.constant 0 : i32
    %c0_i32_1 = arith.constant 0 : i32
    return %c0_i32, %c0_i32_0 : i32, i32
  }
  func.func @transform_4(%arg0: i32) -> (i32, i32) {
    %c0_i32 = arith.constant 0 : i32
    %c0_i32_0 = arith.constant 0 : i32
    %c0_i32_1 = arith.constant 0 : i32
    return %c0_i32, %c0_i32_0 : i32, i32
  }
  func.func @transform_5(%arg0: i32) -> (i32, i32) {
    %c0_i32 = arith.constant 0 : i32
    %c0_i32_0 = arith.constant 0 : i32
    %c0_i32_1 = arith.constant 0 : i32
    return %c0_i32, %c0_i32_0 : i32, i32
  }
  func.func @transform_6(%arg0: i32) -> (i32, i32) {
    %c0_i32 = arith.constant 0 : i32
    %c0_i32_0 = arith.constant 0 : i32
    return %arg0, %c0_i32 : i32, i32
  }
}

</mosaic_0001>

<bundles_post_ra>
// kernel: fc1024_forward.1
= control target key start
LH: loop header
LB: loop body
LE: loop exit
PB: predicated region body
PF: predicated region fallthrough
CT: control target
= control target key end

     0   :  { %11 = vsyncpa [#allocation3], 0  ;;  %s9449_s0 = inlined_call_operand.vmem [shape: bf16[16,784], index: 0, kind: input, shape index: {}]   ;;  %s9450_s1 = inlined_call_operand.hbm [shape: bf16[784,1024], index: 1, kind: input, shape index: {}]   ;;  %s9451_s2 = inlined_call_operand.hbm [shape: f32[1,1024], index: 2, kind: input, shape index: {}]   ;;  %s9452_s3 = inlined_call_operand.hbm [shape: bf16[1024,1024], index: 3, kind: input, shape index: {}]   ;;  %s9453_s4 = inlined_call_operand.hbm [shape: f32[1,1024], index: 4, kind: input, shape index: {}]   ;;  %s9454_s5 = inlined_call_operand.hbm [shape: bf16[1024,128], index: 5, kind: input, shape index: {}]   ;;  %s9455_s6 = inlined_call_operand.vmem [shape: bf16[16,128], index: 6, kind: output, shape index: {}]  }
   0x1   :  { %12 = vsyncpa [#allocation5], 0 }
   0x2   :  { %13 = vsyncpa [#allocation8], 0  ;;  %s9036_s21 = smov [#allocation4]   ;;  %s9037_s23 = smov [#allocation7]  }
   0x3   :  { %s34_s22 = sshll.u32 %s9036_s21, 4  ;;  %s56_s24 = sshll.u32 %s9037_s23, 4  ;;  %s35_s22 = int_to_ptr.vmem [resolvable:$true] %s34_s22  ;;  %s57_s24 = int_to_ptr.vmem [resolvable:$true] %s56_s24 }
   0x4   :  { %s8938_s25 = scalar_lea.vmem %s35_s22, 128  ;;  %p8943_p1 = scmp.lt.s32.totalorder %s35_s22, %s35_s22 }
   0x5   :  { %p8939_p0 = scmp.ne.s32.totalorder %s35_s22, %s8938_s25  ;;  %p8944_p2 = scmp.lt.s32.totalorder %s8938_s25, %s8938_s25 }
   0x7   :  { %p8945_p3 = por %p8944_p2, %p8943_p1 }
   0x9   :  { %p8946_p4 = pnand %p8945_p3, %p8939_p0 }
   0xb   :  { %8949 = shalt.err (!%p8946_p4)
}
   0xc   :  { %37 = dma.hbm_to_vmem [thread:$0]  %s9451_s2, 128, %s35_s22, [#allocation5]  }
   0xd   :  { %s8958_s28 = scalar_lea.vmem %s57_s24, 128  ;;  %p8963_p6 = scmp.lt.s32.totalorder %s57_s24, %s57_s24 }
   0xe   :  { %p8959_p5 = scmp.ne.s32.totalorder %s57_s24, %s8958_s28  ;;  %p8964_p7 = scmp.lt.s32.totalorder %s8958_s28, %s8958_s28 }
  0x10   :  { %p8965_p8 = por %p8964_p7, %p8963_p6 }
  0x12   :  { %p8966_p9 = pnand %p8965_p8, %p8959_p5 }
  0x14   :  { %8969 = shalt.err (!%p8966_p9)
}
  0x15   :  { %59 = dma.hbm_to_vmem [thread:$0]  %s9453_s4, 128, %s57_s24, [#allocation8]  }
  0x16   :  { %s9038_s7 = smov [#allocation2]  }
  0x17   :  { %s21_s8 = sshll.u32 %s9038_s7, 4  ;;  %s22_s8 = int_to_ptr.vmem [resolvable:$true] %s21_s8 }
  0x18   :  { %s8978_s9 = scalar_lea.vmem %s22_s8, 50176  ;;  %p8983_p11 = scmp.lt.s32.totalorder %s22_s8, %s22_s8 }
  0x19   :  { %p8979_p10 = scmp.ne.s32.totalorder %s22_s8, %s8978_s9  ;;  %p8984_p12 = scmp.lt.s32.totalorder %s8978_s9, %s8978_s9 }
  0x1b   :  { %p8985_p13 = por %p8984_p12, %p8983_p11 }
  0x1d   :  { %p8986_p0 = pnand %p8985_p13, %p8979_p10 }
  0x1f   :  { %8989 = shalt.err (!%p8986_p0)
}
  0x20   :  { %s9039_s2 = smov 512   ;;  %s9040_s10 = smov 32  }
  0x21   :  { %27 = dma.hbm_to_vmem [thread:$0]  %s9450_s1, 50176, %s22_s8, [#allocation3], %s9039_s2, %s9039_s2, %s9040_s10  }
  0x22   :  { %s9041_s13 = smov [#allocation6]   ;;  %s9042_s4 = smov [#allocation9]  }
  0x23   :  { %s43_s14 = sshll.u32 %s9041_s13, 4  ;;  %s65_s15 = sshll.u32 %s9042_s4, 4  ;;  %s44_s14 = int_to_ptr.vmem [resolvable:$true] %s43_s14  ;;  %s66_s15 = int_to_ptr.vmem [resolvable:$true] %s65_s15 }
  0x24   :  { %s8998_s16 = scalar_lea.vmem %s44_s14, 65536  ;;  %p9003_p2 = scmp.lt.s32.totalorder %s44_s14, %s44_s14 }
  0x25   :  { %p8999_p1 = scmp.ne.s32.totalorder %s44_s14, %s8998_s16  ;;  %p9004_p3 = scmp.lt.s32.totalorder %s8998_s16, %s8998_s16 }
  0x27   :  { %p9005_p4 = por %p9004_p3, %p9003_p2 }
  0x29   :  { %p9006_p5 = pnand %p9005_p4, %p8999_p1 }
  0x2b   :  { %9009 = shalt.err (!%p9006_p5)
}
  0x2c   :  { %49 = dma.hbm_to_vmem [thread:$0]  %s9452_s3, 65536, %s44_s14, [#allocation5], %s9039_s2, %s9039_s2, %s9040_s10  }
  0x2d   :  { %s9018_s19 = scalar_lea.vmem %s66_s15, 8192  ;;  %p9023_p7 = scmp.lt.s32.totalorder %s66_s15, %s66_s15 }
  0x2e   :  { %p9019_p6 = scmp.ne.s32.totalorder %s66_s15, %s9018_s19  ;;  %p9024_p8 = scmp.lt.s32.totalorder %s9018_s19, %s9018_s19 }
  0x30   :  { %p9025_p9 = por %p9024_p8, %p9023_p7 }
  0x32   :  { %p9026_p10 = pnand %p9025_p9, %p9019_p6 }
  0x34   :  { %9029 = shalt.err (!%p9026_p10)
}
  0x35   :  { %s9043_s1 = smov 64   ;;  %s9044_s20 = smov 4  }
  0x36   :  { %71 = dma.hbm_to_vmem [thread:$0]  %s9454_s5, 8192, %s66_s15, [#allocation8], %s9043_s1, %s9043_s1, %s9044_s20  }
  0x37   :  { %9030 = dma.done.wait [#allocation3], 50176  }
  0x38   :  { %9031 = vsyncadd [#allocation3], 4294917120 }
  0x39   :  { %9032 = dma.done.wait [#allocation5], 65664  }
  0x3a   :  { %9033 = vsyncadd [#allocation5], 4294901632 }
  0x3b   :  { %9034 = dma.done.wait [#allocation8], 8320  }
  0x3c   :  { %9035 = vsyncadd [#allocation8], 4294958976  ;;  %v152_v0 = vld [vmem:[#allocation2 + $0x1c0] sm:$0xff]  ;;  %v9104_v59 = vld [vmem:[%s9449_s0 + $0xc] ss:$28 sps:$4 sm:$0xff]   ;;  %vm2525_vm0 = vcmask 130048  }
  0x3d   :  { %v156_v1 = vld [vmem:[#allocation2 + $0x1e0] sm:$0xff]  ;;  %2604 = vmatprep.mubr.bf16.mxu1 %v9104_v59 }
  0x3e   :  { %v280_v2 = vld [vmem:[#allocation2 + $0x5c0] sm:$0xff]  ;;  %v7824_v3 = vcombine.high %v152_v0, %v156_v1  ;;  %v7823_v5 = vcombine.low %v152_v0, %v156_v1 }
  0x3f   :  { %v284_v4 = vld [vmem:[#allocation2 + $0x5e0] sm:$0xff] }
  0x40   :  { %v144_v6 = vld [vmem:[#allocation2 + $0x180] sm:$0xff]  ;;  %v7952_v8 = vcombine.high %v280_v2, %v284_v4  ;;  %v7951_v9 = vcombine.low %v280_v2, %v284_v4  ;;  %2529 = vmatprep.subr.bf16.mxu0 %v7824_v3 }
  0x41   :  { %v148_v7 = vld [vmem:[#allocation2 + $0x1a0] sm:$0xff]  ;;  %2530 = vmatpush1.bf16.msra.mxu0 %v7823_v5 }
  0x42   :  { %v7816_v10 = vcombine.high %v144_v6, %v148_v7  ;;  %v272_v11 = vld [vmem:[#allocation2 + $0x580] sm:$0xff]  ;;  %2572 = vmatprep.subr.bf16.mxu1 %v7952_v8  ;;  %v7815_v18 = vcombine.low %v144_v6, %v148_v7 }
  0x43   :  { %v276_v12 = vld [vmem:[#allocation2 + $0x5a0] sm:$0xff]  ;;  %2573 = vmatpush1.bf16.msra.mxu1 %v7951_v9 }
  0x44   :  { %v136_v13 = vld [vmem:[#allocation2 + $0x140] sm:$0xff]  ;;  %v7944_v14 = vcombine.high %v272_v11, %v276_v12  ;;  %2531 = vmatprep.subr.bf16.mxu0 %v7816_v10  ;;  %v7943_v19 = vcombine.low %v272_v11, %v276_v12 }
  0x45   :  { %v140_v15 = vld [vmem:[#allocation2 + $0x160] sm:$0xff]  ;;  %2532 = vmatpush1.bf16.msra.mxu0 %v7815_v18 }
  0x46   :  { %v264_v16 = vld [vmem:[#allocation2 + $0x540] sm:$0xff]  ;;  %v7808_v20 = vcombine.high %v136_v13, %v140_v15  ;;  %2574 = vmatprep.subr.bf16.mxu1 %v7944_v14  ;;  %v7807_v26 = vcombine.low %v136_v13, %v140_v15 }
  0x47   :  { %v268_v17 = vld [vmem:[#allocation2 + $0x560] sm:$0xff]  ;;  %2575 = vmatpush1.bf16.msra.mxu1 %v7943_v19 }
  0x48   :  { %v7936_v21 = vcombine.high %v264_v16, %v268_v17  ;;  %v128_v22 = vld [vmem:[#allocation2 + $0x100] sm:$0xff]  ;;  %2533 = vmatprep.subr.bf16.mxu0 %v7808_v20  ;;  %v7935_v27 = vcombine.low %v264_v16, %v268_v17 }
  0x49   :  { %v132_v23 = vld [vmem:[#allocation2 + $0x120] sm:$0xff]  ;;  %2534 = vmatpush1.bf16.msra.mxu0 %v7807_v26 }
  0x4a   :  { %v256_v24 = vld [vmem:[#allocation2 + $0x500] sm:$0xff]  ;;  %v7800_v28 = vcombine.high %v128_v22, %v132_v23  ;;  %2576 = vmatprep.subr.bf16.mxu1 %v7936_v21  ;;  %v7799_v34 = vcombine.low %v128_v22, %v132_v23 }
  0x4b   :  { %v260_v25 = vld [vmem:[#allocation2 + $0x520] sm:$0xff]  ;;  %2577 = vmatpush1.bf16.msra.mxu1 %v7935_v27 }
  0x4c   :  { %v7928_v29 = vcombine.high %v256_v24, %v260_v25  ;;  %v120_v30 = vld [vmem:[#allocation2 + $0xc0] sm:$0xff]  ;;  %2535 = vmatprep.subr.bf16.mxu0 %v7800_v28  ;;  %v7927_v35 = vcombine.low %v256_v24, %v260_v25 }
  0x4d   :  { %v124_v31 = vld [vmem:[#allocation2 + $0xe0] sm:$0xff]  ;;  %2536 = vmatpush1.bf16.msra.mxu0 %v7799_v34 }
  0x4e   :  { %v248_v32 = vld [vmem:[#allocation2 + $0x4c0] sm:$0xff]  ;;  %v7792_v36 = vcombine.high %v120_v30, %v124_v31  ;;  %2578 = vmatprep.subr.bf16.mxu1 %v7928_v29  ;;  %v7791_v42 = vcombine.low %v120_v30, %v124_v31 }
  0x4f   :  { %v252_v33 = vld [vmem:[#allocation2 + $0x4e0] sm:$0xff]  ;;  %2579 = vmatpush1.bf16.msra.mxu1 %v7927_v35 }
  0x50   :  { %v7920_v37 = vcombine.high %v248_v32, %v252_v33  ;;  %v112_v38 = vld [vmem:[#allocation2 + $0x80] sm:$0xff]  ;;  %2537 = vmatprep.subr.bf16.mxu0 %v7792_v36  ;;  %v7919_v43 = vcombine.low %v248_v32, %v252_v33 }
  0x51   :  { %v116_v39 = vld [vmem:[#allocation2 + $0xa0] sm:$0xff]  ;;  %2538 = vmatpush1.bf16.msra.mxu0 %v7791_v42 }
  0x52   :  { %v240_v40 = vld [vmem:[#allocation2 + $0x480] sm:$0xff]  ;;  %v7784_v44 = vcombine.high %v112_v38, %v116_v39  ;;  %2580 = vmatprep.subr.bf16.mxu1 %v7920_v37  ;;  %v7783_v50 = vcombine.low %v112_v38, %v116_v39 }
  0x53   :  { %v244_v41 = vld [vmem:[#allocation2 + $0x4a0] sm:$0xff]  ;;  %2581 = vmatpush1.bf16.msra.mxu1 %v7919_v43 }
  0x54   :  { %v7912_v45 = vcombine.high %v240_v40, %v244_v41  ;;  %v104_v46 = vld [vmem:[#allocation2 + $0x40] sm:$0xff]  ;;  %2539 = vmatprep.subr.bf16.mxu0 %v7784_v44  ;;  %v7911_v52 = vcombine.low %v240_v40, %v244_v41 }
  0x55   :  { %v108_v47 = vld [vmem:[#allocation2 + $0x60] sm:$0xff]  ;;  %2540 = vmatpush1.bf16.msra.mxu0 %v7783_v50 }
  0x56   :  { %v232_v48 = vld [vmem:[#allocation2 + $0x440] sm:$0xff]  ;;  %v7776_v53 = vcombine.high %v104_v46, %v108_v47  ;;  %2582 = vmatprep.subr.bf16.mxu1 %v7912_v45  ;;  %v7775_v60 = vcombine.low %v104_v46, %v108_v47 }
  0x57   :  { %v236_v49 = vld [vmem:[#allocation2 + $0x460] sm:$0xff]  ;;  %2583 = vmatpush1.bf16.msra.mxu1 %v7911_v52 }
  0x58   :  { %v96_v51 = vld [vmem:[#allocation2] sm:$0xff]  ;;  %v7904_v55 = vcombine.high %v232_v48, %v236_v49  ;;  %2541 = vmatprep.subr.bf16.mxu0 %v7776_v53  ;;  %v7903_v61 = vcombine.low %v232_v48, %v236_v49 }
  0x59   :  { %v100_v54 = vld [vmem:[#allocation2 + $0x20] sm:$0xff]  ;;  %2542 = vmatpush1.bf16.msra.mxu0 %v7775_v60 }
  0x5a   :  { %v9099_v56 = vld [vmem:[%s9449_s0 + $0x4] ss:$28 sps:$4 sm:$0xff]   ;;  %v7768_v62 = vcombine.high %v96_v51, %v100_v54  ;;  %2584 = vmatprep.subr.bf16.mxu1 %v7904_v55  ;;  %v7767_v4 = vcombine.low %v96_v51, %v100_v54 }
  0x5b   :  { %v224_v57 = vld [vmem:[#allocation2 + $0x400] sm:$0xff]  ;;  %2561 = vmatprep.mubr.bf16.mxu0 %v9099_v56  ;;  %2585 = vmatpush1.bf16.msra.mxu1 %v7903_v61 }
  0x5c   :  { %v228_v58 = vld [vmem:[#allocation2 + $0x420] sm:$0xff]  ;;  %2543 = vmatprep.subr.bf16.mxu0 %v7768_v62 }
  0x5d   :  { %v7896_v63 = vcombine.high %v224_v57, %v228_v58  ;;  %v216_v0 = vld [vmem:[#allocation2 + $0x3c0] sm:$0xff]  ;;  %v7895_v5 = vcombine.low %v224_v57, %v228_v58  ;;  %2544 = vmatpush1.bf16.msra.mxu0 %v7767_v4 }
  0x5e   :  { %v220_v1 = vld [vmem:[#allocation2 + $0x3e0] sm:$0xff] }
  0x5f   :  { %v344_v2 = vld [vmem:[#allocation2 + $0x7c0] sm:$0xff]  ;;  %v7888_v6 = vcombine.high %v216_v0, %v220_v1  ;;  %2586 = vmatprep.subr.bf16.mxu1 %v7896_v63  ;;  %v7887_v12 = vcombine.low %v216_v0, %v220_v1 }
  0x60   :  { %v348_v3 = vld [vmem:[#allocation2 + $0x7e0] sm:$0xff]  ;;  %2587 = vmatpush1.bf16.msra.mxu1 %v7895_v5 }
  0x61   :  { %v8016_v7 = vcombine.high %v344_v2, %v348_v3  ;;  %v208_v8 = vld [vmem:[#allocation2 + $0x380] sm:$0xff]  ;;  %2545 = vmatprep.subr.bf16.mxu0 %v7888_v6  ;;  %v8015_v13 = vcombine.low %v344_v2, %v348_v3 }
  0x62   :  { %v212_v9 = vld [vmem:[#allocation2 + $0x3a0] sm:$0xff]  ;;  %2546 = vmatpush2.bf16.msra.mxu0 %v7887_v12 }
  0x63   :  { %v336_v10 = vld [vmem:[#allocation2 + $0x780] sm:$0xff]  ;;  %v7880_v14 = vcombine.high %v208_v8, %v212_v9  ;;  %2588 = vmatprep.subr.bf16.mxu1 %v8016_v7  ;;  %v7879_v20 = vcombine.low %v208_v8, %v212_v9 }
  0x64   :  { %v340_v11 = vld [vmem:[#allocation2 + $0x7a0] sm:$0xff]  ;;  %2589 = vmatpush2.bf16.msra.mxu1 %v8015_v13  ;;  %v153_v13 = vld [vmem:[#allocation2 + $0x1c8] sm:$0xff] }
  0x65   :  { %v8008_v15 = vcombine.high %v336_v10, %v340_v11  ;;  %v200_v16 = vld [vmem:[#allocation2 + $0x340] sm:$0xff]  ;;  %2547 = vmatprep.subr.bf16.mxu0 %v7880_v14  ;;  %v8007_v21 = vcombine.low %v336_v10, %v340_v11  ;;  %v157_v14 = vld [vmem:[#allocation2 + $0x1e8] sm:$0xff] }
  0x66   :  { %v204_v17 = vld [vmem:[#allocation2 + $0x360] sm:$0xff]  ;;  %2548 = vmatpush2.bf16.msra.mxu0 %v7879_v20 }
  0x67   :  { %v328_v18 = vld [vmem:[#allocation2 + $0x740] sm:$0xff]  ;;  %v7872_v22 = vcombine.high %v200_v16, %v204_v17  ;;  %2590 = vmatprep.subr.bf16.mxu1 %v8008_v15  ;;  %v7871_v28 = vcombine.low %v200_v16, %v204_v17 }
  0x68   :  { %v332_v19 = vld [vmem:[#allocation2 + $0x760] sm:$0xff]  ;;  %2591 = vmatpush2.bf16.msra.mxu1 %v8007_v21 }
  0x69   :  { %v8000_v23 = vcombine.high %v328_v18, %v332_v19  ;;  %v192_v24 = vld [vmem:[#allocation2 + $0x300] sm:$0xff]  ;;  %2549 = vmatprep.subr.bf16.mxu0 %v7872_v22  ;;  %v7999_v29 = vcombine.low %v328_v18, %v332_v19  ;;  %v7826_v19 = vcombine.high %v153_v13, %v157_v14  ;;  %v9120_v22 = vld [vmem:[%s9449_s0 + $0x14] ss:$28 sps:$4 sm:$0xff]  }
  0x6a   :  { %v196_v25 = vld [vmem:[#allocation2 + $0x320] sm:$0xff]  ;;  %2550 = vmatpush2.bf16.msra.mxu0 %v7871_v28  ;;  %v9045_v28 = vmov 0  }
  0x6b   :  { %v320_v26 = vld [vmem:[#allocation2 + $0x700] sm:$0xff]  ;;  %v7864_v30 = vcombine.high %v192_v24, %v196_v25  ;;  %2592 = vmatprep.subr.bf16.mxu1 %v8000_v23  ;;  %v7863_v36 = vcombine.low %v192_v24, %v196_v25  ;;  %v145_v25 = vld [vmem:[#allocation2 + $0x188] sm:$0xff] }
  0x6c   :  { %v324_v27 = vld [vmem:[#allocation2 + $0x720] sm:$0xff]  ;;  %2593 = vmatpush2.bf16.msra.mxu1 %v7999_v29  ;;  %v8852_v29 = vld [vmem:[%s9449_s0 + $0x18] ss:$28 sps:$4 sm:$0xff]  }
  0x6d   :  { %v7992_v31 = vcombine.high %v320_v26, %v324_v27  ;;  %v184_v32 = vld [vmem:[#allocation2 + $0x2c0] sm:$0xff]  ;;  %2551 = vmatprep.subr.bf16.mxu0 %v7864_v30  ;;  %v7991_v37 = vcombine.low %v320_v26, %v324_v27  ;;  %v149_v26 = vld [vmem:[#allocation2 + $0x1a8] sm:$0xff] }
  0x6e   :  { %v188_v33 = vld [vmem:[#allocation2 + $0x2e0] sm:$0xff]  ;;  %2552 = vmatpush2.bf16.msra.mxu0 %v7863_v36 }
  0x6f   :  { %v312_v34 = vld [vmem:[#allocation2 + $0x6c0] sm:$0xff]  ;;  %v7856_v38 = vcombine.high %v184_v32, %v188_v33  ;;  %2594 = vmatprep.subr.bf16.mxu1 %v7992_v31  ;;  %v7855_v44 = vcombine.low %v184_v32, %v188_v33  ;;  %v7825_v32 = vcombine.low %v153_v13, %v157_v14  ;;  %v101_v13 = vld [vmem:[#allocation2 + $0x28] sm:$0xff] }
  0x70   :  { %v316_v35 = vld [vmem:[#allocation2 + $0x6e0] sm:$0xff]  ;;  %2595 = vmatpush2.bf16.msra.mxu1 %v7991_v37  ;;  %v7818_v37 = vcombine.high %v145_v25, %v149_v26 }
  0x71   :  { %v7984_v39 = vcombine.high %v312_v34, %v316_v35  ;;  %v176_v40 = vld [vmem:[#allocation2 + $0x280] sm:$0xff]  ;;  %2553 = vmatprep.subr.bf16.mxu0 %v7856_v38  ;;  %v7983_v45 = vcombine.low %v312_v34, %v316_v35  ;;  %v137_v34 = vld [vmem:[#allocation2 + $0x148] sm:$0xff] }
  0x72   :  { %v180_v41 = vld [vmem:[#allocation2 + $0x2a0] sm:$0xff]  ;;  %2554 = vmatpush2.bf16.msra.mxu0 %v7855_v44  ;;  %v141_v35 = vld [vmem:[#allocation2 + $0x168] sm:$0xff] }
  0x73   :  { %v304_v42 = vld [vmem:[#allocation2 + $0x680] sm:$0xff]  ;;  %v7848_v46 = vcombine.high %v176_v40, %v180_v41  ;;  %2596 = vmatprep.subr.bf16.mxu1 %v7984_v39  ;;  %v7847_v52 = vcombine.low %v176_v40, %v180_v41  ;;  %v7817_v40 = vcombine.low %v145_v25, %v149_v26 }
  0x74   :  { %v308_v43 = vld [vmem:[#allocation2 + $0x6a0] sm:$0xff]  ;;  %2597 = vmatpush2.bf16.msra.mxu1 %v7983_v45  ;;  %v7810_v45 = vcombine.high %v137_v34, %v141_v35 }
  0x75   :  { %v7976_v47 = vcombine.high %v304_v42, %v308_v43  ;;  %v168_v48 = vld [vmem:[#allocation2 + $0x240] sm:$0xff]  ;;  %2555 = vmatprep.subr.bf16.mxu0 %v7848_v46  ;;  %v7975_v53 = vcombine.low %v304_v42, %v308_v43  ;;  %v129_v42 = vld [vmem:[#allocation2 + $0x108] sm:$0xff] }
  0x76   :  { %v172_v49 = vld [vmem:[#allocation2 + $0x260] sm:$0xff]  ;;  %2556 = vmatpush2.bf16.msra.mxu0 %v7847_v52  ;;  %v133_v43 = vld [vmem:[#allocation2 + $0x128] sm:$0xff] }
  0x77   :  { %v296_v50 = vld [vmem:[#allocation2 + $0x640] sm:$0xff]  ;;  %v7840_v54 = vcombine.high %v168_v48, %v172_v49  ;;  %2598 = vmatprep.subr.bf16.mxu1 %v7976_v47  ;;  %v7839_v62 = vcombine.low %v168_v48, %v172_v49  ;;  %v7809_v48 = vcombine.low %v137_v34, %v141_v35 }
  0x78   :  { %v300_v51 = vld [vmem:[#allocation2 + $0x660] sm:$0xff]  ;;  %2599 = vmatpush2.bf16.msra.mxu1 %v7975_v53  ;;  %v7802_v53 = vcombine.high %v129_v42, %v133_v43 }
  0x79   :  { %v7968_v55 = vcombine.high %v296_v50, %v300_v51  ;;  %v160_v57 = vld [vmem:[#allocation2 + $0x200] sm:$0xff]  ;;  %2557 = vmatprep.subr.bf16.mxu0 %v7840_v54  ;;  %v7967_v63 = vcombine.low %v296_v50, %v300_v51  ;;  %v121_v50 = vld [vmem:[#allocation2 + $0xc8] sm:$0xff] }
  0x7a   :  { %v164_v58 = vld [vmem:[#allocation2 + $0x220] sm:$0xff]  ;;  %2558 = vmatpush2.bf16.msra.mxu0 %v7839_v62  ;;  %v125_v51 = vld [vmem:[#allocation2 + $0xe8] sm:$0xff] }
  0x7b   :  { %v288_v60 = vld [vmem:[#allocation2 + $0x600] sm:$0xff]  ;;  %v7832_v0 = vcombine.high %v160_v57, %v164_v58  ;;  %2600 = vmatprep.subr.bf16.mxu1 %v7968_v55  ;;  %v7831_v6 = vcombine.low %v160_v57, %v164_v58  ;;  %v7801_v57 = vcombine.low %v129_v42, %v133_v43  ;;  %v7794_v62 = vcombine.high %v121_v50, %v125_v51 }
  0x7c   :  { %v292_v61 = vld [vmem:[#allocation2 + $0x620] sm:$0xff]  ;;  %2601 = vmatpush2.bf16.msra.mxu1 %v7967_v63 }
  0x7d   :  { %v7960_v1 = vcombine.high %v288_v60, %v292_v61  ;;  %v408_v2 = vld [vmem:[#allocation2 + $0x9c0] sm:$0xff]  ;;  %2559 = vmatprep.subr.bf16.mxu0 %v7832_v0  ;;  %v7959_v7 = vcombine.low %v288_v60, %v292_v61  ;;  %v113_v60 = vld [vmem:[#allocation2 + $0x88] sm:$0xff] }
  0x7e   :  { %v412_v3 = vld [vmem:[#allocation2 + $0x9e0] sm:$0xff]  ;;  %2560 = vmatpush2.bf16.msra.mxu0 %v7831_v6 }
  0x7f   :  { %v480_v4 = vld [vmem:[#allocation2 + $0xc00] sm:$0xff]  ;;  %v8080_v8 = vcombine.high %v408_v2, %v412_v3  ;;  %2602 = vmatprep.subr.bf16.mxu1 %v7960_v1  ;;  %v8079_v16 = vcombine.low %v408_v2, %v412_v3  ;;  %v7793_v1 = vcombine.low %v121_v50, %v125_v51  ;;  %v105_v3 = vld [vmem:[#allocation2 + $0x48] sm:$0xff] }
  0x80   :  { %v484_v5 = vld [vmem:[#allocation2 + $0xc20] sm:$0xff]  ;;  %2603 = vmatpush2.bf16.msra.mxu1 %v7959_v7 }
  0x81   :  { %v8152_v9 = vcombine.high %v480_v4, %v484_v5  ;;  %v400_v10 = vld [vmem:[#allocation2 + $0x980] sm:$0xff]  ;;  %2615 = vmatprep.subr.bf16.mxu0 %v8080_v8  ;;  %v8151_v17 = vcombine.low %v480_v4, %v484_v5  ;;  %v109_v4 = vld [vmem:[#allocation2 + $0x68] sm:$0xff] }
  0x82   :  { %v404_v11 = vld [vmem:[#allocation2 + $0x9a0] sm:$0xff] }
  0x83   :  { %v9111_v12 = vld [vmem:[%s9449_s0] ss:$28 sps:$4 sm:$0xff]   ;;  %v8851_v15 = vld [vmem:[%s9449_s0 + $0x8] ss:$28 sps:$4 sm:$0xff]   ;;  %v8072_v18 = vcombine.high %v400_v10, %v404_v11  ;;  %2672 = vmatprep.subr.bf16.mxu1 %v8152_v9  ;;  %v8071_v23 = vcombine.low %v400_v10, %v404_v11 }
  0x84   :  { %v392_v20 = vld [vmem:[#allocation2 + $0x940] sm:$0xff]  ;;  %2562 = vmatmul.mubr.bf16.vlgmr.msra.gmra.mxu0 %v9111_v12  ;;  %2605 = vmatmul.mubr.bf16.vlgmr.msra.gmra.mxu1 %v8851_v15  ;;  %v97_v11 = vld [vmem:[#allocation2 + $0x8] sm:$0xff]  ;;  %v7778_v15 = vcombine.high %v105_v3, %v109_v4 }
  0x85   :  { %v396_v21 = vld [vmem:[#allocation2 + $0x960] sm:$0xff]  ;;  %2616 = vmatpush1.bf16.msra.mxu0 %v8079_v16  ;;  %2673 = vmatpush1.bf16.msra.mxu1 %v8151_v17 }
  0x86   :  { %2617 = vmatprep.subr.bf16.mxu0 %v8072_v18  ;;  %v8064_v24 = vcombine.high %v392_v20, %v396_v21  ;;  %v384_v27 = vld [vmem:[#allocation2 + $0x900] sm:$0xff]  ;;  %2690 = vmatprep.mubr.bf16.mxu1 %v9045_v28  ;;  %v8063_v31 = vcombine.low %v392_v20, %v396_v21  ;;  %v7777_v18 = vcombine.low %v105_v3, %v109_v4  ;;  %v217_v20 = vld [vmem:[#allocation2 + $0x3c8] sm:$0xff] }
  0x87   :  { %2701 = vmatprep.subr.bf16.mxu1 %v7826_v19  ;;  %v388_v30 = vld [vmem:[#allocation2 + $0x920] sm:$0xff]  ;;  %2647 = vmatprep.mubr.bf16.mxu0 %v9120_v22  ;;  %v221_v21 = vld [vmem:[#allocation2 + $0x3e8] sm:$0xff] }
  0x88   :  { %v8056_v33 = vcombine.high %v384_v27, %v388_v30  ;;  %v376_v36 = vld [vmem:[#allocation2 + $0x8c0] sm:$0xff]  ;;  %v8055_v39 = vcombine.low %v384_v27, %v388_v30  ;;  %v7769_v27 = vcombine.low %v97_v11, %v101_v13  ;;  %v209_v30 = vld [vmem:[#allocation2 + $0x388] sm:$0xff] }
  0x89   :  { %2618 = vmatpush1.bf16.msra.mxu0 %v8071_v23  ;;  %v380_v38 = vld [vmem:[#allocation2 + $0x8e0] sm:$0xff] }
  0x8a   :  { %2619 = vmatprep.subr.bf16.mxu0 %v8064_v24  ;;  %v8048_v41 = vcombine.high %v376_v36, %v380_v38  ;;  %v368_v44 = vld [vmem:[#allocation2 + $0x880] sm:$0xff]  ;;  %v8047_v47 = vcombine.low %v376_v36, %v380_v38  ;;  %v7770_v24 = vcombine.high %v97_v11, %v101_v13  ;;  %v7889_v36 = vcombine.low %v217_v20, %v221_v21  ;;  %v201_v38 = vld [vmem:[#allocation2 + $0x348] sm:$0xff] }
  0x8b   :  { %v372_v46 = vld [vmem:[#allocation2 + $0x8a0] sm:$0xff]  ;;  %v285_v11 = vld [vmem:[#allocation2 + $0x5e8] sm:$0xff] }
  0x8c   :  { %8159 = vmatmul.mubr.msk.bf16.vlgmr.msra.gmra.mxu1 %vm2525_vm0, %v8852_v29  ;;  %v8040_v49 = vcombine.high %v368_v44, %v372_v46  ;;  %v360_v52 = vld [vmem:[#allocation2 + $0x840] sm:$0xff]  ;;  %v8039_v55 = vcombine.low %v368_v44, %v372_v46  ;;  %v193_v46 = vld [vmem:[#allocation2 + $0x308] sm:$0xff] }
  0x8d   :  { %2620 = vmatpush1.bf16.msra.mxu0 %v8063_v31  ;;  %2702 = vmatpush1.bf16.msra.mxu1 %v7825_v32  ;;  %v364_v54 = vld [vmem:[#allocation2 + $0x860] sm:$0xff]  ;;  %v213_v31 = vld [vmem:[#allocation2 + $0x3a8] sm:$0xff] }
  0x8e   :  { %2621 = vmatprep.subr.bf16.mxu0 %v8056_v33  ;;  %2703 = vmatprep.subr.bf16.mxu1 %v7818_v37  ;;  %v8032_v58 = vcombine.high %v360_v52, %v364_v54  ;;  %v352_v61 = vld [vmem:[#allocation2 + $0x800] sm:$0xff]  ;;  %v8031_v0 = vcombine.low %v360_v52, %v364_v54  ;;  %v7890_v33 = vcombine.high %v217_v20, %v221_v21  ;;  %v185_v54 = vld [vmem:[#allocation2 + $0x2c8] sm:$0xff] }
  0x8f   :  { %2733 = vmatprep.mubr.bf16.mxu1 %v9099_v56  ;;  %v117_v56 = vld [vmem:[#allocation2 + $0xa8] sm:$0xff]  ;;  %v356_v63 = vld [vmem:[#allocation2 + $0x820] sm:$0xff]  ;;  %v7881_v44 = vcombine.low %v209_v30, %v213_v31 }
  0x90   :  { %v8024_v2 = vcombine.high %v352_v61, %v356_v63  ;;  %v472_v5 = vld [vmem:[#allocation2 + $0xbc0] sm:$0xff]  ;;  %v7786_v6 = vcombine.high %v113_v60, %v117_v56  ;;  %v8023_v8 = vcombine.low %v352_v61, %v356_v63  ;;  %v7785_v9 = vcombine.low %v113_v60, %v117_v56  ;;  %v177_v63 = vld [vmem:[#allocation2 + $0x288] sm:$0xff] }
  0x91   :  { %2622 = vmatpush1.bf16.msra.mxu0 %v8055_v39  ;;  %2704 = vmatpush1.bf16.msra.mxu1 %v7817_v40  ;;  %v476_v7 = vld [vmem:[#allocation2 + $0xbe0] sm:$0xff]  ;;  %v205_v39 = vld [vmem:[#allocation2 + $0x368] sm:$0xff] }
  0x92   :  { %2623 = vmatprep.subr.bf16.mxu0 %v8048_v41  ;;  %2705 = vmatprep.subr.bf16.mxu1 %v7810_v45  ;;  %v8144_v10 = vcombine.high %v472_v5, %v476_v7  ;;  %v464_v14 = vld [vmem:[#allocation2 + $0xb80] sm:$0xff]  ;;  %v8143_v17 = vcombine.low %v472_v5, %v476_v7  ;;  %v7882_v41 = vcombine.high %v209_v30, %v213_v31  ;;  %v169_v7 = vld [vmem:[#allocation2 + $0x248] sm:$0xff] }
  0x93   :  { %v468_v16 = vld [vmem:[#allocation2 + $0xba0] sm:$0xff]  ;;  %v7873_v52 = vcombine.low %v201_v38, %v205_v39  ;;  %v277_v21 = vld [vmem:[#allocation2 + $0x5a8] sm:$0xff] }
  0x94   :  { %v8136_v19 = vcombine.high %v464_v14, %v468_v16  ;;  %v456_v23 = vld [vmem:[#allocation2 + $0xb40] sm:$0xff]  ;;  %v8135_v26 = vcombine.low %v464_v14, %v468_v16  ;;  %v265_v30 = vld [vmem:[#allocation2 + $0x548] sm:$0xff] }
  0x95   :  { %2624 = vmatpush1.bf16.msra.mxu0 %v8047_v47  ;;  %2706 = vmatpush1.bf16.msra.mxu1 %v7809_v48  ;;  %v460_v25 = vld [vmem:[#allocation2 + $0xb60] sm:$0xff]  ;;  %v197_v47 = vld [vmem:[#allocation2 + $0x328] sm:$0xff] }
  0x96   :  { %2625 = vmatprep.subr.bf16.mxu0 %v8040_v49  ;;  %2707 = vmatprep.subr.bf16.mxu1 %v7802_v53  ;;  %v8128_v29 = vcombine.high %v456_v23, %v460_v25  ;;  %v448_v32 = vld [vmem:[#allocation2 + $0xb00] sm:$0xff]  ;;  %v8127_v35 = vcombine.low %v456_v23, %v460_v25  ;;  %v7874_v49 = vcombine.high %v201_v38, %v205_v39  ;;  %v269_v31 = vld [vmem:[#allocation2 + $0x568] sm:$0xff] }
  0x97   :  { %v452_v34 = vld [vmem:[#allocation2 + $0xb20] sm:$0xff]  ;;  %v7865_v61 = vcombine.low %v193_v46, %v197_v47  ;;  %v401_v38 = vld [vmem:[#allocation2 + $0x988] sm:$0xff] }
  0x98   :  { %v8120_v37 = vcombine.high %v448_v32, %v452_v34  ;;  %v440_v40 = vld [vmem:[#allocation2 + $0xac0] sm:$0xff]  ;;  %v8119_v43 = vcombine.low %v448_v32, %v452_v34  ;;  %v7938_v34 = vcombine.high %v265_v30, %v269_v31  ;;  %v405_v39 = vld [vmem:[#allocation2 + $0x9a8] sm:$0xff] }
  0x99   :  { %2626 = vmatpush1.bf16.msra.mxu0 %v8039_v55  ;;  %2708 = vmatpush1.bf16.msra.mxu1 %v7801_v57  ;;  %v444_v42 = vld [vmem:[#allocation2 + $0xae0] sm:$0xff]  ;;  %v189_v55 = vld [vmem:[#allocation2 + $0x2e8] sm:$0xff] }
  0x9a   :  { %2627 = vmatprep.subr.bf16.mxu0 %v8032_v58  ;;  %2709 = vmatprep.subr.bf16.mxu1 %v7794_v62  ;;  %v8112_v45 = vcombine.high %v440_v40, %v444_v42  ;;  %v432_v48 = vld [vmem:[#allocation2 + $0xa80] sm:$0xff]  ;;  %v8111_v51 = vcombine.low %v440_v40, %v444_v42  ;;  %v7866_v58 = vcombine.high %v193_v46, %v197_v47  ;;  %v397_v46 = vld [vmem:[#allocation2 + $0x968] sm:$0xff] }
  0x9b   :  { %v436_v50 = vld [vmem:[#allocation2 + $0xaa0] sm:$0xff]  ;;  %v7857_v5 = vcombine.low %v185_v54, %v189_v55  ;;  %v7937_v40 = vcombine.low %v265_v30, %v269_v31  ;;  %v329_v30 = vld [vmem:[#allocation2 + $0x748] sm:$0xff] }
  0x9c   :  { %v8104_v53 = vcombine.high %v432_v48, %v436_v50  ;;  %v424_v57 = vld [vmem:[#allocation2 + $0xa40] sm:$0xff]  ;;  %v8103_v56 = vcombine.low %v432_v48, %v436_v50  ;;  %v8073_v48 = vcombine.low %v401_v38, %v405_v39  ;;  %v333_v31 = vld [vmem:[#allocation2 + $0x768] sm:$0xff] }
  0x9d   :  { %2628 = vmatpush1.bf16.msra.mxu0 %v8031_v0  ;;  %2710 = vmatpush1.bf16.msra.mxu1 %v7793_v1  ;;  %v428_v60 = vld [vmem:[#allocation2 + $0xa60] sm:$0xff]  ;;  %v181_v0 = vld [vmem:[#allocation2 + $0x2a8] sm:$0xff] }
  0x9e   :  { %2629 = vmatprep.subr.bf16.mxu0 %v8024_v2  ;;  %2711 = vmatprep.subr.bf16.mxu1 %v7786_v6  ;;  %v8096_v62 = vcombine.high %v424_v57, %v428_v60  ;;  %v416_v1 = vld [vmem:[#allocation2 + $0xa00] sm:$0xff]  ;;  %v7858_v2 = vcombine.high %v185_v54, %v189_v55  ;;  %v8095_v4 = vcombine.low %v424_v57, %v428_v60  ;;  %v389_v54 = vld [vmem:[#allocation2 + $0x928] sm:$0xff] }
  0x9f   :  { %v420_v3 = vld [vmem:[#allocation2 + $0xa20] sm:$0xff]  ;;  %v7849_v14 = vcombine.low %v177_v63, %v181_v0  ;;  %v233_v60 = vld [vmem:[#allocation2 + $0x448] sm:$0xff] }
  0xa0   :  { %v8088_v6 = vcombine.high %v416_v1, %v420_v3  ;;  %v8087_v13 = vcombine.low %v416_v1, %v420_v3  ;;  %v229_v3 = vld [vmem:[#allocation2 + $0x428] sm:$0xff] }
  0xa1   :  { %2630 = vmatpush1.bf16.msra.mxu0 %v8023_v8  ;;  %2712 = vmatpush1.bf16.msra.mxu1 %v7785_v9  ;;  %v173_v8 = vld [vmem:[#allocation2 + $0x268] sm:$0xff] }
  0xa2   :  { %2631 = vmatprep.subr.bf16.mxu0 %v8144_v10  ;;  %2713 = vmatprep.subr.bf16.mxu1 %v7778_v15  ;;  %v281_v9 = vld [vmem:[#allocation2 + $0x5c8] sm:$0xff]  ;;  %v7850_v10 = vcombine.high %v177_v63, %v181_v0  ;;  %v7842_v20 = vcombine.high %v169_v7, %v173_v8 }
  0xa3   :  { %v9132_v15 = vld [vmem:[%s9449_s0 + $0x10] ss:$28 sps:$4 sm:$0xff]   ;;  %v7954_v16 = vcombine.high %v281_v9, %v285_v11  ;;  %v7953_v23 = vcombine.low %v281_v9, %v285_v11 }
  0xa4   :  { %v349_v11 = vld [vmem:[#allocation2 + $0x7e8] sm:$0xff] }
  0xa5   :  { %2632 = vmatpush2.bf16.msra.mxu0 %v8143_v17  ;;  %2714 = vmatpush1.bf16.msra.mxu1 %v7777_v18  ;;  %v161_v17 = vld [vmem:[#allocation2 + $0x208] sm:$0xff] }
  0xa6   :  { %2633 = vmatprep.subr.bf16.mxu0 %v8136_v19  ;;  %2715 = vmatprep.subr.bf16.mxu1 %v7770_v24  ;;  %v165_v18 = vld [vmem:[#allocation2 + $0x228] sm:$0xff]  ;;  %v7841_v24 = vcombine.low %v169_v7, %v173_v8 }
  0xa7   :  { %v273_v19 = vld [vmem:[#allocation2 + $0x588] sm:$0xff] }
  0xa8   :  { %v7946_v25 = vcombine.high %v273_v19, %v277_v21  ;;  %v7945_v32 = vcombine.low %v273_v19, %v277_v21  ;;  %v341_v21 = vld [vmem:[#allocation2 + $0x7a8] sm:$0xff] }
  0xa9   :  { %2634 = vmatpush2.bf16.msra.mxu0 %v8135_v26  ;;  %2716 = vmatpush1.bf16.msra.mxu1 %v7769_v27  ;;  %v409_v26 = vld [vmem:[#allocation2 + $0x9c8] sm:$0xff] }
  0xaa   :  { %2635 = vmatprep.subr.bf16.mxu0 %v8128_v29  ;;  %2717 = vmatprep.subr.bf16.mxu1 %v7890_v33  ;;  %v413_v27 = vld [vmem:[#allocation2 + $0x9e8] sm:$0xff]  ;;  %v7834_v29 = vcombine.high %v161_v17, %v165_v18  ;;  %v7833_v33 = vcombine.low %v161_v17, %v165_v18 }
  0xad   :  { %2636 = vmatpush2.bf16.msra.mxu0 %v8127_v35  ;;  %2718 = vmatpush2.bf16.msra.mxu1 %v7889_v36  ;;  %v257_v35 = vld [vmem:[#allocation2 + $0x508] sm:$0xff]  ;;  %v8082_v36 = vcombine.high %v409_v26, %v413_v27 }
  0xae   :  { %2637 = vmatprep.subr.bf16.mxu0 %v8120_v37  ;;  %2719 = vmatprep.subr.bf16.mxu1 %v7882_v41  ;;  %v261_v37 = vld [vmem:[#allocation2 + $0x528] sm:$0xff]  ;;  %v8081_v41 = vcombine.low %v409_v26, %v413_v27 }
  0xaf   :  { %v7930_v42 = vcombine.high %v257_v35, %v261_v37  ;;  %v7929_v47 = vcombine.low %v257_v35, %v261_v37 }
  0xb1   :  { %2638 = vmatpush2.bf16.msra.mxu0 %v8119_v43  ;;  %2720 = vmatpush2.bf16.msra.mxu1 %v7881_v44  ;;  %v8074_v43 = vcombine.high %v401_v38, %v405_v39  ;;  %v249_v44 = vld [vmem:[#allocation2 + $0x4c8] sm:$0xff] }
  0xb2   :  { %2639 = vmatprep.subr.bf16.mxu0 %v8112_v45  ;;  %2721 = vmatprep.subr.bf16.mxu1 %v7874_v49  ;;  %v393_v45 = vld [vmem:[#allocation2 + $0x948] sm:$0xff] }
  0xb3   :  { %v8066_v50 = vcombine.high %v393_v45, %v397_v46  ;;  %v8065_v57 = vcombine.low %v393_v45, %v397_v46  ;;  %v321_v38 = vld [vmem:[#allocation2 + $0x708] sm:$0xff] }
  0xb4   :  { %v325_v39 = vld [vmem:[#allocation2 + $0x728] sm:$0xff] }
  0xb5   :  { %2640 = vmatpush2.bf16.msra.mxu0 %v8111_v51  ;;  %2722 = vmatpush2.bf16.msra.mxu1 %v7873_v52  ;;  %v241_v51 = vld [vmem:[#allocation2 + $0x488] sm:$0xff] }
  0xb6   :  { %2641 = vmatprep.subr.bf16.mxu0 %v8104_v53  ;;  %2723 = vmatprep.subr.bf16.mxu1 %v7866_v58  ;;  %v245_v52 = vld [vmem:[#allocation2 + $0x4a8] sm:$0xff] }
  0xb7   :  { %v385_v53 = vld [vmem:[#allocation2 + $0x908] sm:$0xff]  ;;  %v7913_v63 = vcombine.low %v241_v51, %v245_v52 }
  0xb8   :  { %v8058_v58 = vcombine.high %v385_v53, %v389_v54  ;;  %v8057_v0 = vcombine.low %v385_v53, %v389_v54  ;;  %v313_v45 = vld [vmem:[#allocation2 + $0x6c8] sm:$0xff] }
  0xb9   :  { %2642 = vmatpush2.bf16.msra.mxu0 %v8103_v56  ;;  %2724 = vmatpush2.bf16.msra.mxu1 %v7865_v61  ;;  %v237_v56 = vld [vmem:[#allocation2 + $0x468] sm:$0xff] }
  0xba   :  { %2643 = vmatprep.subr.bf16.mxu0 %v8096_v62  ;;  %2725 = vmatprep.subr.bf16.mxu1 %v7858_v2  ;;  %v377_v61 = vld [vmem:[#allocation2 + $0x8c8] sm:$0xff] }
  0xbb   :  { %v381_v62 = vld [vmem:[#allocation2 + $0x8e8] sm:$0xff] }
  0xbc   :  { %v8050_v1 = vcombine.high %v377_v61, %v381_v62  ;;  %v225_v2 = vld [vmem:[#allocation2 + $0x408] sm:$0xff]  ;;  %v8049_v7 = vcombine.low %v377_v61, %v381_v62 }
  0xbd   :  { %2644 = vmatpush2.bf16.msra.mxu0 %v8095_v4  ;;  %2726 = vmatpush2.bf16.msra.mxu1 %v7857_v5  ;;  %v369_v4 = vld [vmem:[#allocation2 + $0x888] sm:$0xff]  ;;  %v7898_v8 = vcombine.high %v225_v2, %v229_v3 }
  0xbe   :  { %2645 = vmatprep.subr.bf16.mxu0 %v8088_v6  ;;  %2727 = vmatprep.subr.bf16.mxu1 %v7850_v10  ;;  %v373_v5 = vld [vmem:[#allocation2 + $0x8a8] sm:$0xff]  ;;  %v7905_v6 = vcombine.low %v233_v60, %v237_v56 }
  0xbf   :  { %v8042_v9 = vcombine.high %v369_v4, %v373_v5  ;;  %v345_v10 = vld [vmem:[#allocation2 + $0x7c8] sm:$0xff]  ;;  %v8041_v17 = vcombine.low %v369_v4, %v373_v5 }
  0xc0   :  { %v8018_v18 = vcombine.high %v345_v10, %v349_v11  ;;  %v317_v46 = vld [vmem:[#allocation2 + $0x6e8] sm:$0xff] }
  0xc1   :  { %2646 = vmatpush2.bf16.msra.mxu0 %v8087_v13  ;;  %2728 = vmatpush2.bf16.msra.mxu1 %v7849_v14  ;;  %v361_v13 = vld [vmem:[#allocation2 + $0x848] sm:$0xff] }
  0xc2   :  { %2744 = vmatprep.subr.bf16.mxu0 %v7954_v16  ;;  %2729 = vmatprep.subr.bf16.mxu1 %v7842_v20  ;;  %v365_v14 = vld [vmem:[#allocation2 + $0x868] sm:$0xff]  ;;  %v7897_v16 = vcombine.low %v225_v2, %v229_v3 }
  0xc3   :  { %v8034_v19 = vcombine.high %v361_v13, %v365_v14  ;;  %v337_v20 = vld [vmem:[#allocation2 + $0x788] sm:$0xff]  ;;  %v8033_v26 = vcombine.low %v361_v13, %v365_v14 }
  0xc4   :  { %2648 = vmatmul.mubr.bf16.vlgmr.msra.gmra.mxu0 %v9132_v15  ;;  %v8010_v27 = vcombine.high %v337_v20, %v341_v21  ;;  %v305_v53 = vld [vmem:[#allocation2 + $0x688] sm:$0xff] }
  0xc5   :  { %2745 = vmatpush1.bf16.msra.mxu0 %v7953_v23  ;;  %2776 = vmatprep.mubr.bf16.mxu0 %v9104_v59  ;;  %v253_v59 = vld [vmem:[#allocation2 + $0x4e8] sm:$0xff] }
  0xc6   :  { %2730 = vmatpush2.bf16.msra.mxu1 %v7841_v24  ;;  %2746 = vmatprep.subr.bf16.mxu0 %v7946_v25  ;;  %v7922_v49 = vcombine.high %v249_v44, %v253_v59  ;;  %v7921_v55 = vcombine.low %v249_v44, %v253_v59  ;;  %v353_v23 = vld [vmem:[#allocation2 + $0x808] sm:$0xff]  ;;  %v8017_v25 = vcombine.low %v345_v10, %v349_v11 }
  0xc7   :  { %2731 = vmatprep.subr.bf16.mxu1 %v7834_v29  ;;  %v357_v24 = vld [vmem:[#allocation2 + $0x828] sm:$0xff]  ;;  %v7994_v44 = vcombine.high %v321_v38, %v325_v39 }
  0xc8   :  { %v8026_v29 = vcombine.high %v353_v23, %v357_v24  ;;  %v8025_v35 = vcombine.low %v353_v23, %v357_v24  ;;  %v309_v54 = vld [vmem:[#allocation2 + $0x6a8] sm:$0xff]  ;;  %v154_v23 = vld [vmem:[#allocation2 + $0x1d0] sm:$0xff] }
  0xc9   :  { %2747 = vmatpush1.bf16.msra.mxu0 %v7945_v32  ;;  %v473_v32 = vld [vmem:[#allocation2 + $0xbc8] sm:$0xff]  ;;  %v158_v24 = vld [vmem:[#allocation2 + $0x1f0] sm:$0xff] }
  0xca   :  { %2732 = vmatpush2.bf16.msra.mxu1 %v7833_v33  ;;  %2748 = vmatprep.subr.bf16.mxu0 %v7938_v34  ;;  %v477_v33 = vld [vmem:[#allocation2 + $0xbe8] sm:$0xff]  ;;  %v8009_v34 = vcombine.low %v337_v20, %v341_v21 }
  0xcb   :  { %2787 = vmatprep.subr.bf16.mxu1 %v8082_v36  ;;  %v8002_v36 = vcombine.high %v329_v30, %v333_v31  ;;  %v8146_v37 = vcombine.high %v473_v32, %v477_v33  ;;  %v297_v61 = vld [vmem:[#allocation2 + $0x648] sm:$0xff] }
  0xcc   :  { %v301_v62 = vld [vmem:[#allocation2 + $0x668] sm:$0xff] }
  0xcd   :  { %2734 = vmatmul.mubr.bf16.vlgmr.msra.gmra.mxu1 %v9111_v12  ;;  %2749 = vmatpush1.bf16.msra.mxu0 %v7937_v40  ;;  %v7914_v12 = vcombine.high %v241_v51, %v245_v52  ;;  %v465_v40 = vld [vmem:[#allocation2 + $0xb88] sm:$0xff]  ;;  %v7986_v51 = vcombine.high %v313_v45, %v317_v46  ;;  %v7970_v2 = vcombine.high %v297_v61, %v301_v62 }
  0xce   :  { %2788 = vmatpush1.bf16.msra.mxu1 %v8081_v41  ;;  %2750 = vmatprep.subr.bf16.mxu0 %v7930_v42  ;;  %v469_v41 = vld [vmem:[#allocation2 + $0xba8] sm:$0xff]  ;;  %v8001_v42 = vcombine.low %v329_v30, %v333_v31  ;;  %v7828_v30 = vcombine.high %v154_v23, %v158_v24 }
  0xcf   :  { %2789 = vmatprep.subr.bf16.mxu1 %v8074_v43  ;;  %2819 = vmatprep.mubr.bf16.mxu1 %v9120_v22  ;;  %v7906_v22 = vcombine.high %v233_v60, %v237_v56  ;;  %v8145_v43 = vcombine.low %v473_v32, %v477_v33  ;;  %v8138_v59 = vcombine.high %v465_v40, %v469_v41  ;;  %v289_v4 = vld [vmem:[#allocation2 + $0x608] sm:$0xff]  ;;  %v282_v33 = vld [vmem:[#allocation2 + $0x5d0] sm:$0xff] }
  0xd0   :  { %v7978_v60 = vcombine.high %v305_v53, %v309_v54  ;;  %v293_v5 = vld [vmem:[#allocation2 + $0x628] sm:$0xff] }
  0xd1   :  { %2751 = vmatpush1.bf16.msra.mxu0 %v7929_v47  ;;  %v457_v47 = vld [vmem:[#allocation2 + $0xb48] sm:$0xff]  ;;  %v7962_v10 = vcombine.high %v289_v4, %v293_v5 }
  0xd2   :  { %2790 = vmatpush1.bf16.msra.mxu1 %v8073_v48  ;;  %2752 = vmatprep.subr.bf16.mxu0 %v7922_v49  ;;  %v461_v48 = vld [vmem:[#allocation2 + $0xb68] sm:$0xff]  ;;  %v7993_v49 = vcombine.low %v321_v38, %v325_v39  ;;  %v150_v38 = vld [vmem:[#allocation2 + $0x1b0] sm:$0xff] }
  0xd3   :  { %2791 = vmatprep.subr.bf16.mxu1 %v8066_v50  ;;  %v8137_v50 = vcombine.low %v465_v40, %v469_v41  ;;  %v8130_v52 = vcombine.high %v457_v47, %v461_v48  ;;  %v481_v13 = vld [vmem:[#allocation2 + $0xc08] sm:$0xff]  ;;  %v274_v39 = vld [vmem:[#allocation2 + $0x590] sm:$0xff]  ;;  %v7827_v41 = vcombine.low %v154_v23, %v158_v24 }
  0xd4   :  { %v485_v14 = vld [vmem:[#allocation2 + $0xc28] sm:$0xff]  ;;  %v278_v40 = vld [vmem:[#allocation2 + $0x5b0] sm:$0xff] }
  0xd5   :  { %2753 = vmatpush1.bf16.msra.mxu0 %v7921_v55  ;;  %v449_v55 = vld [vmem:[#allocation2 + $0xb08] sm:$0xff]  ;;  %v8154_v20 = vcombine.high %v481_v13, %v485_v14  ;;  %v98_v24 = vld [vmem:[#allocation2 + $0x10] sm:$0xff] }
  0xd6   :  { %2792 = vmatpush1.bf16.msra.mxu1 %v8065_v57  ;;  %2754 = vmatprep.subr.bf16.mxu0 %v7914_v12  ;;  %v453_v57 = vld [vmem:[#allocation2 + $0xb28] sm:$0xff]  ;;  %v7985_v12 = vcombine.low %v313_v45, %v317_v46  ;;  %v142_v45 = vld [vmem:[#allocation2 + $0x170] sm:$0xff] }
  0xd7   :  { %2793 = vmatprep.subr.bf16.mxu1 %v8058_v58  ;;  %v8129_v58 = vcombine.low %v457_v47, %v461_v48  ;;  %v8122_v56 = vcombine.high %v449_v55, %v453_v57  ;;  %v9141_v32 = vld [vmem:[%s9449_s0 + $0x8] ss:$28 sps:$4 sm:$0xff]   ;;  %v9148_v46 = vld [vmem:[%s9449_s0 + $0x18] ss:$28 sps:$4 sm:$0xff]  }
  0xd8   :  { %v266_v47 = vld [vmem:[#allocation2 + $0x550] sm:$0xff] }
  0xd9   :  { %2755 = vmatpush1.bf16.msra.mxu0 %v7913_v63  ;;  %v441_v63 = vld [vmem:[#allocation2 + $0xac8] sm:$0xff]  ;;  %v270_v48 = vld [vmem:[#allocation2 + $0x570] sm:$0xff] }
  0xda   :  { %2794 = vmatpush1.bf16.msra.mxu1 %v8057_v0  ;;  %2756 = vmatprep.subr.bf16.mxu0 %v7906_v22  ;;  %v445_v0 = vld [vmem:[#allocation2 + $0xae8] sm:$0xff]  ;;  %v7977_v22 = vcombine.low %v305_v53, %v309_v54  ;;  %v130_v53 = vld [vmem:[#allocation2 + $0x110] sm:$0xff] }
  0xdb   :  { %2795 = vmatprep.subr.bf16.mxu1 %v8050_v1  ;;  %v8121_v1 = vcombine.low %v449_v55, %v453_v57  ;;  %v8114_v3 = vcombine.high %v441_v63, %v445_v0  ;;  %v134_v54 = vld [vmem:[#allocation2 + $0x130] sm:$0xff]  ;;  %v9156_v55 = vld [vmem:[%s9449_s0 + $0x4] ss:$28 sps:$4 sm:$0xff]  }
  0xdc   :  { %v258_v57 = vld [vmem:[#allocation2 + $0x510] sm:$0xff] }
  0xdd   :  { %2757 = vmatpush1.bf16.msra.mxu0 %v7905_v6  ;;  %v433_v6 = vld [vmem:[#allocation2 + $0xa88] sm:$0xff] }
  0xde   :  { %2796 = vmatpush1.bf16.msra.mxu1 %v8049_v7  ;;  %2758 = vmatprep.subr.bf16.mxu0 %v7898_v8  ;;  %v437_v7 = vld [vmem:[#allocation2 + $0xaa8] sm:$0xff]  ;;  %v7969_v8 = vcombine.low %v297_v61, %v301_v62  ;;  %v122_v62 = vld [vmem:[#allocation2 + $0xd0] sm:$0xff] }
  0xdf   :  { %2797 = vmatprep.subr.bf16.mxu1 %v8042_v9  ;;  %v8113_v9 = vcombine.low %v441_v63, %v445_v0  ;;  %v8106_v11 = vcombine.high %v433_v6, %v437_v7  ;;  %v126_v63 = vld [vmem:[#allocation2 + $0xf0] sm:$0xff] }
  0xe0   :  { %v250_v0 = vld [vmem:[#allocation2 + $0x4d0] sm:$0xff] }
  0xe1   :  { %2759 = vmatpush1.bf16.msra.mxu0 %v7897_v16  ;;  %v425_v16 = vld [vmem:[#allocation2 + $0xa48] sm:$0xff] }
  0xe2   :  { %2798 = vmatpush1.bf16.msra.mxu1 %v8041_v17  ;;  %2760 = vmatprep.subr.bf16.mxu0 %v8018_v18  ;;  %v429_v17 = vld [vmem:[#allocation2 + $0xa68] sm:$0xff]  ;;  %v7961_v18 = vcombine.low %v289_v4, %v293_v5  ;;  %v114_v5 = vld [vmem:[#allocation2 + $0x90] sm:$0xff] }
  0xe3   :  { %2799 = vmatprep.subr.bf16.mxu1 %v8034_v19  ;;  %v8105_v19 = vcombine.low %v433_v6, %v437_v7  ;;  %v8098_v21 = vcombine.high %v425_v16, %v429_v17  ;;  %v118_v6 = vld [vmem:[#allocation2 + $0xb0] sm:$0xff] }
  0xe4   :  { %v242_v7 = vld [vmem:[#allocation2 + $0x490] sm:$0xff] }
  0xe5   :  { %2761 = vmatpush2.bf16.msra.mxu0 %v8017_v25  ;;  %v417_v25 = vld [vmem:[#allocation2 + $0xa08] sm:$0xff] }
  0xe6   :  { %2800 = vmatpush1.bf16.msra.mxu1 %v8033_v26  ;;  %2762 = vmatprep.subr.bf16.mxu0 %v8010_v27  ;;  %v421_v26 = vld [vmem:[#allocation2 + $0xa28] sm:$0xff]  ;;  %v8153_v27 = vcombine.low %v481_v13, %v485_v14  ;;  %v106_v14 = vld [vmem:[#allocation2 + $0x50] sm:$0xff] }
  0xe7   :  { %2801 = vmatprep.subr.bf16.mxu1 %v8026_v29  ;;  %v8097_v29 = vcombine.low %v425_v16, %v429_v17  ;;  %v8090_v31 = vcombine.high %v417_v25, %v421_v26  ;;  %v110_v16 = vld [vmem:[#allocation2 + $0x70] sm:$0xff] }
  0xe8   :  { %v234_v17 = vld [vmem:[#allocation2 + $0x450] sm:$0xff] }
  0xe9   :  { %2763 = vmatpush2.bf16.msra.mxu0 %v8009_v34  ;;  %v286_v34 = vld [vmem:[#allocation2 + $0x5f0] sm:$0xff] }
  0xea   :  { %2802 = vmatpush1.bf16.msra.mxu1 %v8025_v35  ;;  %2764 = vmatprep.subr.bf16.mxu0 %v8002_v36  ;;  %v8089_v35 = vcombine.low %v417_v25, %v421_v26  ;;  %v7956_v36 = vcombine.high %v282_v33, %v286_v34  ;;  %v102_v25 = vld [vmem:[#allocation2 + $0x30] sm:$0xff] }
  0xeb   :  { %2803 = vmatprep.subr.bf16.mxu1 %v8146_v37  ;;  %v146_v37 = vld [vmem:[#allocation2 + $0x190] sm:$0xff] }
  0xec   :  { %v226_v26 = vld [vmem:[#allocation2 + $0x410] sm:$0xff] }
  0xed   :  { %2765 = vmatpush2.bf16.msra.mxu0 %v8001_v42  ;;  %v7955_v42 = vcombine.low %v282_v33, %v286_v34  ;;  %v218_v34 = vld [vmem:[#allocation2 + $0x3d0] sm:$0xff] }
  0xee   :  { %2804 = vmatpush2.bf16.msra.mxu1 %v8145_v43  ;;  %2766 = vmatprep.subr.bf16.mxu0 %v7994_v44  ;;  %v7820_v43 = vcombine.high %v146_v37, %v150_v38  ;;  %v7948_v44 = vcombine.high %v274_v39, %v278_v40 }
  0xef   :  { %2805 = vmatprep.subr.bf16.mxu1 %v8138_v59  ;;  %v138_v59 = vld [vmem:[#allocation2 + $0x150] sm:$0xff] }
  0xf1   :  { %2767 = vmatpush2.bf16.msra.mxu0 %v7993_v49  ;;  %v7819_v49 = vcombine.low %v146_v37, %v150_v38  ;;  %v350_v37 = vld [vmem:[#allocation2 + $0x7f0] sm:$0xff]  ;;  %v7771_v38 = vcombine.low %v98_v24, %v102_v25 }
  0xf2   :  { %2806 = vmatpush2.bf16.msra.mxu1 %v8137_v50  ;;  %2768 = vmatprep.subr.bf16.mxu0 %v7986_v51  ;;  %v7947_v50 = vcombine.low %v274_v39, %v278_v40  ;;  %v7812_v51 = vcombine.high %v138_v59, %v142_v45 }
  0xf3   :  { %2807 = vmatprep.subr.bf16.mxu1 %v8130_v52  ;;  %v7940_v52 = vcombine.high %v266_v47, %v270_v48 }
  0xf5   :  { %2769 = vmatpush2.bf16.msra.mxu0 %v7985_v12  ;;  %v262_v12 = vld [vmem:[#allocation2 + $0x530] sm:$0xff] }
  0xf6   :  { %2808 = vmatpush2.bf16.msra.mxu1 %v8129_v58  ;;  %2770 = vmatprep.subr.bf16.mxu0 %v7978_v60  ;;  %v7811_v58 = vcombine.low %v138_v59, %v142_v45  ;;  %v7939_v60 = vcombine.low %v266_v47, %v270_v48  ;;  %v7932_v61 = vcombine.high %v258_v57, %v262_v12  ;;  %v342_v59 = vld [vmem:[#allocation2 + $0x7b0] sm:$0xff] }
  0xf7   :  { %2809 = vmatprep.subr.bf16.mxu1 %v8122_v56  ;;  %v7804_v56 = vcombine.high %v130_v53, %v134_v54 }
  0xf9   :  { %2771 = vmatpush2.bf16.msra.mxu0 %v7977_v22  ;;  %v254_v22 = vld [vmem:[#allocation2 + $0x4f0] sm:$0xff] }
  0xfa   :  { %2810 = vmatpush2.bf16.msra.mxu1 %v8121_v1  ;;  %2772 = vmatprep.subr.bf16.mxu0 %v7970_v2  ;;  %v7803_v1 = vcombine.low %v130_v53, %v134_v54  ;;  %v7931_v2 = vcombine.low %v258_v57, %v262_v12  ;;  %v7924_v4 = vcombine.high %v250_v0, %v254_v22  ;;  %v334_v53 = vld [vmem:[#allocation2 + $0x770] sm:$0xff] }
  0xfb   :  { %2811 = vmatprep.subr.bf16.mxu1 %v8114_v3  ;;  %v7796_v3 = vcombine.high %v122_v62, %v126_v63 }
  0xfd   :  { %2773 = vmatpush2.bf16.msra.mxu0 %v7969_v8  ;;  %v246_v8 = vld [vmem:[#allocation2 + $0x4b0] sm:$0xff] }
  0xfe   :  { %2812 = vmatpush2.bf16.msra.mxu1 %v8113_v9  ;;  %2774 = vmatprep.subr.bf16.mxu0 %v7962_v10  ;;  %v7795_v9 = vcombine.low %v122_v62, %v126_v63  ;;  %v7923_v10 = vcombine.low %v250_v0, %v254_v22  ;;  %v7916_v13 = vcombine.high %v242_v7, %v246_v8  ;;  %v326_v62 = vld [vmem:[#allocation2 + $0x730] sm:$0xff] }
  0xff   :  { %2813 = vmatprep.subr.bf16.mxu1 %v8106_v11  ;;  %v7788_v11 = vcombine.high %v114_v5, %v118_v6 }
 0x101   :  { %2775 = vmatpush2.bf16.msra.mxu0 %v7961_v18  ;;  %v238_v18 = vld [vmem:[#allocation2 + $0x470] sm:$0xff] }
 0x102   :  { %2814 = vmatpush2.bf16.msra.mxu1 %v8105_v19  ;;  %2844 = vmatprep.subr.bf16.mxu0 %v8154_v20  ;;  %v7787_v19 = vcombine.low %v114_v5, %v118_v6  ;;  %v7915_v20 = vcombine.low %v242_v7, %v246_v8  ;;  %v7908_v23 = vcombine.high %v234_v17, %v238_v18  ;;  %v318_v5 = vld [vmem:[#allocation2 + $0x6f0] sm:$0xff]  ;;  %v490_v7 = vlaneseq }
 0x103   :  { %2815 = vmatprep.subr.bf16.mxu1 %v8098_v21  ;;  %v7780_v21 = vcombine.high %v106_v14, %v110_v16 }
 0x104   :  { %2777 = vmatmul.mubr.bf16.vlgmr.msra.gmra.mxu0 %v9141_v32 }
 0x105   :  { %2845 = vmatpush1.bf16.msra.mxu0 %v8153_v27  ;;  %2862 = vmatprep.mubr.bf16.mxu0 %v9045_v28  ;;  %v230_v27 = vld [vmem:[#allocation2 + $0x430] sm:$0xff] }
 0x106   :  { %2816 = vmatpush2.bf16.msra.mxu1 %v8097_v29  ;;  %2873 = vmatprep.subr.bf16.mxu0 %v7828_v30  ;;  %v7779_v29 = vcombine.low %v106_v14, %v110_v16  ;;  %v7907_v30 = vcombine.low %v234_v17, %v238_v18  ;;  %v7900_v33 = vcombine.high %v226_v26, %v230_v27  ;;  %v306_v14 = vld [vmem:[#allocation2 + $0x690] sm:$0xff]  ;;  %v9165_v18 = vshrl.u32 %v490_v7, 7 }
 0x107   :  { %2817 = vmatprep.subr.bf16.mxu1 %v8090_v31  ;;  %v7772_v31 = vcombine.high %v98_v24, %v102_v25  ;;  %v7899_v39 = vcombine.low %v226_v26, %v230_v27  ;;  %v310_v16 = vld [vmem:[#allocation2 + $0x6b0] sm:$0xff] }
 0x108   :  { %v174_v24 = vld [vmem:[#allocation2 + $0x270] sm:$0xff] }
 0x109   :  { %v298_v25 = vld [vmem:[#allocation2 + $0x650] sm:$0xff] }
 0x10a   :  { %2818 = vmatpush2.bf16.msra.mxu1 %v8089_v35  ;;  %v222_v35 = vld [vmem:[#allocation2 + $0x3f0] sm:$0xff] }
 0x10b   :  { %2916 = vmatprep.subr.bf16.mxu1 %v7956_v36  ;;  %v346_v36 = vld [vmem:[#allocation2 + $0x7d0] sm:$0xff]  ;;  %v7892_v40 = vcombine.high %v218_v34, %v222_v35  ;;  %v7891_v45 = vcombine.low %v218_v34, %v222_v35 }
 0x10c   :  { %8160 = vmatmul.mubr.msk.bf16.vlgmr.msra.gmra.mxu0 %vm2525_vm0, %v9148_v46  ;;  %v8019_v47 = vcombine.low %v346_v36, %v350_v37  ;;  %v302_v26 = vld [vmem:[#allocation2 + $0x670] sm:$0xff] }
 0x10d   :  { %2820 = vmatmul.mubr.bf16.vlgmr.msra.gmra.mxu1 %v9132_v15  ;;  %2874 = vmatpush1.bf16.msra.mxu0 %v7827_v41  ;;  %v9162_v15 = vld [vmem:[%s9449_s0 + $0xc] ss:$28 sps:$4 sm:$0xff]   ;;  %v8020_v41 = vcombine.high %v346_v36, %v350_v37  ;;  %v7972_v34 = vcombine.high %v298_v25, %v302_v26  ;;  %v162_v35 = vld [vmem:[#allocation2 + $0x210] sm:$0xff] }
 0x10e   :  { %2917 = vmatpush1.bf16.msra.mxu1 %v7955_v42  ;;  %2875 = vmatprep.subr.bf16.mxu0 %v7820_v43  ;;  %v210_v42 = vld [vmem:[#allocation2 + $0x390] sm:$0xff] }
 0x10f   :  { %2918 = vmatprep.subr.bf16.mxu1 %v7948_v44  ;;  %2905 = vmatprep.mubr.bf16.mxu0 %v9156_v55  ;;  %v214_v43 = vld [vmem:[#allocation2 + $0x3b0] sm:$0xff] }
 0x110   :  { %2948 = vmatprep.mubr.bf16.mxu1 %v9162_v15  ;;  %v338_v44 = vld [vmem:[#allocation2 + $0x790] sm:$0xff]  ;;  %v7884_v48 = vcombine.high %v210_v42, %v214_v43  ;;  %v7883_v54 = vcombine.low %v210_v42, %v214_v43 }
 0x111   :  { %2876 = vmatpush1.bf16.msra.mxu0 %v7819_v49  ;;  %v8012_v49 = vcombine.high %v338_v44, %v342_v59  ;;  %v8011_v57 = vcombine.low %v338_v44, %v342_v59  ;;  %v166_v36 = vld [vmem:[#allocation2 + $0x230] sm:$0xff] }
 0x112   :  { %2919 = vmatpush1.bf16.msra.mxu1 %v7947_v50  ;;  %2877 = vmatprep.subr.bf16.mxu0 %v7812_v51  ;;  %v202_v50 = vld [vmem:[#allocation2 + $0x350] sm:$0xff]  ;;  %v7836_v42 = vcombine.high %v162_v35, %v166_v36 }
 0x113   :  { %2920 = vmatprep.subr.bf16.mxu1 %v7940_v52  ;;  %v206_v51 = vld [vmem:[#allocation2 + $0x370] sm:$0xff] }
 0x114   :  { %v330_v52 = vld [vmem:[#allocation2 + $0x750] sm:$0xff]  ;;  %v7876_v12 = vcombine.high %v202_v50, %v206_v51  ;;  %v7875_v63 = vcombine.low %v202_v50, %v206_v51  ;;  %v7835_v51 = vcombine.low %v162_v35, %v166_v36 }
 0x115   :  { %2878 = vmatpush1.bf16.msra.mxu0 %v7811_v58  ;;  %v8004_v58 = vcombine.high %v330_v52, %v334_v53  ;;  %v8003_v0 = vcombine.low %v330_v52, %v334_v53  ;;  %v290_v37 = vld [vmem:[#allocation2 + $0x610] sm:$0xff] }
 0x116   :  { %2921 = vmatpush1.bf16.msra.mxu1 %v7939_v60  ;;  %2879 = vmatprep.subr.bf16.mxu0 %v7804_v56  ;;  %v194_v60 = vld [vmem:[#allocation2 + $0x310] sm:$0xff] }
 0x117   :  { %2922 = vmatprep.subr.bf16.mxu1 %v7932_v61  ;;  %v198_v56 = vld [vmem:[#allocation2 + $0x330] sm:$0xff] }
 0x118   :  { %v322_v61 = vld [vmem:[#allocation2 + $0x710] sm:$0xff]  ;;  %v7868_v22 = vcombine.high %v194_v60, %v198_v56  ;;  %v7867_v6 = vcombine.low %v194_v60, %v198_v56 }
 0x119   :  { %2880 = vmatpush1.bf16.msra.mxu0 %v7803_v1  ;;  %v7996_v1 = vcombine.high %v322_v61, %v326_v62  ;;  %v7995_v8 = vcombine.low %v322_v61, %v326_v62  ;;  %v410_v44 = vld [vmem:[#allocation2 + $0x9d0] sm:$0xff]  ;;  %v155_v62 = vld [vmem:[#allocation2 + $0x1d8] sm:$0xff] }
 0x11a   :  { %2923 = vmatpush1.bf16.msra.mxu1 %v7931_v2  ;;  %2881 = vmatprep.subr.bf16.mxu0 %v7796_v3  ;;  %v186_v2 = vld [vmem:[#allocation2 + $0x2d0] sm:$0xff] }
 0x11b   :  { %2924 = vmatprep.subr.bf16.mxu1 %v7924_v4  ;;  %v190_v3 = vld [vmem:[#allocation2 + $0x2f0] sm:$0xff] }
 0x11c   :  { %v314_v4 = vld [vmem:[#allocation2 + $0x6d0] sm:$0xff]  ;;  %v7859_v17 = vcombine.low %v186_v2, %v190_v3 }
 0x11d   :  { %2882 = vmatpush1.bf16.msra.mxu0 %v7795_v9  ;;  %v7860_v9 = vcombine.high %v186_v2, %v190_v3  ;;  %v414_v59 = vld [vmem:[#allocation2 + $0x9f0] sm:$0xff] }
 0x11e   :  { %2925 = vmatpush1.bf16.msra.mxu1 %v7923_v10  ;;  %2883 = vmatprep.subr.bf16.mxu0 %v7788_v11  ;;  %v7988_v10 = vcombine.high %v314_v4, %v318_v5  ;;  %v178_v11 = vld [vmem:[#allocation2 + $0x290] sm:$0xff] }
 0x11f   :  { %2926 = vmatprep.subr.bf16.mxu1 %v7916_v13  ;;  %v182_v13 = vld [vmem:[#allocation2 + $0x2b0] sm:$0xff] }
 0x120   :  { %v7851_v27 = vcombine.low %v178_v11, %v182_v13  ;;  %v402_v60 = vld [vmem:[#allocation2 + $0x990] sm:$0xff] }
 0x121   :  { %2884 = vmatpush1.bf16.msra.mxu0 %v7787_v19  ;;  %v7987_v19 = vcombine.low %v314_v4, %v318_v5  ;;  %v406_v56 = vld [vmem:[#allocation2 + $0x9b0] sm:$0xff] }
 0x122   :  { %2927 = vmatpush1.bf16.msra.mxu1 %v7915_v20  ;;  %2885 = vmatprep.subr.bf16.mxu0 %v7780_v21  ;;  %v7852_v20 = vcombine.high %v178_v11, %v182_v13  ;;  %v7980_v21 = vcombine.high %v306_v14, %v310_v16  ;;  %v8076_v3 = vcombine.high %v402_v60, %v406_v56  ;;  %v398_v7 = vld [vmem:[#allocation2 + $0x970] sm:$0xff] }
 0x123   :  { %2928 = vmatprep.subr.bf16.mxu1 %v7908_v23  ;;  %v170_v23 = vld [vmem:[#allocation2 + $0x250] sm:$0xff] }
 0x124   :  { %v386_v11 = vld [vmem:[#allocation2 + $0x910] sm:$0xff] }
 0x125   :  { %2886 = vmatpush1.bf16.msra.mxu0 %v7779_v29  ;;  %v492_v29 = vsub.s32 0, %v9165_v18  ;;  %v390_v13 = vld [vmem:[#allocation2 + $0x930] sm:$0xff] }
 0x126   :  { %2929 = vmatpush1.bf16.msra.mxu1 %v7907_v30  ;;  %2887 = vmatprep.subr.bf16.mxu0 %v7772_v31  ;;  %v7979_v30 = vcombine.low %v306_v14, %v310_v16  ;;  %v7844_v31 = vcombine.high %v170_v23, %v174_v24  ;;  %v147_v14 = vld [vmem:[#allocation2 + $0x198] sm:$0xff]  ;;  %v370_v35 = vld [vmem:[#allocation2 + $0x890] sm:$0xff] }
 0x127   :  { %2930 = vmatprep.subr.bf16.mxu1 %v7900_v33  ;;  %v9168_v33 = vld [vmem:[#allocation4] sm:$0xff]  ;;  %v151_v16 = vld [vmem:[#allocation2 + $0x1b8] sm:$0xff]  ;;  %v374_v36 = vld [vmem:[#allocation2 + $0x8b0] sm:$0xff] }
 0x129   :  { %2888 = vmatpush1.bf16.msra.mxu0 %v7771_v38  ;;  %v294_v38 = vld [vmem:[#allocation2 + $0x630] sm:$0xff] }
 0x12a   :  { %2931 = vmatpush1.bf16.msra.mxu1 %v7899_v39  ;;  %2889 = vmatprep.subr.bf16.mxu0 %v7892_v40  ;;  %v7843_v39 = vcombine.low %v170_v23, %v174_v24  ;;  %v493_v40 = vrot.slane %v9168_v33, %v492_v29  ;;  %v7964_v43 = vcombine.high %v290_v37, %v294_v38  ;;  %v378_v23 = vld [vmem:[#allocation2 + $0x8d0] sm:$0xff] }
 0x12b   :  { %2932 = vmatprep.subr.bf16.mxu1 %v8020_v41  ;;  %v7971_v41 = vcombine.low %v298_v25, %v302_v26  ;;  %v7963_v53 = vcombine.low %v290_v37, %v294_v38  ;;  %v382_v24 = vld [vmem:[#allocation2 + $0x8f0] sm:$0xff]  ;;  %v139_v25 = vld [vmem:[#allocation2 + $0x158] sm:$0xff] }
 0x12c   :  { %v143_v26 = vld [vmem:[#allocation2 + $0x178] sm:$0xff] }
 0x12d   :  { %2890 = vmatpush2.bf16.msra.mxu0 %v7891_v45  ;;  %v131_v37 = vld [vmem:[#allocation2 + $0x118] sm:$0xff] }
 0x12e   :  { %2933 = vmatpush2.bf16.msra.mxu1 %v8019_v47  ;;  %2891 = vmatprep.subr.bf16.mxu0 %v7884_v48  ;;  %v482_v47 = vld [vmem:[#allocation2 + $0xc10] sm:$0xff]  ;;  %v135_v38 = vld [vmem:[#allocation2 + $0x138] sm:$0xff] }
 0x12f   :  { %2934 = vmatprep.subr.bf16.mxu1 %v8012_v49  ;;  %v486_v48 = vld [vmem:[#allocation2 + $0xc30] sm:$0xff] }
 0x130   :  { %v8155_v2 = vcombine.low %v482_v47, %v486_v48 }
 0x131   :  { %2892 = vmatpush2.bf16.msra.mxu0 %v7883_v54  ;;  %v8084_v54 = vcombine.high %v410_v44, %v414_v59 }
 0x132   :  { %2935 = vmatpush2.bf16.msra.mxu1 %v8011_v57  ;;  %2893 = vmatprep.subr.bf16.mxu0 %v7876_v12 }
 0x133   :  { %2936 = vmatprep.subr.bf16.mxu1 %v8004_v58  ;;  %v8156_v58 = vcombine.high %v482_v47, %v486_v48  ;;  %v7805_v47 = vcombine.low %v131_v37, %v135_v38 }
 0x135   :  { %2894 = vmatpush2.bf16.msra.mxu0 %v7875_v63  ;;  %v159_v63 = vld [vmem:[#allocation2 + $0x1f8] sm:$0xff] }
 0x136   :  { %2937 = vmatpush2.bf16.msra.mxu1 %v8003_v0  ;;  %2895 = vmatprep.subr.bf16.mxu0 %v7868_v22  ;;  %v8083_v22 = vcombine.low %v410_v44, %v414_v59  ;;  %v7830_v5 = vcombine.high %v155_v62, %v159_v63  ;;  %v123_v44 = vld [vmem:[#allocation2 + $0xd8] sm:$0xff] }
 0x137   :  { %2938 = vmatprep.subr.bf16.mxu1 %v7996_v1  ;;  %v127_v59 = vld [vmem:[#allocation2 + $0xf8] sm:$0xff] }
 0x138   :  { %v7798_v48 = vcombine.high %v123_v44, %v127_v59 }
 0x139   :  { %2896 = vmatpush2.bf16.msra.mxu0 %v7867_v6  ;;  %v394_v6 = vld [vmem:[#allocation2 + $0x950] sm:$0xff] }
 0x13a   :  { %2939 = vmatpush2.bf16.msra.mxu1 %v7995_v8  ;;  %2897 = vmatprep.subr.bf16.mxu0 %v7860_v9  ;;  %v9184_v8 = vld [vmem:[%s9449_s0] ss:$28 sps:$4 sm:$0xff]   ;;  %v8075_v9 = vcombine.low %v402_v60, %v406_v56 }
 0x13b   :  { %2940 = vmatprep.subr.bf16.mxu1 %v7988_v10  ;;  %v8068_v10 = vcombine.high %v394_v6, %v398_v7 }
 0x13d   :  { %2898 = vmatpush2.bf16.msra.mxu0 %v7859_v17  ;;  %v9192_v17 = vld [vmem:[%s9449_s0 + $0x14] ss:$28 sps:$4 sm:$0xff]  }
 0x13e   :  { %2941 = vmatpush2.bf16.msra.mxu1 %v7987_v19  ;;  %2899 = vmatprep.subr.bf16.mxu0 %v7852_v20  ;;  %v7829_v19 = vcombine.low %v155_v62, %v159_v63  ;;  %v8060_v20 = vcombine.high %v386_v11, %v390_v13  ;;  %v478_v62 = vld [vmem:[#allocation2 + $0xbf0] sm:$0xff]  ;;  %v107_v63 = vld [vmem:[#allocation2 + $0x58] sm:$0xff] }
 0x13f   :  { %2942 = vmatprep.subr.bf16.mxu1 %v7980_v21  ;;  %v7822_v21 = vcombine.high %v147_v14, %v151_v16 }
 0x141   :  { %2900 = vmatpush2.bf16.msra.mxu0 %v7851_v27  ;;  %v8059_v27 = vcombine.low %v386_v11, %v390_v13 }
 0x142   :  { %2943 = vmatpush2.bf16.msra.mxu1 %v7979_v30  ;;  %2901 = vmatprep.subr.bf16.mxu0 %v7844_v31  ;;  %v7821_v30 = vcombine.low %v147_v14, %v151_v16  ;;  %v8052_v31 = vcombine.high %v378_v23, %v382_v24  ;;  %v458_v16 = vld [vmem:[#allocation2 + $0xb50] sm:$0xff] }
 0x143   :  { %2944 = vmatprep.subr.bf16.mxu1 %v7972_v34  ;;  %v7814_v34 = vcombine.high %v139_v25, %v143_v26 }
 0x144   :  { %v2563_v45 = vpop.f32.mrf.mxu0  ;;  %v2606_v50 = vpop.f32.mrf.mxu1 }
 0x145   :  { %v2564_v49 = vadd.f32 %v2563_v45, %v493_v40  ;;  %2902 = vmatpush2.bf16.msra.mxu0 %v7843_v39  ;;  %v8051_v39 = vcombine.low %v378_v23, %v382_v24  ;;  %v8043_v45 = vcombine.low %v370_v35, %v374_v36 }
 0x146   :  { %2945 = vmatpush2.bf16.msra.mxu1 %v7971_v41  ;;  %v9173_v52 = vpop.f32.mrf.mxu0  ;;  %2903 = vmatprep.subr.bf16.mxu0 %v7836_v42  ;;  %v9177_v12 = vpop.f32.mrf.mxu1  ;;  %v7806_v41 = vcombine.high %v131_v37, %v135_v38  ;;  %v362_v42 = vld [vmem:[#allocation2 + $0x850] sm:$0xff] }
 0x147   :  { %v9175_v57 = vadd.f32 %v2606_v50, %v2564_v49  ;;  %2946 = vmatprep.subr.bf16.mxu1 %v7964_v43  ;;  %v366_v43 = vld [vmem:[#allocation2 + $0x870] sm:$0xff] }
 0x148   :  { %v2567_v61 = vpop.f32.mrf.mxu0  ;;  %v2610_v1 = vpop.f32.mrf.mxu1  ;;  %v354_v49 = vld [vmem:[#allocation2 + $0x810] sm:$0xff] }
 0x149   :  { %v2568_v0 = vadd.f32 %v2567_v61, %v493_v40  ;;  %2904 = vmatpush2.bf16.msra.mxu0 %v7835_v51  ;;  %v7813_v40 = vcombine.low %v139_v25, %v143_v26  ;;  %v358_v50 = vld [vmem:[#allocation2 + $0x830] sm:$0xff]  ;;  %v115_v51 = vld [vmem:[#allocation2 + $0x98] sm:$0xff] }
 0x14a   :  { %2947 = vmatpush2.bf16.msra.mxu1 %v7963_v53  ;;  %2959 = vmatprep.subr.bf16.mxu0 %v8084_v54  ;;  %v119_v53 = vld [vmem:[#allocation2 + $0xb8] sm:$0xff]  ;;  %v8035_v54 = vcombine.low %v362_v42, %v366_v43  ;;  %v8028_v60 = vcombine.high %v354_v49, %v358_v50  ;;  %v474_v61 = vld [vmem:[#allocation2 + $0xbd0] sm:$0xff] }
 0x14b   :  { %v9179_v4 = vadd.f32 %v2610_v1, %v2568_v0  ;;  %3016 = vmatprep.subr.bf16.mxu1 %v8156_v58  ;;  %v7797_v58 = vcombine.low %v123_v44, %v127_v59  ;;  %v7790_v56 = vcombine.high %v115_v51, %v119_v53  ;;  %v111_v0 = vld [vmem:[#allocation2 + $0x78] sm:$0xff]  ;;  %v7789_v1 = vcombine.low %v115_v51, %v119_v53  ;;  %v450_v26 = vld [vmem:[#allocation2 + $0xb10] sm:$0xff] }
 0x14c   :  { %2906 = vmatmul.mubr.bf16.vlgmr.msra.gmra.mxu0 %v9184_v8  ;;  %v7781_v11 = vcombine.low %v107_v63, %v111_v0  ;;  %v442_v38 = vld [vmem:[#allocation2 + $0xad0] sm:$0xff] }
 0x14d   :  { %2949 = vmatmul.mubr.bf16.vlgmr.msra.gmra.mxu1 %v9141_v32  ;;  %2960 = vmatpush1.bf16.msra.mxu0 %v8083_v22  ;;  %v8067_v32 = vcombine.low %v394_v6, %v398_v7  ;;  %v8027_v22 = vcombine.low %v354_v49, %v358_v50  ;;  %v470_v6 = vld [vmem:[#allocation2 + $0xbb0] sm:$0xff]  ;;  %v99_v7 = vld [vmem:[#allocation2 + $0x18] sm:$0xff] }
 0x14e   :  { %3017 = vmatpush1.bf16.msra.mxu1 %v8155_v2  ;;  %2961 = vmatprep.subr.bf16.mxu0 %v8076_v3  ;;  %v8148_v2 = vcombine.high %v474_v61, %v478_v62  ;;  %v7782_v3 = vcombine.high %v107_v63, %v111_v0  ;;  %v434_v59 = vld [vmem:[#allocation2 + $0xa90] sm:$0xff] }
 0x14f   :  { %3034 = vmatprep.mubr.bf16.mxu1 %v9045_v28  ;;  %3045 = vmatprep.subr.bf16.mxu1 %v7830_v5  ;;  %v466_v5 = vld [vmem:[#allocation2 + $0xb90] sm:$0xff] }
 0x150   :  { %2991 = vmatprep.mubr.bf16.mxu0 %v9192_v17  ;;  %v8140_v13 = vcombine.high %v466_v5, %v470_v6  ;;  %v426_v53 = vld [vmem:[#allocation2 + $0xa50] sm:$0xff] }
 0x151   :  { %2962 = vmatpush1.bf16.msra.mxu0 %v8075_v9  ;;  %v103_v9 = vld [vmem:[#allocation2 + $0x38] sm:$0xff] }
 0x152   :  { %2963 = vmatprep.subr.bf16.mxu0 %v8068_v10  ;;  %v8147_v10 = vcombine.low %v474_v61, %v478_v62  ;;  %v7774_v14 = vcombine.high %v99_v7, %v103_v9  ;;  %v7773_v23 = vcombine.low %v99_v7, %v103_v9  ;;  %v9198_v61 = vpop.f32.mrf.mxu1 }
 0x154   :  { %v2692_v7 = vpop.f32.mrf.mxu1 }
 0x155   :  { %8161 = vmatmul.mubr.msk.bf16.vlgmr.msra.gmra.mxu1 %vm2525_vm0, %v9148_v46  ;;  %2964 = vmatpush1.bf16.msra.mxu0 %v8067_v32  ;;  %v8044_v46 = vcombine.high %v370_v35, %v374_v36  ;;  %v462_v32 = vld [vmem:[#allocation2 + $0xb70] sm:$0xff] }
 0x156   :  { %3046 = vmatpush1.bf16.msra.mxu1 %v7829_v19  ;;  %2965 = vmatprep.subr.bf16.mxu0 %v8060_v20  ;;  %v219_v19 = vld [vmem:[#allocation2 + $0x3d8] sm:$0xff]  ;;  %v8132_v24 = vcombine.high %v458_v16, %v462_v32 }
 0x157   :  { %3047 = vmatprep.subr.bf16.mxu1 %v7822_v21  ;;  %3077 = vmatprep.mubr.bf16.mxu1 %v9156_v55  ;;  %v8036_v55 = vcombine.high %v362_v42, %v366_v43  ;;  %v223_v20 = vld [vmem:[#allocation2 + $0x3f8] sm:$0xff]  ;;  %v8139_v21 = vcombine.low %v466_v5, %v470_v6  ;;  %v9200_v6 = vpop.f32.mrf.mxu0 }
 0x158   :  { %v7894_v25 = vcombine.high %v219_v19, %v223_v20  ;;  %v7893_v35 = vcombine.low %v219_v19, %v223_v20  ;;  %v175_v19 = vld [vmem:[#allocation2 + $0x278] sm:$0xff] }
 0x159   :  { %2966 = vmatpush1.bf16.msra.mxu0 %v8059_v27  ;;  %v454_v27 = vld [vmem:[#allocation2 + $0xb30] sm:$0xff] }
 0x15a   :  { %3048 = vmatpush1.bf16.msra.mxu1 %v7821_v30  ;;  %2967 = vmatprep.subr.bf16.mxu0 %v8052_v31  ;;  %v211_v30 = vld [vmem:[#allocation2 + $0x398] sm:$0xff]  ;;  %v8124_v36 = vcombine.high %v450_v26, %v454_v27 }
 0x15b   :  { %3049 = vmatprep.subr.bf16.mxu1 %v7814_v34  ;;  %v215_v31 = vld [vmem:[#allocation2 + $0x3b8] sm:$0xff]  ;;  %v8131_v34 = vcombine.low %v458_v16, %v462_v32 }
 0x15c   :  { %v7886_v37 = vcombine.high %v211_v30, %v215_v31  ;;  %v7885_v42 = vcombine.low %v211_v30, %v215_v31  ;;  %v171_v32 = vld [vmem:[#allocation2 + $0x258] sm:$0xff] }
 0x15d   :  { %2968 = vmatpush1.bf16.msra.mxu0 %v8051_v39  ;;  %v446_v39 = vld [vmem:[#allocation2 + $0xaf0] sm:$0xff]  ;;  %v7846_v30 = vcombine.high %v171_v32, %v175_v19  ;;  %v275_v31 = vld [vmem:[#allocation2 + $0x598] sm:$0xff] }
 0x15e   :  { %3050 = vmatpush1.bf16.msra.mxu1 %v7813_v40  ;;  %2969 = vmatprep.subr.bf16.mxu0 %v8044_v46  ;;  %v203_v40 = vld [vmem:[#allocation2 + $0x358] sm:$0xff]  ;;  %v8116_v43 = vcombine.high %v442_v38, %v446_v39 }
 0x15f   :  { %3051 = vmatprep.subr.bf16.mxu1 %v7806_v41  ;;  %v207_v46 = vld [vmem:[#allocation2 + $0x378] sm:$0xff]  ;;  %v8123_v41 = vcombine.low %v450_v26, %v454_v27 }
 0x160   :  { %v7878_v44 = vcombine.high %v203_v40, %v207_v46  ;;  %v7877_v49 = vcombine.low %v203_v40, %v207_v46  ;;  %v7845_v40 = vcombine.low %v171_v32, %v175_v19 }
 0x161   :  { %2970 = vmatpush1.bf16.msra.mxu0 %v8043_v45  ;;  %v438_v45 = vld [vmem:[#allocation2 + $0xab0] sm:$0xff] }
 0x162   :  { %3052 = vmatpush1.bf16.msra.mxu1 %v7805_v47  ;;  %2971 = vmatprep.subr.bf16.mxu0 %v8036_v55  ;;  %v195_v47 = vld [vmem:[#allocation2 + $0x318] sm:$0xff]  ;;  %v8108_v50 = vcombine.high %v434_v59, %v438_v45 }
 0x163   :  { %3053 = vmatprep.subr.bf16.mxu1 %v7798_v48  ;;  %v199_v55 = vld [vmem:[#allocation2 + $0x338] sm:$0xff]  ;;  %v8115_v48 = vcombine.low %v442_v38, %v446_v39 }
 0x164   :  { %v7870_v51 = vcombine.high %v195_v47, %v199_v55  ;;  %v7869_v62 = vcombine.low %v195_v47, %v199_v55 }
 0x165   :  { %2972 = vmatpush1.bf16.msra.mxu0 %v8035_v54  ;;  %v430_v54 = vld [vmem:[#allocation2 + $0xa70] sm:$0xff] }
 0x166   :  { %3054 = vmatpush1.bf16.msra.mxu1 %v7797_v58  ;;  %2973 = vmatprep.subr.bf16.mxu0 %v8028_v60  ;;  %v187_v58 = vld [vmem:[#allocation2 + $0x2d8] sm:$0xff]  ;;  %v8100_v63 = vcombine.high %v426_v53, %v430_v54  ;;  %v8099_v5 = vcombine.low %v426_v53, %v430_v54 }
 0x167   :  { %3055 = vmatprep.subr.bf16.mxu1 %v7790_v56  ;;  %v191_v60 = vld [vmem:[#allocation2 + $0x2f8] sm:$0xff]  ;;  %v8107_v56 = vcombine.low %v434_v59, %v438_v45  ;;  %v9211_v59 = vld [vmem:[%s9449_s0 + $0x10] ss:$28 sps:$4 sm:$0xff]  }
 0x168   :  { %v7862_v0 = vcombine.high %v187_v58, %v191_v60  ;;  %v7861_v9 = vcombine.low %v187_v58, %v191_v60  ;;  %v415_v45 = vld [vmem:[#allocation2 + $0x9f8] sm:$0xff] }
 0x169   :  { %2974 = vmatpush1.bf16.msra.mxu0 %v8027_v22  ;;  %v418_v22 = vld [vmem:[#allocation2 + $0xa10] sm:$0xff]  ;;  %v259_v54 = vld [vmem:[#allocation2 + $0x518] sm:$0xff] }
 0x16a   :  { %3056 = vmatpush1.bf16.msra.mxu1 %v7789_v1  ;;  %2975 = vmatprep.subr.bf16.mxu0 %v8148_v2  ;;  %v422_v1 = vld [vmem:[#allocation2 + $0xa30] sm:$0xff]  ;;  %v179_v2 = vld [vmem:[#allocation2 + $0x298] sm:$0xff] }
 0x16b   :  { %3057 = vmatprep.subr.bf16.mxu1 %v7782_v3  ;;  %v183_v3 = vld [vmem:[#allocation2 + $0x2b8] sm:$0xff] }
 0x16c   :  { %v263_v58 = vld [vmem:[#allocation2 + $0x538] sm:$0xff] }
 0x16d   :  { %2976 = vmatpush2.bf16.msra.mxu0 %v8147_v10  ;;  %v8092_v10 = vcombine.high %v418_v22, %v422_v1  ;;  %v403_v60 = vld [vmem:[#allocation2 + $0x998] sm:$0xff] }
 0x16e   :  { %3058 = vmatpush1.bf16.msra.mxu1 %v7781_v11  ;;  %2977 = vmatprep.subr.bf16.mxu0 %v8140_v13  ;;  %v7854_v11 = vcombine.high %v179_v2, %v183_v3  ;;  %v283_v13 = vld [vmem:[#allocation2 + $0x5d8] sm:$0xff] }
 0x16f   :  { %3059 = vmatprep.subr.bf16.mxu1 %v7774_v14  ;;  %v287_v14 = vld [vmem:[#allocation2 + $0x5f8] sm:$0xff] }
 0x170   :  { %v7958_v26 = vcombine.high %v283_v13, %v287_v14  ;;  %v7957_v38 = vcombine.low %v283_v13, %v287_v14  ;;  %v247_v13 = vld [vmem:[#allocation2 + $0x4b8] sm:$0xff] }
 0x171   :  { %2978 = vmatpush2.bf16.msra.mxu0 %v8139_v21  ;;  %v8091_v21 = vcombine.low %v418_v22, %v422_v1  ;;  %v251_v22 = vld [vmem:[#allocation2 + $0x4d8] sm:$0xff] }
 0x172   :  { %3060 = vmatpush1.bf16.msra.mxu1 %v7773_v23  ;;  %2979 = vmatprep.subr.bf16.mxu0 %v8132_v24  ;;  %v9203_v23 = vpop.f32.mrf.mxu1  ;;  %v255_v1 = vld [vmem:[#allocation2 + $0x4f8] sm:$0xff] }
 0x173   :  { %3061 = vmatprep.subr.bf16.mxu1 %v7894_v25  ;;  %v7853_v25 = vcombine.low %v179_v2, %v183_v3  ;;  %v395_v2 = vld [vmem:[#allocation2 + $0x958] sm:$0xff]  ;;  %v7925_v32 = vcombine.low %v251_v22, %v255_v1 }
 0x174   :  { %v2696_v39 = vpop.f32.mrf.mxu1  ;;  %v399_v3 = vld [vmem:[#allocation2 + $0x978] sm:$0xff] }
 0x175   :  { %2980 = vmatpush2.bf16.msra.mxu0 %v8131_v34  ;;  %v279_v34 = vld [vmem:[#allocation2 + $0x5b8] sm:$0xff]  ;;  %v8069_v19 = vcombine.low %v395_v2, %v399_v3 }
 0x176   :  { %3062 = vmatpush2.bf16.msra.mxu1 %v7893_v35  ;;  %2981 = vmatprep.subr.bf16.mxu0 %v8124_v36  ;;  %v163_v36 = vld [vmem:[#allocation2 + $0x218] sm:$0xff]  ;;  %v7950_v46 = vcombine.high %v275_v31, %v279_v34 }
 0x177   :  { %3063 = vmatprep.subr.bf16.mxu1 %v7886_v37  ;;  %v167_v37 = vld [vmem:[#allocation2 + $0x238] sm:$0xff] }
 0x178   :  { %v387_v14 = vld [vmem:[#allocation2 + $0x918] sm:$0xff] }
 0x179   :  { %2982 = vmatpush2.bf16.msra.mxu0 %v8123_v41 }
 0x17a   :  { %3064 = vmatpush2.bf16.msra.mxu1 %v7885_v42  ;;  %2983 = vmatprep.subr.bf16.mxu0 %v8116_v43  ;;  %v7838_v42 = vcombine.high %v163_v36, %v167_v37  ;;  %v267_v43 = vld [vmem:[#allocation2 + $0x558] sm:$0xff] }
 0x17b   :  { %3065 = vmatprep.subr.bf16.mxu1 %v7878_v44  ;;  %v271_v44 = vld [vmem:[#allocation2 + $0x578] sm:$0xff] }
 0x17d   :  { %2984 = vmatpush2.bf16.msra.mxu0 %v8115_v48  ;;  %v7949_v48 = vcombine.low %v275_v31, %v279_v34 }
 0x17e   :  { %3066 = vmatpush2.bf16.msra.mxu1 %v7877_v49  ;;  %2985 = vmatprep.subr.bf16.mxu0 %v8108_v50  ;;  %v7837_v49 = vcombine.low %v163_v36, %v167_v37  ;;  %v7942_v50 = vcombine.high %v267_v43, %v271_v44  ;;  %v231_v36 = vld [vmem:[#allocation2 + $0x438] sm:$0xff] }
 0x17f   :  { %3067 = vmatprep.subr.bf16.mxu1 %v7870_v51  ;;  %v371_v37 = vld [vmem:[#allocation2 + $0x898] sm:$0xff] }
 0x181   :  { %2986 = vmatpush2.bf16.msra.mxu0 %v8107_v56  ;;  %v407_v56 = vld [vmem:[#allocation2 + $0x9b8] sm:$0xff] }
 0x182   :  { %3068 = vmatpush2.bf16.msra.mxu1 %v7869_v62  ;;  %2987 = vmatprep.subr.bf16.mxu0 %v8100_v63  ;;  %v7941_v62 = vcombine.low %v267_v43, %v271_v44  ;;  %v363_v43 = vld [vmem:[#allocation2 + $0x858] sm:$0xff] }
 0x183   :  { %3069 = vmatprep.subr.bf16.mxu1 %v7862_v0  ;;  %v7934_v0 = vcombine.high %v259_v54, %v263_v58  ;;  %v367_v44 = vld [vmem:[#allocation2 + $0x878] sm:$0xff] }
 0x184   :  { %v2649_v16 = vpop.f32.mrf.mxu0 }
 0x185   :  { %v2650_v20 = vadd.f32 %v2649_v16, %v9175_v57  ;;  %2988 = vmatpush2.bf16.msra.mxu0 %v8099_v5  ;;  %v7933_v5 = vcombine.low %v259_v54, %v263_v58  ;;  %v391_v16 = vld [vmem:[#allocation2 + $0x938] sm:$0xff]  ;;  %v8037_v58 = vcombine.low %v363_v43, %v367_v44 }
 0x186   :  { %3070 = vmatpush2.bf16.msra.mxu1 %v7861_v9  ;;  %v9205_v24 = vpop.f32.mrf.mxu0  ;;  %2989 = vmatprep.subr.bf16.mxu0 %v8092_v10  ;;  %v7926_v9 = vcombine.high %v251_v22, %v255_v1  ;;  %v8070_v10 = vcombine.high %v395_v2, %v399_v3  ;;  %v8061_v31 = vcombine.low %v387_v14, %v391_v16 }
 0x187   :  { %v2693_v27 = vadd.f32 %v2692_v7, %v2650_v20  ;;  %3071 = vmatprep.subr.bf16.mxu1 %v7854_v11  ;;  %v8077_v7 = vcombine.low %v403_v60, %v407_v56  ;;  %v243_v11 = vld [vmem:[#allocation2 + $0x498] sm:$0xff]  ;;  %v8062_v20 = vcombine.high %v387_v14, %v391_v16 }
 0x188   :  { %v2653_v35 = vpop.f32.mrf.mxu0 }
 0x189   :  { %v2654_v57 = vadd.f32 %v2653_v35, %v9179_v4  ;;  %2990 = vmatpush2.bf16.msra.mxu0 %v8091_v21  ;;  %v411_v4 = vld [vmem:[#allocation2 + $0x9d8] sm:$0xff]  ;;  %v3217_v47 = vmax.f32 %v2693_v27, 0.0 }
 0x18a   :  { %3072 = vmatpush2.bf16.msra.mxu1 %v7853_v25  ;;  %3088 = vmatprep.subr.bf16.mxu0 %v7958_v26  ;;  %v8086_v53 = vcombine.high %v411_v4, %v415_v45  ;;  %v8085_v63 = vcombine.low %v411_v4, %v415_v45  ;;  %v235_v21 = vld [vmem:[#allocation2 + $0x458] sm:$0xff] }
 0x18b   :  { %v2697_v41 = vadd.f32 %v2696_v39, %v2654_v57  ;;  %3073 = vmatprep.subr.bf16.mxu1 %v7846_v30  ;;  %v239_v25 = vld [vmem:[#allocation2 + $0x478] sm:$0xff]  ;;  %v7917_v30 = vcombine.low %v243_v11, %v247_v13 }
 0x18c   :  { %2992 = vmatmul.mubr.bf16.vlgmr.msra.gmra.mxu0 %v9211_v59  ;;  %v379_v26 = vld [vmem:[#allocation2 + $0x8d8] sm:$0xff] }
 0x18d   :  { %v3225_v55 = vmax.f32 %v2697_v41, 0.0  ;;  %3089 = vmatpush1.bf16.msra.mxu0 %v7957_v38  ;;  %3120 = vmatprep.mubr.bf16.mxu0 %v9162_v15  ;;  %v8078_v15 = vcombine.high %v403_v60, %v407_v56  ;;  %v383_v27 = vld [vmem:[#allocation2 + $0x8f8] sm:$0xff]  ;;  %v7909_v38 = vcombine.low %v235_v21, %v239_v25 }
 0x18e   :  { %3074 = vmatpush2.bf16.msra.mxu1 %v7845_v40  ;;  %3090 = vmatprep.subr.bf16.mxu0 %v7950_v46  ;;  %v8054_v34 = vcombine.high %v379_v26, %v383_v27  ;;  %v227_v35 = vld [vmem:[#allocation2 + $0x418] sm:$0xff]  ;;  %v8053_v39 = vcombine.low %v379_v26, %v383_v27 }
 0x18f   :  { %v9215_v51 = vpack.c.bf16 %v3225_v55, %v3217_v47  ;;  %3075 = vmatprep.subr.bf16.mxu1 %v7838_v42  ;;  %v375_v57 = vld [vmem:[#allocation2 + $0x8b8] sm:$0xff]  ;;  %v7902_v40 = vcombine.high %v227_v35, %v231_v36  ;;  %v7901_v4 = vcombine.low %v227_v35, %v231_v36  ;;  %v8038_v55 = vcombine.high %v363_v43, %v367_v44  ;;  %v9221_v43 = vpop.f32.mrf.mxu1 }
 0x190   :  { %v8046_v46 = vcombine.high %v371_v37, %v375_v57  ;;  %v347_v41 = vld [vmem:[#allocation2 + $0x7d8] sm:$0xff]  ;;  %v8045_v45 = vcombine.low %v371_v37, %v375_v57  ;;  %v500_v57 = vsub.s32 2, %v9165_v18 }
 0x191   :  { %3091 = vmatpush1.bf16.msra.mxu0 %v7949_v48  ;;  %v351_v42 = vld [vmem:[#allocation2 + $0x7f8] sm:$0xff] }
 0x192   :  { %3076 = vmatpush2.bf16.msra.mxu1 %v7837_v49  ;;  %3092 = vmatprep.subr.bf16.mxu0 %v7942_v50  ;;  %v8022_v47 = vcombine.high %v347_v41, %v351_v42  ;;  %v339_v48 = vld [vmem:[#allocation2 + $0x798] sm:$0xff]  ;;  %v8021_v54 = vcombine.low %v347_v41, %v351_v42 }
 0x193   :  { %3131 = vmatprep.subr.bf16.mxu1 %v8086_v53  ;;  %v343_v49 = vld [vmem:[#allocation2 + $0x7b8] sm:$0xff] }
 0x194   :  { %v355_v50 = vld [vmem:[#allocation2 + $0x818] sm:$0xff]  ;;  %v8014_v60 = vcombine.high %v339_v48, %v343_v49  ;;  %v8013_v22 = vcombine.low %v339_v48, %v343_v49 }
 0x195   :  { %3078 = vmatmul.mubr.bf16.vlgmr.msra.gmra.mxu1 %v9184_v8  ;;  %3093 = vmatpush1.bf16.msra.mxu0 %v7941_v62  ;;  %v7918_v8 = vcombine.high %v243_v11, %v247_v13  ;;  %v359_v53 = vld [vmem:[#allocation2 + $0x838] sm:$0xff] }
 0x196   :  { %3132 = vmatpush1.bf16.msra.mxu1 %v8085_v63  ;;  %3094 = vmatprep.subr.bf16.mxu0 %v7934_v0  ;;  %v8030_v56 = vcombine.high %v355_v50, %v359_v53  ;;  %v331_v62 = vld [vmem:[#allocation2 + $0x758] sm:$0xff]  ;;  %v8029_v1 = vcombine.low %v355_v50, %v359_v53 }
 0x197   :  { %3133 = vmatprep.subr.bf16.mxu1 %v8078_v15  ;;  %3163 = vmatprep.mubr.bf16.mxu1 %v9192_v17  ;;  %v7910_v17 = vcombine.high %v235_v21, %v239_v25  ;;  %v335_v63 = vld [vmem:[#allocation2 + $0x778] sm:$0xff] }
 0x198   :  { %v475_v0 = vld [vmem:[#allocation2 + $0xbd8] sm:$0xff]  ;;  %v8006_v2 = vcombine.high %v331_v62, %v335_v63  ;;  %v8005_v11 = vcombine.low %v331_v62, %v335_v63  ;;  %v2655_v62 = vpop.f32.mrf.mxu0 }
 0x199   :  { %3095 = vmatpush1.bf16.msra.mxu0 %v7933_v5  ;;  %v479_v15 = vld [vmem:[#allocation2 + $0xbf8] sm:$0xff] }
 0x19a   :  { %3134 = vmatpush1.bf16.msra.mxu1 %v8077_v7  ;;  %3096 = vmatprep.subr.bf16.mxu0 %v7926_v9  ;;  %v8150_v3 = vcombine.high %v475_v0, %v479_v15  ;;  %v323_v5 = vld [vmem:[#allocation2 + $0x718] sm:$0xff]  ;;  %v8149_v13 = vcombine.low %v475_v0, %v479_v15 }
 0x19b   :  { %3135 = vmatprep.subr.bf16.mxu1 %v8070_v10  ;;  %v327_v7 = vld [vmem:[#allocation2 + $0x738] sm:$0xff] }
 0x19c   :  { %v467_v9 = vld [vmem:[#allocation2 + $0xb98] sm:$0xff]  ;;  %v7998_v14 = vcombine.high %v323_v5, %v327_v7  ;;  %v7997_v21 = vcombine.low %v323_v5, %v327_v7  ;;  %v504_v7 = vsub.s32 3, %v9165_v18 }
 0x19d   :  { %3097 = vmatpush1.bf16.msra.mxu0 %v7925_v32  ;;  %v471_v10 = vld [vmem:[#allocation2 + $0xbb8] sm:$0xff] }
 0x19e   :  { %3136 = vmatpush1.bf16.msra.mxu1 %v8069_v19  ;;  %3098 = vmatprep.subr.bf16.mxu0 %v7918_v8  ;;  %v8142_v16 = vcombine.high %v467_v9, %v471_v10  ;;  %v315_v32 = vld [vmem:[#allocation2 + $0x6d8] sm:$0xff]  ;;  %v8141_v25 = vcombine.low %v467_v9, %v471_v10 }
 0x19f   :  { %3137 = vmatprep.subr.bf16.mxu1 %v8062_v20  ;;  %v319_v19 = vld [vmem:[#allocation2 + $0x6f8] sm:$0xff] }
 0x1a0   :  { %v459_v8 = vld [vmem:[#allocation2 + $0xb58] sm:$0xff]  ;;  %v7990_v26 = vcombine.high %v315_v32, %v319_v19  ;;  %v7989_v35 = vcombine.low %v315_v32, %v319_v19 }
 0x1a1   :  { %3099 = vmatpush1.bf16.msra.mxu0 %v7917_v30  ;;  %v463_v20 = vld [vmem:[#allocation2 + $0xb78] sm:$0xff] }
 0x1a2   :  { %3138 = vmatpush1.bf16.msra.mxu1 %v8061_v31  ;;  %3100 = vmatprep.subr.bf16.mxu0 %v7910_v17  ;;  %v8134_v27 = vcombine.high %v459_v8, %v463_v20  ;;  %v307_v30 = vld [vmem:[#allocation2 + $0x698] sm:$0xff]  ;;  %v8133_v36 = vcombine.low %v459_v8, %v463_v20  ;;  %v9240_v20 = vld [vmem:[#allocation6 + $0x1c0] sm:$0xff] }
 0x1a3   :  { %3139 = vmatprep.subr.bf16.mxu1 %v8054_v34  ;;  %v311_v31 = vld [vmem:[#allocation2 + $0x6b8] sm:$0xff] }
 0x1a4   :  { %v451_v17 = vld [vmem:[#allocation2 + $0xb18] sm:$0xff]  ;;  %v7982_v37 = vcombine.high %v307_v30, %v311_v31  ;;  %v7981_v44 = vcombine.low %v307_v30, %v311_v31 }
 0x1a5   :  { %3101 = vmatpush1.bf16.msra.mxu0 %v7909_v38  ;;  %v455_v34 = vld [vmem:[#allocation2 + $0xb38] sm:$0xff] }
 0x1a6   :  { %3140 = vmatpush1.bf16.msra.mxu1 %v8053_v39  ;;  %3102 = vmatprep.subr.bf16.mxu0 %v7902_v40  ;;  %v8126_v38 = vcombine.high %v451_v17, %v455_v34  ;;  %v299_v39 = vld [vmem:[#allocation2 + $0x658] sm:$0xff] }
 0x1a7   :  { %3141 = vmatprep.subr.bf16.mxu1 %v8046_v46  ;;  %v303_v40 = vld [vmem:[#allocation2 + $0x678] sm:$0xff]  ;;  %v496_v46 = vsub.s32 1, %v9165_v18 }
 0x1a8   :  { %v443_v41 = vld [vmem:[#allocation2 + $0xad8] sm:$0xff] }
 0x1a9   :  { %3103 = vmatpush1.bf16.msra.mxu0 %v7901_v4  ;;  %v447_v42 = vld [vmem:[#allocation2 + $0xaf8] sm:$0xff]  ;;  %v8125_v4 = vcombine.low %v451_v17, %v455_v34  ;;  %v497_v53 = vrot.slane %v9168_v33, %v496_v46 }
 0x1aa   :  { %3142 = vmatpush1.bf16.msra.mxu1 %v8045_v45  ;;  %3104 = vmatprep.subr.bf16.mxu0 %v8022_v47  ;;  %v7974_v45 = vcombine.high %v299_v39, %v303_v40  ;;  %v9226_v47 = vrot.slane %v9168_v33, %v500_v57  ;;  %v8118_v48 = vcombine.high %v443_v41, %v447_v42  ;;  %v291_v49 = vld [vmem:[#allocation2 + $0x618] sm:$0xff] }
 0x1ab   :  { %3143 = vmatprep.subr.bf16.mxu1 %v8038_v55  ;;  %v2735_v55 = vpop.f32.mrf.mxu1  ;;  %v295_v50 = vld [vmem:[#allocation2 + $0x638] sm:$0xff]  ;;  %v8117_v63 = vcombine.low %v443_v41, %v447_v42  ;;  %v2566_v5 = vadd.f32 %v9173_v52, %v497_v53  ;;  %v3429_v42 = vld [vmem:[#allocation6 + $0x5e0] sm:$0xff] }
 0x1ac   :  { %v7966_v0 = vcombine.high %v291_v49, %v295_v50  ;;  %v2736_v15 = vadd.f32 %v2735_v55, %v9226_v47  ;;  %v427_v10 = vld [vmem:[#allocation2 + $0xa58] sm:$0xff] }
 0x1ad   :  { %3105 = vmatpush2.bf16.msra.mxu0 %v8021_v54  ;;  %v435_v54 = vld [vmem:[#allocation2 + $0xa98] sm:$0xff] }
 0x1ae   :  { %3144 = vmatpush1.bf16.msra.mxu1 %v8037_v58  ;;  %3106 = vmatprep.subr.bf16.mxu0 %v8014_v60  ;;  %v439_v58 = vld [vmem:[#allocation2 + $0xab8] sm:$0xff]  ;;  %v7973_v60 = vcombine.low %v299_v39, %v303_v40  ;;  %v8927_v40 = vld [vmem:[%s9449_s0 + $0x8] ss:$28 sps:$4 sm:$0xff]  }
 0x1af   :  { %3145 = vmatprep.subr.bf16.mxu1 %v8030_v56  ;;  %v2570_v56 = vadd.f32 %v9200_v6, %v497_v53  ;;  %v8109_v32 = vcombine.low %v435_v54, %v439_v58  ;;  %v419_v30 = vld [vmem:[#allocation2 + $0xa18] sm:$0xff] }
 0x1b0   :  { %v423_v31 = vld [vmem:[#allocation2 + $0xa38] sm:$0xff] }
 0x1b1   :  { %3107 = vmatpush2.bf16.msra.mxu0 %v8013_v22  ;;  %v2737_v22 = vpop.f32.mrf.mxu1  ;;  %v8093_v55 = vcombine.low %v419_v30, %v423_v31 }
 0x1b2   :  { %3146 = vmatpush1.bf16.msra.mxu1 %v8029_v1  ;;  %3108 = vmatprep.subr.bf16.mxu0 %v8006_v2  ;;  %v8110_v1 = vcombine.high %v435_v54, %v439_v58  ;;  %v483_v2 = vld [vmem:[#allocation2 + $0xc18] sm:$0xff] }
 0x1b3   :  { %3147 = vmatprep.subr.bf16.mxu1 %v8150_v3  ;;  %v487_v3 = vld [vmem:[#allocation2 + $0xc38] sm:$0xff]  ;;  %v9238_v8 = vpop.f32.mrf.mxu1 }
 0x1b4   :  { %v8158_v19 = vcombine.high %v483_v2, %v487_v3  ;;  %v8157_v17 = vcombine.low %v483_v2, %v487_v3 }
 0x1b5   :  { %3109 = vmatpush2.bf16.msra.mxu0 %v8005_v11  ;;  %v431_v11 = vld [vmem:[#allocation2 + $0xa78] sm:$0xff] }
 0x1b6   :  { %3148 = vmatpush2.bf16.msra.mxu1 %v8149_v13  ;;  %3110 = vmatprep.subr.bf16.mxu0 %v7998_v14  ;;  %v7965_v13 = vcombine.low %v291_v49, %v295_v50  ;;  %v2613_v14 = vadd.f32 %v9198_v61, %v2570_v56  ;;  %v8102_v52 = vcombine.high %v427_v10, %v431_v11  ;;  %v3289_v50 = vld [vmem:[#allocation6 + $0x180] sm:$0xff] }
 0x1b7   :  { %3149 = vmatprep.subr.bf16.mxu1 %v8142_v16  ;;  %v505_v61 = vrot.slane %v9168_v33, %v504_v7  ;;  %v3293_v56 = vld [vmem:[#allocation6 + $0x1a0] sm:$0xff] }
 0x1b8   :  { %v8212_v3 = vcombine.high %v3289_v50, %v3293_v56 }
 0x1b9   :  { %3111 = vmatpush2.bf16.msra.mxu0 %v7997_v21  ;;  %v9242_v21 = vld [vmem:[#allocation6 + $0x1e0] sm:$0xff]  ;;  %v2738_v39 = vadd.f32 %v2737_v22, %v505_v61 }
 0x1ba   :  { %3150 = vmatpush2.bf16.msra.mxu1 %v8141_v25  ;;  %3112 = vmatprep.subr.bf16.mxu0 %v7990_v26  ;;  %v2609_v25 = vadd.f32 %v9177_v12, %v2566_v5  ;;  %v2656_v26 = vadd.f32 %v2655_v62, %v2613_v14  ;;  %v8220_v12 = vcombine.high %v9240_v20, %v9242_v21  ;;  %v3417_v62 = vld [vmem:[#allocation6 + $0x580] sm:$0xff] }
 0x1bb   :  { %3151 = vmatprep.subr.bf16.mxu1 %v8134_v27 }
 0x1bc   :  { %v2652_v34 = vadd.f32 %v9205_v24, %v2609_v25  ;;  %v2699_v33 = vadd.f32 %v9221_v43, %v2656_v26  ;;  %v3425_v24 = vld [vmem:[#allocation6 + $0x5c0] sm:$0xff] }
 0x1bd   :  { %3113 = vmatpush2.bf16.msra.mxu0 %v7989_v35  ;;  %v8348_v49 = vcombine.high %v3425_v24, %v3429_v42  ;;  %v8347_v22 = vcombine.low %v3425_v24, %v3429_v42  ;;  %v3397_v24 = vld [vmem:[#allocation6 + $0x4e0] sm:$0xff] }
 0x1be   :  { %3152 = vmatpush2.bf16.msra.mxu1 %v8133_v36  ;;  %3114 = vmatprep.subr.bf16.mxu0 %v7982_v37  ;;  %v8101_v36 = vcombine.low %v427_v10, %v431_v11  ;;  %v2741_v37 = vpop.f32.mrf.mxu1  ;;  %v3226_v53 = vmax.f32 %v2699_v33, 0.0  ;;  %v3285_v10 = vld [vmem:[#allocation6 + $0x160] sm:$0xff] }
 0x1bf   :  { %3153 = vmatprep.subr.bf16.mxu1 %v8126_v38  ;;  %v8094_v38 = vcombine.high %v419_v30, %v423_v31  ;;  %v2742_v54 = vadd.f32 %v2741_v37, %v505_v61  ;;  %v3273_v61 = vld [vmem:[#allocation6 + $0x100] sm:$0xff] }
 0x1c0   :  { %v3277_v30 = vld [vmem:[#allocation6 + $0x120] sm:$0xff] }
 0x1c1   :  { %3115 = vmatpush2.bf16.msra.mxu0 %v7981_v44  ;;  %v8196_v37 = vcombine.high %v3273_v61, %v3277_v30  ;;  %v3265_v33 = vld [vmem:[#allocation6 + $0xc0] sm:$0xff]  ;;  %v8195_v42 = vcombine.low %v3273_v61, %v3277_v30 }
 0x1c2   :  { %3154 = vmatpush2.bf16.msra.mxu1 %v8125_v4  ;;  %3116 = vmatprep.subr.bf16.mxu0 %v7974_v45  ;;  %v2695_v4 = vadd.f32 %v9203_v23, %v2652_v34  ;;  %v8219_v23 = vcombine.low %v9240_v20, %v9242_v21  ;;  %v3401_v34 = vld [vmem:[#allocation6 + $0x500] sm:$0xff] }
 0x1c3   :  { %3155 = vmatprep.subr.bf16.mxu1 %v8118_v48 }
 0x1c4   :  { %v2778_v9 = vpop.f32.mrf.mxu0 }
 0x1c5   :  { %v9235_v6 = vadd.f32 %v2778_v9, %v2736_v15  ;;  %3117 = vmatpush2.bf16.msra.mxu0 %v7973_v60  ;;  %v3281_v9 = vld [vmem:[#allocation6 + $0x140] sm:$0xff] }
 0x1c6   :  { %3156 = vmatpush2.bf16.msra.mxu1 %v8117_v63  ;;  %v2780_v16 = vpop.f32.mrf.mxu0  ;;  %3118 = vmatprep.subr.bf16.mxu0 %v7966_v0  ;;  %v3421_v63 = vld [vmem:[#allocation6 + $0x5a0] sm:$0xff]  ;;  %v3218_v0 = vmax.f32 %v2695_v4, 0.0  ;;  %v8204_v25 = vcombine.high %v3281_v9, %v3285_v10 }
 0x1c7   :  { %3157 = vmatprep.subr.bf16.mxu1 %v8110_v1  ;;  %v2781_v45 = vadd.f32 %v2780_v16, %v2738_v39  ;;  %v8340_v5 = vcombine.high %v3417_v62, %v3421_v63  ;;  %v8928_v16 = vld [vmem:[%s9449_s0 + $0x18] ss:$28 sps:$4 sm:$0xff]   ;;  %v8339_v21 = vcombine.low %v3417_v62, %v3421_v63  ;;  %v3269_v39 = vld [vmem:[#allocation6 + $0xe0] sm:$0xff] }
 0x1c8   :  { %v9248_v27 = vpop.f32.mrf.mxu0  ;;  %v9269_v11 = vpack.c.bf16 %v3226_v53, %v3218_v0  ;;  %v8187_v53 = vcombine.low %v3265_v33, %v3269_v39  ;;  %v3249_v62 = vld [vmem:[#allocation6 + $0x40] sm:$0xff] }
 0x1c9   :  { %3119 = vmatpush2.bf16.msra.mxu0 %v7965_v13  ;;  %v3253_v63 = vld [vmem:[#allocation6 + $0x60] sm:$0xff] }
 0x1ca   :  { %3158 = vmatpush2.bf16.msra.mxu1 %v8109_v32  ;;  %v2784_v35 = vpop.f32.mrf.mxu0  ;;  %3188 = vmatprep.subr.bf16.mxu0 %v8158_v19  ;;  %v3409_v32 = vld [vmem:[#allocation6 + $0x540] sm:$0xff] }
 0x1cb   :  { %3159 = vmatprep.subr.bf16.mxu1 %v8102_v52  ;;  %v2785_v15 = vadd.f32 %v2784_v35, %v2742_v54  ;;  %v3413_v19 = vld [vmem:[#allocation6 + $0x560] sm:$0xff]  ;;  %v8211_v52 = vcombine.low %v3289_v50, %v3293_v56 }
 0x1cc   :  { %3121 = vmatmul.mubr.bf16.vlgmr.msra.gmra.mxu0 %v8927_v40  ;;  %v9257_v41 = vpop.f32.mrf.mxu0  ;;  %v8332_v26 = vcombine.high %v3409_v32, %v3413_v19  ;;  %v3405_v35 = vld [vmem:[#allocation6 + $0x520] sm:$0xff] }
 0x1cd   :  { %v9259_v44 = vpop.f32.mrf.mxu1  ;;  %3189 = vmatpush1.bf16.msra.mxu0 %v8157_v17  ;;  %3206 = vmatprep.mubr.bf16.mxu0 %v9045_v28  ;;  %v3393_v40 = vld [vmem:[#allocation6 + $0x4c0] sm:$0xff]  ;;  %v8323_v4 = vcombine.low %v3401_v34, %v3405_v35 }
 0x1ce   :  { %3160 = vmatpush2.bf16.msra.mxu1 %v8101_v36  ;;  %v2866_v43 = vpop.f32.mrf.mxu0  ;;  %6355 = vmatprep.subr.bf16.mxu0 %v8220_v12  ;;  %v8203_v36 = vcombine.low %v3281_v9, %v3285_v10  ;;  %v8331_v12 = vcombine.low %v3409_v32, %v3413_v19  ;;  %v3389_v50 = vld [vmem:[#allocation6 + $0x4a0] sm:$0xff]  ;;  %v8315_v54 = vcombine.low %v3393_v40, %v3397_v24 }
 0x1cf   :  { %v2823_v48 = vpop.f32.mrf.mxu1  ;;  %3161 = vmatprep.subr.bf16.mxu1 %v8094_v38  ;;  %v8324_v38 = vcombine.high %v3401_v34, %v3405_v35  ;;  %v3381_v0 = vld [vmem:[#allocation6 + $0x460] sm:$0xff] }
 0x1d0   :  { %v2824_v58 = vadd.f32 %v2823_v48, %v2781_v45  ;;  %v9263_v60 = vpop.f32.mrf.mxu0  ;;  %v8188_v45 = vcombine.high %v3265_v33, %v3269_v39  ;;  %v3261_v48 = vld [vmem:[#allocation6 + $0xa0] sm:$0xff] }
 0x1d1   :  { %v9265_v28 = vpop.f32.mrf.mxu1  ;;  %v3369_v9 = vld [vmem:[#allocation6 + $0x400] sm:$0xff] }
 0x1d2   :  { %3162 = vmatpush2.bf16.msra.mxu1 %v8093_v55  ;;  %v2870_v2 = vpop.f32.mrf.mxu0  ;;  %v2867_v13 = vadd.f32 %v2866_v43, %v2824_v58  ;;  %v8316_v43 = vcombine.high %v3393_v40, %v3397_v24  ;;  %v3257_v55 = vld [vmem:[#allocation6 + $0x80] sm:$0xff] }
 0x1d3   :  { %v2827_v1 = vpop.f32.mrf.mxu1  ;;  %6398 = vmatprep.subr.bf16.mxu1 %v8348_v49  ;;  %v3385_v49 = vld [vmem:[#allocation6 + $0x480] sm:$0xff]  ;;  %v8180_v58 = vcombine.high %v3257_v55, %v3261_v48 }
 0x1d4   :  { %v2828_v14 = vadd.f32 %v2827_v1, %v2785_v15  ;;  %8162 = vmatmul.mubr.msk.bf16.vlgmr.msra.gmra.mxu0 %vm2525_vm0, %v8928_v16  ;;  %v3220_v31 = vmax.f32 %v2867_v13, 0.0  ;;  %v8308_v56 = vcombine.high %v3385_v49, %v3389_v50  ;;  %v8179_v15 = vcombine.low %v3257_v55, %v3261_v48  ;;  %v3373_v10 = vld [vmem:[#allocation6 + $0x420] sm:$0xff] }
 0x1d5   :  { %3164 = vmatmul.mubr.bf16.vlgmr.msra.gmra.mxu1 %v9211_v59  ;;  %6356 = vmatpush1.bf16.msra.mxu0 %v8219_v23  ;;  %v3377_v23 = vld [vmem:[#allocation6 + $0x440] sm:$0xff]  ;;  %v8172_v1 = vcombine.high %v3249_v62, %v3253_v63  ;;  %v8171_v13 = vcombine.low %v3249_v62, %v3253_v63  ;;  %v8292_v32 = vcombine.high %v3369_v9, %v3373_v10 }
 0x1d6   :  { %v2871_v20 = vadd.f32 %v2870_v2, %v2828_v14  ;;  %6399 = vmatpush1.bf16.msra.mxu1 %v8347_v22  ;;  %6387 = vmatprep.mubr.bf16.mxu0 %v9269_v11  ;;  %v8307_v22 = vcombine.low %v3385_v49, %v3389_v50  ;;  %v8300_v2 = vcombine.high %v3377_v23, %v3381_v0  ;;  %v3361_v19 = vld [vmem:[#allocation6 + $0x3c0] sm:$0xff] }
 0x1d7   :  { %6357 = vmatprep.subr.bf16.mxu0 %v8212_v3  ;;  %6400 = vmatprep.subr.bf16.mxu1 %v8340_v5  ;;  %v3241_v3 = vld [vmem:[#allocation6] sm:$0xff]  ;;  %v8299_v14 = vcombine.low %v3377_v23, %v3381_v0 }
 0x1d8   :  { %v3228_v17 = vmax.f32 %v2871_v20, 0.0  ;;  %v3245_v5 = vld [vmem:[#allocation6 + $0x20] sm:$0xff] }
 0x1d9   :  { %6358 = vmatpush1.bf16.msra.mxu0 %v8211_v52  ;;  %v8164_v16 = vcombine.high %v3241_v3, %v3245_v5  ;;  %v3365_v52 = vld [vmem:[#allocation6 + $0x3e0] sm:$0xff] }
 0x1da   :  { %v9277_v59 = vpack.c.bf16 %v3228_v17, %v3220_v31  ;;  %6401 = vmatpush1.bf16.msra.mxu1 %v8339_v21  ;;  %6359 = vmatprep.subr.bf16.mxu0 %v8204_v25  ;;  %v3489_v20 = vld [vmem:[#allocation6 + $0x7c0] sm:$0xff]  ;;  %v8163_v25 = vcombine.low %v3241_v3, %v3245_v5  ;;  %v8284_v61 = vcombine.high %v3361_v19, %v3365_v52 }
 0x1db   :  { %6402 = vmatprep.subr.bf16.mxu1 %v8332_v26  ;;  %v3493_v21 = vld [vmem:[#allocation6 + $0x7e0] sm:$0xff]  ;;  %v8291_v26 = vcombine.low %v3369_v9, %v3373_v10 }
 0x1dc   :  { %6430 = vmatprep.mubr.bf16.mxu1 %v9277_v59  ;;  %v8412_v30 = vcombine.high %v3489_v20, %v3493_v21  ;;  %v3353_v31 = vld [vmem:[#allocation6 + $0x380] sm:$0xff] }
 0x1dd   :  { %6360 = vmatpush1.bf16.msra.mxu0 %v8203_v36  ;;  %v3357_v17 = vld [vmem:[#allocation6 + $0x3a0] sm:$0xff]  ;;  %v8283_v36 = vcombine.low %v3361_v19, %v3365_v52 }
 0x1de   :  { %6403 = vmatpush1.bf16.msra.mxu1 %v8331_v12  ;;  %6361 = vmatprep.subr.bf16.mxu0 %v8196_v37  ;;  %v3481_v34 = vld [vmem:[#allocation6 + $0x780] sm:$0xff]  ;;  %v8411_v12 = vcombine.low %v3489_v20, %v3493_v21  ;;  %v8276_v37 = vcombine.high %v3353_v31, %v3357_v17 }
 0x1df   :  { %6404 = vmatprep.subr.bf16.mxu1 %v8324_v38  ;;  %v3485_v35 = vld [vmem:[#allocation6 + $0x7a0] sm:$0xff] }
 0x1e0   :  { %v8404_v38 = vcombine.high %v3481_v34, %v3485_v35  ;;  %v3345_v33 = vld [vmem:[#allocation6 + $0x340] sm:$0xff] }
 0x1e1   :  { %6362 = vmatpush1.bf16.msra.mxu0 %v8195_v42  ;;  %v3349_v39 = vld [vmem:[#allocation6 + $0x360] sm:$0xff]  ;;  %v8275_v42 = vcombine.low %v3353_v31, %v3357_v17 }
 0x1e2   :  { %6405 = vmatpush1.bf16.msra.mxu1 %v8323_v4  ;;  %6363 = vmatprep.subr.bf16.mxu0 %v8188_v45  ;;  %v3473_v40 = vld [vmem:[#allocation6 + $0x740] sm:$0xff]  ;;  %v8403_v4 = vcombine.low %v3481_v34, %v3485_v35  ;;  %v8268_v45 = vcombine.high %v3345_v33, %v3349_v39 }
 0x1e3   :  { %6406 = vmatprep.subr.bf16.mxu1 %v8316_v43  ;;  %v3477_v24 = vld [vmem:[#allocation6 + $0x760] sm:$0xff] }
 0x1e4   :  { %v8396_v43 = vcombine.high %v3473_v40, %v3477_v24  ;;  %v3337_v55 = vld [vmem:[#allocation6 + $0x300] sm:$0xff] }
 0x1e5   :  { %6364 = vmatpush1.bf16.msra.mxu0 %v8187_v53  ;;  %v3341_v48 = vld [vmem:[#allocation6 + $0x320] sm:$0xff]  ;;  %v8267_v53 = vcombine.low %v3345_v33, %v3349_v39 }
 0x1e6   :  { %6407 = vmatpush1.bf16.msra.mxu1 %v8315_v54  ;;  %6365 = vmatprep.subr.bf16.mxu0 %v8180_v58  ;;  %v3465_v49 = vld [vmem:[#allocation6 + $0x700] sm:$0xff]  ;;  %v8395_v54 = vcombine.low %v3473_v40, %v3477_v24  ;;  %v8260_v58 = vcombine.high %v3337_v55, %v3341_v48 }
 0x1e7   :  { %6408 = vmatprep.subr.bf16.mxu1 %v8308_v56  ;;  %v3469_v50 = vld [vmem:[#allocation6 + $0x720] sm:$0xff] }
 0x1e8   :  { %v8388_v56 = vcombine.high %v3465_v49, %v3469_v50  ;;  %v3329_v62 = vld [vmem:[#allocation6 + $0x2c0] sm:$0xff] }
 0x1e9   :  { %6366 = vmatpush1.bf16.msra.mxu0 %v8179_v15  ;;  %v3333_v63 = vld [vmem:[#allocation6 + $0x2e0] sm:$0xff]  ;;  %v8259_v15 = vcombine.low %v3337_v55, %v3341_v48 }
 0x1ea   :  { %6409 = vmatpush1.bf16.msra.mxu1 %v8307_v22  ;;  %6367 = vmatprep.subr.bf16.mxu0 %v8172_v1  ;;  %v3457_v23 = vld [vmem:[#allocation6 + $0x6c0] sm:$0xff]  ;;  %v8387_v22 = vcombine.low %v3465_v49, %v3469_v50  ;;  %v8252_v1 = vcombine.high %v3329_v62, %v3333_v63 }
 0x1eb   :  { %6410 = vmatprep.subr.bf16.mxu1 %v8300_v2  ;;  %v3461_v0 = vld [vmem:[#allocation6 + $0x6e0] sm:$0xff] }
 0x1ec   :  { %v8380_v2 = vcombine.high %v3457_v23, %v3461_v0  ;;  %v3321_v3 = vld [vmem:[#allocation6 + $0x280] sm:$0xff] }
 0x1ed   :  { %6368 = vmatpush1.bf16.msra.mxu0 %v8171_v13  ;;  %v3325_v5 = vld [vmem:[#allocation6 + $0x2a0] sm:$0xff]  ;;  %v8251_v13 = vcombine.low %v3329_v62, %v3333_v63 }
 0x1ee   :  { %6411 = vmatpush1.bf16.msra.mxu1 %v8299_v14  ;;  %6369 = vmatprep.subr.bf16.mxu0 %v8164_v16  ;;  %v3449_v9 = vld [vmem:[#allocation6 + $0x680] sm:$0xff]  ;;  %v8379_v14 = vcombine.low %v3457_v23, %v3461_v0  ;;  %v8244_v16 = vcombine.high %v3321_v3, %v3325_v5 }
 0x1ef   :  { %6412 = vmatprep.subr.bf16.mxu1 %v8292_v32  ;;  %v3453_v10 = vld [vmem:[#allocation6 + $0x6a0] sm:$0xff]  ;;  %v2740_v32 = vadd.f32 %v9238_v8, %v9226_v47 }
 0x1f0   :  { %v8372_v19 = vcombine.high %v3449_v9, %v3453_v10  ;;  %v3313_v52 = vld [vmem:[#allocation6 + $0x240] sm:$0xff] }
 0x1f1   :  { %6370 = vmatpush1.bf16.msra.mxu0 %v8163_v25  ;;  %v3317_v20 = vld [vmem:[#allocation6 + $0x260] sm:$0xff] }
 0x1f2   :  { %6413 = vmatpush1.bf16.msra.mxu1 %v8291_v26  ;;  %6371 = vmatprep.subr.bf16.mxu0 %v8284_v61  ;;  %v3441_v21 = vld [vmem:[#allocation6 + $0x640] sm:$0xff]  ;;  %v2783_v26 = vadd.f32 %v9248_v27, %v2740_v32  ;;  %v8243_v61 = vcombine.low %v3321_v3, %v3325_v5  ;;  %v8236_v31 = vcombine.high %v3313_v52, %v3317_v20 }
 0x1f3   :  { %6414 = vmatprep.subr.bf16.mxu1 %v8412_v30  ;;  %v3445_v25 = vld [vmem:[#allocation6 + $0x660] sm:$0xff]  ;;  %v8371_v30 = vcombine.low %v3449_v9, %v3453_v10 }
 0x1f4   :  { %v2826_v17 = vadd.f32 %v9265_v28, %v2783_v26  ;;  %v8364_v34 = vcombine.high %v3441_v21, %v3445_v25  ;;  %v3305_v35 = vld [vmem:[#allocation6 + $0x200] sm:$0xff]  ;;  %v8363_v27 = vcombine.low %v3441_v21, %v3445_v25 }
 0x1f5   :  { %6372 = vmatpush2.bf16.msra.mxu0 %v8283_v36  ;;  %v3309_v47 = vld [vmem:[#allocation6 + $0x220] sm:$0xff] }
 0x1f6   :  { %6415 = vmatpush2.bf16.msra.mxu1 %v8411_v12  ;;  %6373 = vmatprep.subr.bf16.mxu0 %v8276_v37  ;;  %v3433_v8 = vld [vmem:[#allocation6 + $0x600] sm:$0xff]  ;;  %v2822_v12 = vadd.f32 %v9259_v44, %v9235_v6  ;;  %v8235_v37 = vcombine.low %v3313_v52, %v3317_v20  ;;  %v2869_v33 = vadd.f32 %v9263_v60, %v2826_v17 }
 0x1f7   :  { %6416 = vmatprep.subr.bf16.mxu1 %v8404_v38  ;;  %v3437_v36 = vld [vmem:[#allocation6 + $0x620] sm:$0xff]  ;;  %v8228_v38 = vcombine.high %v3305_v35, %v3309_v47 }
 0x1f8   :  { %v8356_v39 = vcombine.high %v3433_v8, %v3437_v36  ;;  %v3553_v28 = vld [vmem:[#allocation6 + $0x9c0] sm:$0xff]  ;;  %v8355_v6 = vcombine.low %v3433_v8, %v3437_v36  ;;  %v9292_v36 = vld [vmem:[#allocation6 + $0x5c8] sm:$0xff] }
 0x1f9   :  { %6374 = vmatpush2.bf16.msra.mxu0 %v8275_v42  ;;  %v3557_v40 = vld [vmem:[#allocation6 + $0x9e0] sm:$0xff] }
 0x1fa   :  { %6417 = vmatpush2.bf16.msra.mxu1 %v8403_v4  ;;  %6375 = vmatprep.subr.bf16.mxu0 %v8268_v45  ;;  %v3681_v24 = vld [vmem:[#allocation6 + $0xdc0] sm:$0xff]  ;;  %v2865_v4 = vadd.f32 %v9257_v41, %v2822_v12  ;;  %v8227_v45 = vcombine.low %v3305_v35, %v3309_v47  ;;  %v8476_v44 = vcombine.high %v3553_v28, %v3557_v40  ;;  %v9294_v12 = vld [vmem:[#allocation6 + $0x5e8] sm:$0xff] }
 0x1fb   :  { %6418 = vmatprep.subr.bf16.mxu1 %v8396_v43  ;;  %v3685_v42 = vld [vmem:[#allocation6 + $0xde0] sm:$0xff]  ;;  %v3227_v43 = vmax.f32 %v2869_v33, 0.0 }
 0x1fc   :  { %v3545_v55 = vld [vmem:[#allocation6 + $0x980] sm:$0xff]  ;;  %v8604_v49 = vcombine.high %v3681_v24, %v3685_v42  ;;  %v8603_v41 = vcombine.low %v3681_v24, %v3685_v42 }
 0x1fd   :  { %6376 = vmatpush2.bf16.msra.mxu0 %v8267_v53  ;;  %v3549_v48 = vld [vmem:[#allocation6 + $0x9a0] sm:$0xff]  ;;  %v3219_v53 = vmax.f32 %v2865_v4, 0.0 }
 0x1fe   :  { %6419 = vmatpush2.bf16.msra.mxu1 %v8395_v54  ;;  %6377 = vmatprep.subr.bf16.mxu0 %v8260_v58  ;;  %v3673_v60 = vld [vmem:[#allocation6 + $0xd80] sm:$0xff]  ;;  %v8475_v54 = vcombine.low %v3553_v28, %v3557_v40  ;;  %v8468_v58 = vcombine.high %v3545_v55, %v3549_v48  ;;  %v8349_v28 = vcombine.low %v9292_v36, %v9294_v12 }
 0x1ff   :  { %6420 = vmatprep.subr.bf16.mxu1 %v8388_v56  ;;  %v3677_v50 = vld [vmem:[#allocation6 + $0xda0] sm:$0xff]  ;;  %v9288_v56 = vpack.c.bf16 %v3227_v43, %v3219_v53 }
 0x200   :  { %v3537_v62 = vld [vmem:[#allocation6 + $0x940] sm:$0xff]  ;;  %v8596_v23 = vcombine.high %v3673_v60, %v3677_v50 }
 0x201   :  { %6378 = vmatpush2.bf16.msra.mxu0 %v8259_v15  ;;  %v3541_v63 = vld [vmem:[#allocation6 + $0x960] sm:$0xff] }
 0x202   :  { %6421 = vmatpush2.bf16.msra.mxu1 %v8387_v22  ;;  %6379 = vmatprep.subr.bf16.mxu0 %v8252_v1  ;;  %v3665_v0 = vld [vmem:[#allocation6 + $0xd40] sm:$0xff]  ;;  %v8467_v22 = vcombine.low %v3545_v55, %v3549_v48  ;;  %v8460_v1 = vcombine.high %v3537_v62, %v3541_v63 }
 0x203   :  { %6422 = vmatprep.subr.bf16.mxu1 %v8380_v2  ;;  %v3669_v15 = vld [vmem:[#allocation6 + $0xd60] sm:$0xff]  ;;  %v8595_v2 = vcombine.low %v3673_v60, %v3677_v50 }
 0x204   :  { %v3529_v3 = vld [vmem:[#allocation6 + $0x900] sm:$0xff]  ;;  %v8588_v9 = vcombine.high %v3665_v0, %v3669_v15  ;;  %v8587_v32 = vcombine.low %v3665_v0, %v3669_v15 }
 0x205   :  { %6380 = vmatpush2.bf16.msra.mxu0 %v8251_v13  ;;  %v3533_v5 = vld [vmem:[#allocation6 + $0x920] sm:$0xff] }
 0x206   :  { %6423 = vmatpush2.bf16.msra.mxu1 %v8379_v14  ;;  %6381 = vmatprep.subr.bf16.mxu0 %v8244_v16  ;;  %v3657_v10 = vld [vmem:[#allocation6 + $0xd00] sm:$0xff]  ;;  %v8459_v14 = vcombine.low %v3537_v62, %v3541_v63  ;;  %v8452_v16 = vcombine.high %v3529_v3, %v3533_v5  ;;  %v8451_v26 = vcombine.low %v3529_v3, %v3533_v5 }
 0x207   :  { %6424 = vmatprep.subr.bf16.mxu1 %v8372_v19  ;;  %v3661_v13 = vld [vmem:[#allocation6 + $0xd20] sm:$0xff] }
 0x208   :  { %v3521_v19 = vld [vmem:[#allocation6 + $0x8c0] sm:$0xff]  ;;  %v8580_v20 = vcombine.high %v3657_v10, %v3661_v13 }
 0x209   :  { %6382 = vmatpush2.bf16.msra.mxu0 %v8243_v61  ;;  %v3525_v52 = vld [vmem:[#allocation6 + $0x8e0] sm:$0xff] }
 0x20a   :  { %6425 = vmatpush2.bf16.msra.mxu1 %v8371_v30  ;;  %6383 = vmatprep.subr.bf16.mxu0 %v8236_v31  ;;  %v3649_v21 = vld [vmem:[#allocation6 + $0xcc0] sm:$0xff]  ;;  %v8444_v61 = vcombine.high %v3521_v19, %v3525_v52  ;;  %v8579_v30 = vcombine.low %v3657_v10, %v3661_v13  ;;  %v8443_v8 = vcombine.low %v3521_v19, %v3525_v52 }
 0x20b   :  { %6426 = vmatprep.subr.bf16.mxu1 %v8364_v34  ;;  %v3653_v25 = vld [vmem:[#allocation6 + $0xce0] sm:$0xff] }
 0x20c   :  { %v3513_v31 = vld [vmem:[#allocation6 + $0x880] sm:$0xff]  ;;  %v8572_v34 = vcombine.high %v3649_v21, %v3653_v25 }
 0x20d   :  { %6384 = vmatpush2.bf16.msra.mxu0 %v8235_v37  ;;  %v3517_v17 = vld [vmem:[#allocation6 + $0x8a0] sm:$0xff] }
 0x20e   :  { %6427 = vmatpush2.bf16.msra.mxu1 %v8363_v27  ;;  %6385 = vmatprep.subr.bf16.mxu0 %v8228_v38  ;;  %v3641_v35 = vld [vmem:[#allocation6 + $0xc80] sm:$0xff]  ;;  %v8436_v37 = vcombine.high %v3513_v31, %v3517_v17  ;;  %v8571_v27 = vcombine.low %v3649_v21, %v3653_v25  ;;  %v8435_v42 = vcombine.low %v3513_v31, %v3517_v17 }
 0x20f   :  { %6428 = vmatprep.subr.bf16.mxu1 %v8356_v39  ;;  %v3645_v47 = vld [vmem:[#allocation6 + $0xca0] sm:$0xff] }
 0x210   :  { %v3505_v38 = vld [vmem:[#allocation6 + $0x840] sm:$0xff]  ;;  %v8564_v39 = vcombine.high %v3641_v35, %v3645_v47 }
 0x211   :  { %6386 = vmatpush2.bf16.msra.mxu0 %v8227_v45  ;;  %v3509_v33 = vld [vmem:[#allocation6 + $0x860] sm:$0xff]  ;;  %v8563_v45 = vcombine.low %v3641_v35, %v3645_v47 }
 0x212   :  { %6429 = vmatpush2.bf16.msra.mxu1 %v8355_v6  ;;  %6441 = vmatprep.subr.bf16.mxu0 %v8476_v44  ;;  %v3633_v40 = vld [vmem:[#allocation6 + $0xc40] sm:$0xff]  ;;  %v8428_v4 = vcombine.high %v3505_v38, %v3509_v33 }
 0x213   :  { %6484 = vmatprep.subr.bf16.mxu1 %v8604_v49  ;;  %v3637_v24 = vld [vmem:[#allocation6 + $0xc60] sm:$0xff]  ;;  %v8427_v49 = vcombine.low %v3505_v38, %v3509_v33 }
 0x214   :  { %6388 = vmatmul.mubr.bf16.vlgmr.msra.gmra.mxu0 %v9215_v51  ;;  %v3497_v6 = vld [vmem:[#allocation6 + $0x800] sm:$0xff]  ;;  %v8556_v43 = vcombine.high %v3633_v40, %v3637_v24  ;;  %v8555_v50 = vcombine.low %v3633_v40, %v3637_v24  ;;  %v2907_v24 = vpop.f32.mrf.mxu0 }
 0x215   :  { %6431 = vmatmul.mubr.bf16.vlgmr.msra.gmra.mxu1 %v9288_v56  ;;  %6442 = vmatpush1.bf16.msra.mxu0 %v8475_v54  ;;  %v3501_v44 = vld [vmem:[#allocation6 + $0x820] sm:$0xff] }
 0x216   :  { %6443 = vmatprep.subr.bf16.mxu0 %v8468_v58  ;;  %6485 = vmatpush1.bf16.msra.mxu1 %v8603_v41  ;;  %v3625_v55 = vld [vmem:[#allocation6 + $0xc00] sm:$0xff]  ;;  %v8420_v60 = vcombine.high %v3497_v6, %v3501_v44  ;;  %v8419_v63 = vcombine.low %v3497_v6, %v3501_v44 }
 0x217   :  { %6486 = vmatprep.subr.bf16.mxu1 %v8596_v23  ;;  %v3629_v48 = vld [vmem:[#allocation6 + $0xc20] sm:$0xff] }
 0x218   :  { %v3617_v53 = vld [vmem:[#allocation6 + $0xbc0] sm:$0xff]  ;;  %v8548_v58 = vcombine.high %v3625_v55, %v3629_v48  ;;  %v8547_v0 = vcombine.low %v3625_v55, %v3629_v48 }
 0x219   :  { %6444 = vmatpush1.bf16.msra.mxu0 %v8467_v22  ;;  %v3621_v54 = vld [vmem:[#allocation6 + $0xbe0] sm:$0xff] }
 0x21a   :  { %6445 = vmatprep.subr.bf16.mxu0 %v8460_v1  ;;  %6487 = vmatpush1.bf16.msra.mxu1 %v8595_v2  ;;  %v3745_v41 = vld [vmem:[#allocation6 + $0xfc0] sm:$0xff]  ;;  %v8540_v23 = vcombine.high %v3617_v53, %v3621_v54  ;;  %v8539_v5 = vcombine.low %v3617_v53, %v3621_v54  ;;  %v2909_v53 = vpop.f32.mrf.mxu0 }
 0x21b   :  { %6488 = vmatprep.subr.bf16.mxu1 %v8588_v9  ;;  %v3749_v62 = vld [vmem:[#allocation6 + $0xfe0] sm:$0xff] }
 0x21c   :  { %v3609_v15 = vld [vmem:[#allocation6 + $0xb80] sm:$0xff]  ;;  %v8668_v1 = vcombine.high %v3745_v41, %v3749_v62  ;;  %v8667_v10 = vcombine.low %v3745_v41, %v3749_v62 }
 0x21d   :  { %6446 = vmatpush1.bf16.msra.mxu0 %v8459_v14  ;;  %v3613_v22 = vld [vmem:[#allocation6 + $0xba0] sm:$0xff] }
 0x21e   :  { %6447 = vmatprep.subr.bf16.mxu0 %v8452_v16  ;;  %6489 = vmatpush1.bf16.msra.mxu1 %v8587_v32  ;;  %v3737_v2 = vld [vmem:[#allocation6 + $0xf80] sm:$0xff]  ;;  %v8532_v9 = vcombine.high %v3609_v15, %v3613_v22  ;;  %v8531_v52 = vcombine.low %v3609_v15, %v3613_v22  ;;  %v9304_v22 = vld [vmem:[#allocation4] sm:$0xff] }
 0x21f   :  { %6490 = vmatprep.subr.bf16.mxu1 %v8580_v20  ;;  %v3741_v3 = vld [vmem:[#allocation6 + $0xfa0] sm:$0xff] }
 0x220   :  { %v3601_v13 = vld [vmem:[#allocation6 + $0xb40] sm:$0xff]  ;;  %v8660_v16 = vcombine.high %v3737_v2, %v3741_v3  ;;  %v8659_v21 = vcombine.low %v3737_v2, %v3741_v3 }
 0x221   :  { %6448 = vmatpush1.bf16.msra.mxu0 %v8451_v26  ;;  %v3605_v14 = vld [vmem:[#allocation6 + $0xb60] sm:$0xff] }
 0x222   :  { %6449 = vmatprep.subr.bf16.mxu0 %v8444_v61  ;;  %6491 = vmatpush1.bf16.msra.mxu1 %v8579_v30  ;;  %v3729_v32 = vld [vmem:[#allocation6 + $0xf40] sm:$0xff]  ;;  %v8524_v20 = vcombine.high %v3601_v13, %v3605_v14  ;;  %v9298_v30 = vpop.f32.mrf.mxu1 }
 0x223   :  { %6492 = vmatprep.subr.bf16.mxu1 %v8572_v34  ;;  %v3733_v19 = vld [vmem:[#allocation6 + $0xf60] sm:$0xff]  ;;  %v8523_v34 = vcombine.low %v3601_v13, %v3605_v14 }
 0x224   :  { %v3593_v25 = vld [vmem:[#allocation6 + $0xb00] sm:$0xff]  ;;  %v8652_v61 = vcombine.high %v3729_v32, %v3733_v19  ;;  %v8651_v47 = vcombine.low %v3729_v32, %v3733_v19  ;;  %v9300_v38 = vpop.f32.mrf.mxu1 }
 0x225   :  { %6450 = vmatpush1.bf16.msra.mxu0 %v8443_v8  ;;  %v3597_v26 = vld [vmem:[#allocation6 + $0xb20] sm:$0xff] }
 0x226   :  { %6451 = vmatprep.subr.bf16.mxu0 %v8436_v37  ;;  %6493 = vmatpush1.bf16.msra.mxu1 %v8571_v27  ;;  %v3721_v31 = vld [vmem:[#allocation6 + $0xf00] sm:$0xff]  ;;  %v8516_v35 = vcombine.high %v3593_v25, %v3597_v26  ;;  %v8515_v40 = vcombine.low %v3593_v25, %v3597_v26 }
 0x227   :  { %6494 = vmatprep.subr.bf16.mxu1 %v8564_v39  ;;  %v3725_v17 = vld [vmem:[#allocation6 + $0xf20] sm:$0xff] }
 0x228   :  { %v3585_v8 = vld [vmem:[#allocation6 + $0xac0] sm:$0xff]  ;;  %v8644_v27 = vcombine.high %v3721_v31, %v3725_v17 }
 0x229   :  { %6452 = vmatpush1.bf16.msra.mxu0 %v8435_v42  ;;  %v3589_v37 = vld [vmem:[#allocation6 + $0xae0] sm:$0xff] }
 0x22a   :  { %6453 = vmatprep.subr.bf16.mxu0 %v8428_v4  ;;  %6495 = vmatpush1.bf16.msra.mxu1 %v8563_v45  ;;  %v3713_v33 = vld [vmem:[#allocation6 + $0xec0] sm:$0xff]  ;;  %v8508_v42 = vcombine.high %v3585_v8, %v3589_v37  ;;  %v8643_v4 = vcombine.low %v3721_v31, %v3725_v17 }
 0x22b   :  { %6496 = vmatprep.subr.bf16.mxu1 %v8556_v43  ;;  %v3717_v39 = vld [vmem:[#allocation6 + $0xee0] sm:$0xff]  ;;  %v2954_v43 = vpop.f32.mrf.mxu1 }
 0x22c   :  { %v3577_v45 = vld [vmem:[#allocation6 + $0xa80] sm:$0xff]  ;;  %v8636_v44 = vcombine.high %v3713_v33, %v3717_v39 }
 0x22d   :  { %6454 = vmatpush1.bf16.msra.mxu0 %v8427_v49  ;;  %v3581_v6 = vld [vmem:[#allocation6 + $0xaa0] sm:$0xff]  ;;  %v512_v49 = vsub.s32 5, %v9165_v18 }
 0x22e   :  { %6455 = vmatprep.subr.bf16.mxu0 %v8420_v60  ;;  %6497 = vmatpush1.bf16.msra.mxu1 %v8555_v50  ;;  %v3705_v55 = vld [vmem:[#allocation6 + $0xe80] sm:$0xff]  ;;  %v8507_v60 = vcombine.low %v3585_v8, %v3589_v37  ;;  %v508_v50 = vsub.s32 4, %v9165_v18  ;;  %v8500_v54 = vcombine.high %v3577_v45, %v3581_v6  ;;  %v8499_v2 = vcombine.low %v3577_v45, %v3581_v6 }
 0x22f   :  { %6498 = vmatprep.subr.bf16.mxu1 %v8548_v58  ;;  %v3709_v48 = vld [vmem:[#allocation6 + $0xea0] sm:$0xff]  ;;  %v8635_v58 = vcombine.low %v3713_v33, %v3717_v39 }
 0x230   :  { %v3569_v41 = vld [vmem:[#allocation6 + $0xa40] sm:$0xff]  ;;  %v509_v3 = vrot.slane %v9304_v22, %v508_v50 }
 0x231   :  { %6456 = vmatpush1.bf16.msra.mxu0 %v8419_v63  ;;  %v3573_v62 = vld [vmem:[#allocation6 + $0xa60] sm:$0xff]  ;;  %v8628_v63 = vcombine.high %v3705_v55, %v3709_v48 }
 0x232   :  { %6457 = vmatprep.subr.bf16.mxu0 %v8540_v23  ;;  %6499 = vmatpush1.bf16.msra.mxu1 %v8547_v0  ;;  %v2956_v23 = vpop.f32.mrf.mxu1  ;;  %v3697_v0 = vld [vmem:[#allocation6 + $0xe40] sm:$0xff]  ;;  %v2908_v25 = vadd.f32 %v2907_v24, %v509_v3 }
 0x233   :  { %6500 = vmatprep.subr.bf16.mxu1 %v8668_v1  ;;  %v3701_v15 = vld [vmem:[#allocation6 + $0xe60] sm:$0xff]  ;;  %v513_v1 = vrot.slane %v9304_v22, %v512_v49 }
 0x234   :  { %v3561_v13 = vld [vmem:[#allocation6 + $0xa00] sm:$0xff]  ;;  %v3036_v32 = vpop.f32.mrf.mxu1  ;;  %v8619_v31 = vcombine.low %v3697_v0, %v3701_v15 }
 0x235   :  { %6458 = vmatpush2.bf16.msra.mxu0 %v8539_v5  ;;  %v2911_v5 = vpop.f32.mrf.mxu0  ;;  %v3565_v14 = vld [vmem:[#allocation6 + $0xa20] sm:$0xff] }
 0x236   :  { %6459 = vmatprep.subr.bf16.mxu0 %v8532_v9  ;;  %6501 = vmatpush2.bf16.msra.mxu1 %v8667_v10  ;;  %v8492_v9 = vcombine.high %v3569_v41, %v3573_v62  ;;  %v8627_v10 = vcombine.low %v3705_v55, %v3709_v48  ;;  %v3689_v19 = vld [vmem:[#allocation6 + $0xe00] sm:$0xff]  ;;  %v2912_v17 = vadd.f32 %v2911_v5, %v509_v3  ;;  %v3038_v8 = vpop.f32.mrf.mxu1  ;;  %v3294_v3 = vld [vmem:[#allocation6 + $0x1a8] sm:$0xff] }
 0x237   :  { %6502 = vmatprep.subr.bf16.mxu1 %v8660_v16  ;;  %v8620_v16 = vcombine.high %v3697_v0, %v3701_v15  ;;  %v2913_v26 = vpop.f32.mrf.mxu0  ;;  %v8483_v39 = vcombine.low %v3561_v13, %v3565_v14 }
 0x238   :  { %v2914_v33 = vadd.f32 %v2913_v26, %v513_v1  ;;  %v2955_v45 = vadd.f32 %v2954_v43, %v2912_v17  ;;  %v3040_v55 = vpop.f32.mrf.mxu1  ;;  %v3266_v26 = vld [vmem:[#allocation6 + $0xc8] sm:$0xff] }
 0x239   :  { %6460 = vmatpush2.bf16.msra.mxu0 %v8531_v52  ;;  %v3693_v52 = vld [vmem:[#allocation6 + $0xe20] sm:$0xff] }
 0x23a   :  { %6461 = vmatprep.subr.bf16.mxu0 %v8524_v20  ;;  %6503 = vmatpush2.bf16.msra.mxu1 %v8659_v21  ;;  %v2910_v20 = vadd.f32 %v2909_v53, %v513_v1  ;;  %v8491_v21 = vcombine.low %v3569_v41, %v3573_v62  ;;  %v3042_v62 = vpop.f32.mrf.mxu1 }
 0x23b   :  { %6504 = vmatprep.subr.bf16.mxu1 %v8652_v61  ;;  %v8484_v61 = vcombine.high %v3561_v13, %v3565_v14  ;;  %v3282_v14 = vld [vmem:[#allocation6 + $0x148] sm:$0xff] }
 0x23d   :  { %6462 = vmatpush2.bf16.msra.mxu0 %v8523_v34  ;;  %v3298_v34 = vld [vmem:[#allocation6 + $0x1c8] sm:$0xff] }
 0x23e   :  { %6463 = vmatprep.subr.bf16.mxu0 %v8516_v35  ;;  %6505 = vmatpush2.bf16.msra.mxu1 %v8651_v47  ;;  %v3302_v35 = vld [vmem:[#allocation6 + $0x1e8] sm:$0xff]  ;;  %v8612_v47 = vcombine.high %v3689_v19, %v3693_v52 }
 0x23f   :  { %6506 = vmatprep.subr.bf16.mxu1 %v8644_v27  ;;  %v2953_v27 = vadd.f32 %v9300_v38, %v2910_v20  ;;  %v2957_v38 = vadd.f32 %v2956_v23, %v2914_v33  ;;  %v8221_v23 = vcombine.low %v3298_v34, %v3302_v35  ;;  %v3278_v20 = vld [vmem:[#allocation6 + $0x128] sm:$0xff] }
 0x241   :  { %6464 = vmatpush2.bf16.msra.mxu0 %v8515_v40  ;;  %v2951_v40 = vadd.f32 %v9298_v30, %v2908_v25 }
 0x242   :  { %6465 = vmatprep.subr.bf16.mxu0 %v8508_v42  ;;  %6507 = vmatpush2.bf16.msra.mxu1 %v8643_v4  ;;  %v8222_v42 = vcombine.high %v3298_v34, %v3302_v35  ;;  %v8611_v4 = vcombine.low %v3689_v19, %v3693_v52  ;;  %v3274_v52 = vld [vmem:[#allocation6 + $0x108] sm:$0xff] }
 0x243   :  { %6508 = vmatprep.subr.bf16.mxu1 %v8636_v44  ;;  %v8350_v44 = vcombine.high %v9292_v36, %v9294_v12  ;;  %v8198_v25 = vcombine.high %v3274_v52, %v3278_v20  ;;  %v3258_v34 = vld [vmem:[#allocation6 + $0x88] sm:$0xff] }
 0x244   :  { %v3262_v35 = vld [vmem:[#allocation6 + $0xa8] sm:$0xff] }
 0x245   :  { %6466 = vmatpush2.bf16.msra.mxu0 %v8507_v60  ;;  %v8181_v33 = vcombine.low %v3258_v34, %v3262_v35  ;;  %v3506_v12 = vld [vmem:[#allocation6 + $0x848] sm:$0xff] }
 0x246   :  { %6467 = vmatprep.subr.bf16.mxu0 %v8500_v54  ;;  %6509 = vmatpush2.bf16.msra.mxu1 %v8635_v58 }
 0x247   :  { %6510 = vmatprep.subr.bf16.mxu1 %v8628_v63 }
 0x249   :  { %6468 = vmatpush2.bf16.msra.mxu0 %v8499_v2  ;;  %v3290_v2 = vld [vmem:[#allocation6 + $0x188] sm:$0xff] }
 0x24a   :  { %6469 = vmatprep.subr.bf16.mxu0 %v8492_v9  ;;  %6511 = vmatpush2.bf16.msra.mxu1 %v8627_v10  ;;  %v8214_v13 = vcombine.high %v3290_v2, %v3294_v3 }
 0x24b   :  { %6512 = vmatprep.subr.bf16.mxu1 %v8620_v16  ;;  %v3286_v16 = vld [vmem:[#allocation6 + $0x168] sm:$0xff] }
 0x24c   :  { %v2993_v37 = vpop.f32.mrf.mxu0  ;;  %v8206_v19 = vcombine.high %v3282_v14, %v3286_v16 }
 0x24d   :  { %6470 = vmatpush2.bf16.msra.mxu0 %v8491_v21  ;;  %v2994_v48 = vadd.f32 %v2993_v37, %v2951_v40  ;;  %v8205_v21 = vcombine.low %v3282_v14, %v3286_v16  ;;  %v3250_v37 = vld [vmem:[#allocation6 + $0x48] sm:$0xff] }
 0x24e   :  { %v2995_v24 = vpop.f32.mrf.mxu0  ;;  %6471 = vmatprep.subr.bf16.mxu0 %v8484_v61  ;;  %6513 = vmatpush2.bf16.msra.mxu1 %v8619_v31  ;;  %v3270_v61 = vld [vmem:[#allocation6 + $0xe8] sm:$0xff]  ;;  %v8197_v31 = vcombine.low %v3274_v52, %v3278_v20  ;;  %v520_v20 = vsub.s32 7, %v9165_v18 }
 0x24f   :  { %v2996_v6 = vadd.f32 %v2995_v24, %v2953_v27  ;;  %6514 = vmatprep.subr.bf16.mxu1 %v8612_v47  ;;  %v3037_v43 = vadd.f32 %v3036_v32, %v2994_v48  ;;  %v8213_v32 = vcombine.low %v3290_v2, %v3294_v3  ;;  %v8190_v17 = vcombine.high %v3266_v26, %v3270_v61  ;;  %v3254_v27 = vld [vmem:[#allocation6 + $0x68] sm:$0xff] }
 0x250   :  { %v2997_v60 = vpop.f32.mrf.mxu0  ;;  %v8189_v47 = vcombine.low %v3266_v26, %v3270_v61  ;;  %v3242_v40 = vld [vmem:[#allocation6 + $0x8] sm:$0xff] }
 0x251   :  { %v2998_v53 = vadd.f32 %v2997_v60, %v2955_v45  ;;  %6472 = vmatpush2.bf16.msra.mxu0 %v8483_v39  ;;  %v3039_v30 = vadd.f32 %v3038_v8, %v2996_v6  ;;  %v3221_v5 = vmax.f32 %v3037_v43, 0.0  ;;  %v8182_v8 = vcombine.high %v3258_v34, %v3262_v35  ;;  %v3246_v24 = vld [vmem:[#allocation6 + $0x28] sm:$0xff] }
 0x252   :  { %v2999_v54 = vpop.f32.mrf.mxu0  ;;  %6527 = vmatprep.subr.bf16.mxu0 %v8222_v42  ;;  %6515 = vmatpush2.bf16.msra.mxu1 %v8611_v4  ;;  %v8174_v39 = vcombine.high %v3250_v37, %v3254_v27  ;;  %v8173_v42 = vcombine.low %v3250_v37, %v3254_v27  ;;  %v8166_v4 = vcombine.high %v3242_v40, %v3246_v24  ;;  %v3362_v45 = vld [vmem:[#allocation6 + $0x3c8] sm:$0xff] }
 0x253   :  { %v3041_v58 = vadd.f32 %v3040_v55, %v2998_v53  ;;  %v3000_v41 = vadd.f32 %v2999_v54, %v2957_v38  ;;  %6570 = vmatprep.subr.bf16.mxu1 %v8350_v44  ;;  %v3222_v15 = vmax.f32 %v3039_v30, 0.0  ;;  %v3366_v6 = vld [vmem:[#allocation6 + $0x3e8] sm:$0xff]  ;;  %v8165_v44 = vcombine.low %v3242_v40, %v3246_v24 }
 0x254   :  { %v8286_v55 = vcombine.high %v3362_v45, %v3366_v6  ;;  %v3354_v48 = vld [vmem:[#allocation6 + $0x388] sm:$0xff]  ;;  %v8285_v38 = vcombine.low %v3362_v45, %v3366_v6 }
 0x255   :  { %v3043_v63 = vadd.f32 %v3042_v62, %v3000_v41  ;;  %v3229_v0 = vmax.f32 %v3041_v58, 0.0  ;;  %v3358_v60 = vld [vmem:[#allocation6 + $0x3a8] sm:$0xff] }
 0x256   :  { %v8278_v53 = vcombine.high %v3354_v48, %v3358_v60  ;;  %v3346_v54 = vld [vmem:[#allocation6 + $0x348] sm:$0xff]  ;;  %v8277_v58 = vcombine.low %v3354_v48, %v3358_v60 }
 0x257   :  { %v3230_v1 = vmax.f32 %v3043_v63, 0.0  ;;  %v9318_v10 = vpack.c.bf16 %v3229_v0, %v3221_v5  ;;  %v3350_v30 = vld [vmem:[#allocation6 + $0x368] sm:$0xff]  ;;  %v3079_v5 = vpop.f32.mrf.mxu1 }
 0x258   :  { %v8270_v41 = vcombine.high %v3346_v54, %v3350_v30  ;;  %v3338_v62 = vld [vmem:[#allocation6 + $0x308] sm:$0xff]  ;;  %v8269_v63 = vcombine.low %v3346_v54, %v3350_v30 }
 0x259   :  { %v9316_v9 = vpack.c.bf16 %v3230_v1, %v3222_v15  ;;  %v3342_v43 = vld [vmem:[#allocation6 + $0x328] sm:$0xff] }
 0x25a   :  { %v8262_v0 = vcombine.high %v3338_v62, %v3342_v43  ;;  %v3330_v15 = vld [vmem:[#allocation6 + $0x2c8] sm:$0xff]  ;;  %v8261_v2 = vcombine.low %v3338_v62, %v3342_v43 }
 0x25b   :  { %6473 = vmatprep.mubr.bf16.mxu0 %v9316_v9  ;;  %v3334_v1 = vld [vmem:[#allocation6 + $0x2e8] sm:$0xff] }
 0x25c   :  { %6474 = vmatmul.mubr.bf16.vlgmr.msra.gmra.mxu0 %v9318_v10  ;;  %v8254_v3 = vcombine.high %v3330_v15, %v3334_v1  ;;  %v8253_v14 = vcombine.low %v3330_v15, %v3334_v1  ;;  %v3318_v52 = vld [vmem:[#allocation6 + $0x268] sm:$0xff] }
 0x25d   :  { %6528 = vmatpush1.bf16.msra.mxu0 %v8221_v23  ;;  %6559 = vmatprep.mubr.bf16.mxu0 %v9269_v11  ;;  %v3322_v23 = vld [vmem:[#allocation6 + $0x288] sm:$0xff] }
 0x25e   :  { %6529 = vmatprep.subr.bf16.mxu0 %v8214_v13  ;;  %v3326_v13 = vld [vmem:[#allocation6 + $0x2a8] sm:$0xff] }
 0x25f   :  { %v8246_v16 = vcombine.high %v3322_v23, %v3326_v13  ;;  %v8245_v26 = vcombine.low %v3322_v23, %v3326_v13  ;;  %v3306_v34 = vld [vmem:[#allocation6 + $0x208] sm:$0xff] }
 0x260   :  { %v3310_v35 = vld [vmem:[#allocation6 + $0x228] sm:$0xff] }
 0x261   :  { %6530 = vmatpush1.bf16.msra.mxu0 %v8213_v32  ;;  %v3081_v32 = vpop.f32.mrf.mxu1  ;;  %v3554_v24 = vld [vmem:[#allocation6 + $0x9c8] sm:$0xff] }
 0x262   :  { %6531 = vmatprep.subr.bf16.mxu0 %v8206_v19  ;;  %v3314_v19 = vld [vmem:[#allocation6 + $0x248] sm:$0xff] }
 0x263   :  { %v8237_v27 = vcombine.low %v3314_v19, %v3318_v52  ;;  %v3546_v30 = vld [vmem:[#allocation6 + $0x988] sm:$0xff] }
 0x265   :  { %6532 = vmatpush1.bf16.msra.mxu0 %v8205_v21 }
 0x266   :  { %6533 = vmatprep.subr.bf16.mxu0 %v8198_v25  ;;  %v516_v25 = vsub.s32 6, %v9165_v18 }
 0x268   :  { %v517_v37 = vrot.slane %v9304_v22, %v516_v25 }
 0x269   :  { %6534 = vmatpush1.bf16.msra.mxu0 %v8197_v31  ;;  %v8238_v31 = vcombine.high %v3314_v19, %v3318_v52 }
 0x26a   :  { %6535 = vmatprep.subr.bf16.mxu0 %v8190_v17  ;;  %v3083_v17 = vpop.f32.mrf.mxu1  ;;  %v3080_v6 = vadd.f32 %v3079_v5, %v517_v37 }
 0x26b   :  { %v3084_v48 = vadd.f32 %v3083_v17, %v517_v37  ;;  %v3530_v37 = vld [vmem:[#allocation6 + $0x908] sm:$0xff] }
 0x26c   :  { %v3085_v40 = vpop.f32.mrf.mxu1 }
 0x26d   :  { %6536 = vmatpush1.bf16.msra.mxu0 %v8189_v47  ;;  %v521_v47 = vrot.slane %v9304_v22, %v520_v20 }
 0x26e   :  { %6537 = vmatprep.subr.bf16.mxu0 %v8182_v8 }
 0x271   :  { %6538 = vmatpush1.bf16.msra.mxu0 %v8181_v33 }
 0x272   :  { %6539 = vmatprep.subr.bf16.mxu0 %v8174_v39  ;;  %v8230_v39 = vcombine.high %v3306_v34, %v3310_v35 }
 0x275   :  { %6540 = vmatpush1.bf16.msra.mxu0 %v8173_v42  ;;  %v3558_v42 = vld [vmem:[#allocation6 + $0x9e8] sm:$0xff] }
 0x276   :  { %6541 = vmatprep.subr.bf16.mxu0 %v8166_v4  ;;  %v3082_v4 = vadd.f32 %v3081_v32, %v521_v47  ;;  %v8477_v1 = vcombine.low %v3554_v24, %v3558_v42 }
 0x279   :  { %6542 = vmatpush1.bf16.msra.mxu0 %v8165_v44 }
 0x27a   :  { %6543 = vmatprep.subr.bf16.mxu0 %v8286_v55  ;;  %v8229_v55 = vcombine.low %v3306_v34, %v3310_v35  ;;  %v3418_v34 = vld [vmem:[#allocation6 + $0x588] sm:$0xff] }
 0x27d   :  { %6544 = vmatpush2.bf16.msra.mxu0 %v8285_v38 }
 0x27e   :  { %6545 = vmatprep.subr.bf16.mxu0 %v8278_v53  ;;  %v8478_v53 = vcombine.high %v3554_v24, %v3558_v42 }
 0x281   :  { %6546 = vmatpush2.bf16.msra.mxu0 %v8277_v58  ;;  %v3550_v58 = vld [vmem:[#allocation6 + $0x9a8] sm:$0xff] }
 0x282   :  { %6547 = vmatprep.subr.bf16.mxu0 %v8270_v41  ;;  %v3086_v41 = vadd.f32 %v3085_v40, %v521_v47  ;;  %v8470_v5 = vcombine.high %v3546_v30, %v3550_v58 }
 0x285   :  { %6548 = vmatpush2.bf16.msra.mxu0 %v8269_v63 }
 0x286   :  { %6549 = vmatprep.subr.bf16.mxu0 %v8262_v0 }
 0x289   :  { %6550 = vmatpush2.bf16.msra.mxu0 %v8261_v2 }
 0x28a   :  { %6551 = vmatprep.subr.bf16.mxu0 %v8254_v3 }
 0x28c   :  { %v3122_v21 = vpop.f32.mrf.mxu0 }
 0x28d   :  { %6552 = vmatpush2.bf16.msra.mxu0 %v8253_v14  ;;  %v3123_v22 = vadd.f32 %v3122_v21, %v3080_v6  ;;  %v3538_v14 = vld [vmem:[#allocation6 + $0x948] sm:$0xff] }
 0x28e   :  { %v3124_v61 = vpop.f32.mrf.mxu0  ;;  %6553 = vmatprep.subr.bf16.mxu0 %v8246_v16  ;;  %v3542_v16 = vld [vmem:[#allocation6 + $0x968] sm:$0xff] }
 0x28f   :  { %v3125_v60 = vadd.f32 %v3124_v61, %v3082_v4  ;;  %v3526_v6 = vld [vmem:[#allocation6 + $0x8e8] sm:$0xff] }
 0x290   :  { %v3126_v8 = vpop.f32.mrf.mxu0 }
 0x291   :  { %6554 = vmatpush2.bf16.msra.mxu0 %v8245_v26  ;;  %v3127_v62 = vadd.f32 %v3126_v8, %v3084_v48  ;;  %v8469_v26 = vcombine.low %v3546_v30, %v3550_v58  ;;  %v3422_v8 = vld [vmem:[#allocation6 + $0x5a8] sm:$0xff] }
 0x292   :  { %v3128_v33 = vpop.f32.mrf.mxu0  ;;  %6555 = vmatprep.subr.bf16.mxu0 %v8238_v31  ;;  %v8462_v31 = vcombine.high %v3538_v14, %v3542_v16  ;;  %v8342_v42 = vcombine.high %v3418_v34, %v3422_v8  ;;  %v3402_v30 = vld [vmem:[#allocation6 + $0x508] sm:$0xff] }
 0x293   :  { %v3129_v2 = vadd.f32 %v3128_v33, %v3086_v41  ;;  %v3406_v58 = vld [vmem:[#allocation6 + $0x528] sm:$0xff] }
 0x294   :  { %v3208_v45 = vpop.f32.mrf.mxu0  ;;  %v8326_v36 = vcombine.high %v3402_v30, %v3406_v58 }
 0x295   :  { %v3165_v44 = vpop.f32.mrf.mxu1  ;;  %6556 = vmatpush2.bf16.msra.mxu0 %v8237_v27  ;;  %v3534_v27 = vld [vmem:[#allocation6 + $0x928] sm:$0xff] }
 0x296   :  { %v3210_v38 = vpop.f32.mrf.mxu0  ;;  %6557 = vmatprep.subr.bf16.mxu0 %v8230_v39  ;;  %v3166_v0 = vadd.f32 %v3165_v44, %v3123_v22  ;;  %v8461_v39 = vcombine.low %v3538_v14, %v3542_v16  ;;  %v8454_v4 = vcombine.high %v3530_v37, %v3534_v27  ;;  %v3410_v44 = vld [vmem:[#allocation6 + $0x548] sm:$0xff]  ;;  %v8453_v48 = vcombine.low %v3530_v37, %v3534_v27 }
 0x297   :  { %v3167_v54 = vpop.f32.mrf.mxu1  ;;  %v3514_v22 = vld [vmem:[#allocation6 + $0x888] sm:$0xff] }
 0x298   :  { %v3168_v43 = vadd.f32 %v3167_v54, %v3125_v60  ;;  %v3212_v63 = vpop.f32.mrf.mxu0  ;;  %v3209_v21 = vadd.f32 %v3208_v45, %v3166_v0  ;;  %v3522_v45 = vld [vmem:[#allocation6 + $0x8c8] sm:$0xff]  ;;  %v8341_v60 = vcombine.low %v3418_v34, %v3422_v8 }
 0x299   :  { %v3169_v15 = vpop.f32.mrf.mxu1  ;;  %6558 = vmatpush2.bf16.msra.mxu0 %v8229_v55  ;;  %v3414_v55 = vld [vmem:[#allocation6 + $0x568] sm:$0xff]  ;;  %v8445_v41 = vcombine.low %v3522_v45, %v3526_v6 }
 0x29a   :  { %v3170_v3 = vadd.f32 %v3169_v15, %v3127_v62  ;;  %6613 = vmatprep.subr.bf16.mxu0 %v8478_v53  ;;  %v3214_v13 = vpop.f32.mrf.mxu0  ;;  %v3211_v32 = vadd.f32 %v3210_v38, %v3168_v43  ;;  %v3223_v33 = vmax.f32 %v3209_v21, 0.0  ;;  %v8446_v38 = vcombine.high %v3522_v45, %v3526_v6  ;;  %v3518_v54 = vld [vmem:[#allocation6 + $0x8a8] sm:$0xff] }
 0x29b   :  { %v3171_v23 = vpop.f32.mrf.mxu1  ;;  %v8334_v53 = vcombine.high %v3410_v44, %v3414_v55  ;;  %v8333_v62 = vcombine.low %v3410_v44, %v3414_v55  ;;  %v8438_v43 = vcombine.high %v3514_v22, %v3518_v54  ;;  %v3398_v0 = vld [vmem:[#allocation6 + $0x4e8] sm:$0xff]  ;;  %v8437_v15 = vcombine.low %v3514_v22, %v3518_v54 }
 0x29c   :  { %v3213_v19 = vadd.f32 %v3212_v63, %v3170_v3  ;;  %v3172_v52 = vadd.f32 %v3171_v23, %v3129_v2  ;;  %6560 = vmatmul.mubr.bf16.vlgmr.msra.gmra.mxu0 %v9215_v51  ;;  %v3224_v35 = vmax.f32 %v3211_v32, 0.0  ;;  %v3394_v63 = vld [vmem:[#allocation6 + $0x4c8] sm:$0xff] }
 0x29d   :  { %6614 = vmatpush1.bf16.msra.mxu0 %v8477_v1  ;;  %6645 = vmatprep.mubr.bf16.mxu0 %v9316_v9  ;;  %v8325_v1 = vcombine.low %v3402_v30, %v3406_v58  ;;  %v8318_v3 = vcombine.high %v3394_v63, %v3398_v0  ;;  %v3502_v23 = vld [vmem:[#allocation6 + $0x828] sm:$0xff]  ;;  %v8317_v32 = vcombine.low %v3394_v63, %v3398_v0 }
 0x29e   :  { %v3215_v61 = vadd.f32 %v3214_v13, %v3172_v52  ;;  %6615 = vmatprep.subr.bf16.mxu0 %v8470_v5  ;;  %v3231_v17 = vmax.f32 %v3213_v19, 0.0  ;;  %v3498_v5 = vld [vmem:[#allocation6 + $0x808] sm:$0xff] }
 0x29f   :  { %v3386_v13 = vld [vmem:[#allocation6 + $0x488] sm:$0xff]  ;;  %v8422_v19 = vcombine.high %v3498_v5, %v3502_v23 }
 0x2a0   :  { %v3232_v47 = vmax.f32 %v3215_v61, 0.0  ;;  %v9335_v24 = vpack.c.bf16 %v3231_v17, %v3223_v33  ;;  %v3390_v14 = vld [vmem:[#allocation6 + $0x4a8] sm:$0xff]  ;;  %v8421_v17 = vcombine.low %v3498_v5, %v3502_v23 }
 0x2a1   :  { %6616 = vmatpush1.bf16.msra.mxu0 %v8469_v26  ;;  %v8310_v52 = vcombine.high %v3386_v13, %v3390_v14  ;;  %v3618_v21 = vld [vmem:[#allocation6 + $0xbc8] sm:$0xff]  ;;  %v8309_v34 = vcombine.low %v3386_v13, %v3390_v14 }
 0x2a2   :  { %v9333_v40 = vpack.c.bf16 %v3232_v47, %v3224_v35  ;;  %6617 = vmatprep.subr.bf16.mxu0 %v8462_v31  ;;  %v3622_v26 = vld [vmem:[#allocation6 + $0xbe8] sm:$0xff] }
 0x2a3   :  { %v3378_v61 = vld [vmem:[#allocation6 + $0x448] sm:$0xff]  ;;  %v8542_v35 = vcombine.high %v3618_v21, %v3622_v26 }
 0x2a4   :  { %6516 = vmatprep.mubr.bf16.mxu1 %v9333_v40  ;;  %v3382_v31 = vld [vmem:[#allocation6 + $0x468] sm:$0xff] }
 0x2a5   :  { %6517 = vmatmul.mubr.bf16.vlgmr.msra.gmra.mxu1 %v9335_v24  ;;  %6618 = vmatpush1.bf16.msra.mxu0 %v8461_v39  ;;  %v8302_v47 = vcombine.high %v3378_v61, %v3382_v31  ;;  %v3610_v8 = vld [vmem:[#allocation6 + $0xb88] sm:$0xff]  ;;  %v8541_v39 = vcombine.low %v3618_v21, %v3622_v26 }
 0x2a6   :  { %6571 = vmatpush1.bf16.msra.mxu1 %v8349_v28  ;;  %6602 = vmatprep.mubr.bf16.mxu1 %v9277_v59  ;;  %v3510_v28 = vld [vmem:[#allocation6 + $0x868] sm:$0xff] }
 0x2a7   :  { %6572 = vmatprep.subr.bf16.mxu1 %v8342_v42  ;;  %6619 = vmatprep.subr.bf16.mxu0 %v8454_v4  ;;  %v8430_v2 = vcombine.high %v3506_v12, %v3510_v28  ;;  %v8429_v16 = vcombine.low %v3506_v12, %v3510_v28  ;;  %v3614_v37 = vld [vmem:[#allocation6 + $0xba8] sm:$0xff]  ;;  %v8301_v42 = vcombine.low %v3378_v61, %v3382_v31 }
 0x2a8   :  { %v3370_v27 = vld [vmem:[#allocation6 + $0x408] sm:$0xff]  ;;  %v8534_v4 = vcombine.high %v3610_v8, %v3614_v37 }
 0x2a9   :  { %6620 = vmatpush1.bf16.msra.mxu0 %v8453_v48  ;;  %v3374_v33 = vld [vmem:[#allocation6 + $0x428] sm:$0xff] }
 0x2aa   :  { %6573 = vmatpush1.bf16.msra.mxu1 %v8341_v60  ;;  %6621 = vmatprep.subr.bf16.mxu0 %v8446_v38  ;;  %v8294_v45 = vcombine.high %v3370_v27, %v3374_v33  ;;  %v3602_v6 = vld [vmem:[#allocation6 + $0xb48] sm:$0xff]  ;;  %v8533_v60 = vcombine.low %v3610_v8, %v3614_v37  ;;  %v8293_v38 = vcombine.low %v3370_v27, %v3374_v33 }
 0x2ab   :  { %6574 = vmatprep.subr.bf16.mxu1 %v8334_v53  ;;  %v3606_v44 = vld [vmem:[#allocation6 + $0xb68] sm:$0xff] }
 0x2ac   :  { %v3490_v55 = vld [vmem:[#allocation6 + $0x7c8] sm:$0xff]  ;;  %v8526_v53 = vcombine.high %v3602_v6, %v3606_v44 }
 0x2ad   :  { %6622 = vmatpush1.bf16.msra.mxu0 %v8445_v41  ;;  %v3494_v48 = vld [vmem:[#allocation6 + $0x7e8] sm:$0xff] }
 0x2ae   :  { %6575 = vmatpush1.bf16.msra.mxu1 %v8333_v62  ;;  %6623 = vmatprep.subr.bf16.mxu0 %v8438_v43  ;;  %v8414_v22 = vcombine.high %v3490_v55, %v3494_v48  ;;  %v3594_v54 = vld [vmem:[#allocation6 + $0xb08] sm:$0xff]  ;;  %v8525_v62 = vcombine.low %v3602_v6, %v3606_v44  ;;  %v8413_v43 = vcombine.low %v3490_v55, %v3494_v48  ;;  %v3299_v44 = vld [vmem:[#allocation6 + $0x1d0] sm:$0xff] }
 0x2af   :  { %6576 = vmatprep.subr.bf16.mxu1 %v8326_v36  ;;  %v3598_v30 = vld [vmem:[#allocation6 + $0xb28] sm:$0xff]  ;;  %v3303_v55 = vld [vmem:[#allocation6 + $0x1f0] sm:$0xff] }
 0x2b0   :  { %v3482_v58 = vld [vmem:[#allocation6 + $0x788] sm:$0xff]  ;;  %v8518_v36 = vcombine.high %v3594_v54, %v3598_v30 }
 0x2b1   :  { %6624 = vmatpush1.bf16.msra.mxu0 %v8437_v15  ;;  %v3486_v41 = vld [vmem:[#allocation6 + $0x7a8] sm:$0xff] }
 0x2b2   :  { %6577 = vmatpush1.bf16.msra.mxu1 %v8325_v1  ;;  %6625 = vmatprep.subr.bf16.mxu0 %v8430_v2  ;;  %v8406_v12 = vcombine.high %v3482_v58, %v3486_v41  ;;  %v3586_v28 = vld [vmem:[#allocation6 + $0xac8] sm:$0xff]  ;;  %v8517_v1 = vcombine.low %v3594_v54, %v3598_v30  ;;  %v8405_v2 = vcombine.low %v3482_v58, %v3486_v41  ;;  %v3291_v30 = vld [vmem:[#allocation6 + $0x190] sm:$0xff] }
 0x2b3   :  { %6578 = vmatprep.subr.bf16.mxu1 %v8318_v3  ;;  %v3590_v63 = vld [vmem:[#allocation6 + $0xae8] sm:$0xff]  ;;  %v3295_v58 = vld [vmem:[#allocation6 + $0x1b0] sm:$0xff] }
 0x2b4   :  { %v3474_v0 = vld [vmem:[#allocation6 + $0x748] sm:$0xff]  ;;  %v8510_v3 = vcombine.high %v3586_v28, %v3590_v63 }
 0x2b5   :  { %6626 = vmatpush1.bf16.msra.mxu0 %v8429_v16  ;;  %v3478_v15 = vld [vmem:[#allocation6 + $0x768] sm:$0xff] }
 0x2b6   :  { %6579 = vmatpush1.bf16.msra.mxu1 %v8317_v32  ;;  %6627 = vmatprep.subr.bf16.mxu0 %v8422_v19  ;;  %v8398_v5 = vcombine.high %v3474_v0, %v3478_v15  ;;  %v3578_v23 = vld [vmem:[#allocation6 + $0xa88] sm:$0xff]  ;;  %v8509_v32 = vcombine.low %v3586_v28, %v3590_v63  ;;  %v8397_v19 = vcombine.low %v3474_v0, %v3478_v15  ;;  %v3283_v63 = vld [vmem:[#allocation6 + $0x150] sm:$0xff] }
 0x2b7   :  { %6580 = vmatprep.subr.bf16.mxu1 %v8310_v52  ;;  %v3582_v13 = vld [vmem:[#allocation6 + $0xaa8] sm:$0xff]  ;;  %v3287_v0 = vld [vmem:[#allocation6 + $0x170] sm:$0xff] }
 0x2b8   :  { %v3466_v14 = vld [vmem:[#allocation6 + $0x708] sm:$0xff]  ;;  %v8502_v52 = vcombine.high %v3578_v23, %v3582_v13 }
 0x2b9   :  { %6628 = vmatpush1.bf16.msra.mxu0 %v8421_v17  ;;  %v3470_v16 = vld [vmem:[#allocation6 + $0x728] sm:$0xff] }
 0x2ba   :  { %6581 = vmatpush1.bf16.msra.mxu1 %v8309_v34  ;;  %6629 = vmatprep.subr.bf16.mxu0 %v8542_v35  ;;  %v8390_v21 = vcombine.high %v3466_v14, %v3470_v16  ;;  %v3570_v26 = vld [vmem:[#allocation6 + $0xa48] sm:$0xff]  ;;  %v8501_v34 = vcombine.low %v3578_v23, %v3582_v13  ;;  %v8389_v35 = vcombine.low %v3466_v14, %v3470_v16  ;;  %v3275_v16 = vld [vmem:[#allocation6 + $0x110] sm:$0xff] }
 0x2bb   :  { %6582 = vmatprep.subr.bf16.mxu1 %v8302_v47  ;;  %v3574_v61 = vld [vmem:[#allocation6 + $0xa68] sm:$0xff] }
 0x2bc   :  { %v3458_v31 = vld [vmem:[#allocation6 + $0x6c8] sm:$0xff]  ;;  %v8494_v47 = vcombine.high %v3570_v26, %v3574_v61 }
 0x2bd   :  { %6630 = vmatpush2.bf16.msra.mxu0 %v8541_v39  ;;  %v3462_v17 = vld [vmem:[#allocation6 + $0x6e8] sm:$0xff] }
 0x2be   :  { %6583 = vmatpush1.bf16.msra.mxu1 %v8301_v42  ;;  %6631 = vmatprep.subr.bf16.mxu0 %v8534_v4  ;;  %v8382_v8 = vcombine.high %v3458_v31, %v3462_v17  ;;  %v3562_v37 = vld [vmem:[#allocation6 + $0xa08] sm:$0xff]  ;;  %v8493_v42 = vcombine.low %v3570_v26, %v3574_v61  ;;  %v8381_v4 = vcombine.low %v3458_v31, %v3462_v17  ;;  %v3267_v61 = vld [vmem:[#allocation6 + $0xd0] sm:$0xff] }
 0x2bf   :  { %6584 = vmatprep.subr.bf16.mxu1 %v8294_v45  ;;  %v3566_v27 = vld [vmem:[#allocation6 + $0xa28] sm:$0xff]  ;;  %v3271_v31 = vld [vmem:[#allocation6 + $0xf0] sm:$0xff] }
 0x2c0   :  { %v3450_v33 = vld [vmem:[#allocation6 + $0x688] sm:$0xff]  ;;  %v8486_v45 = vcombine.high %v3562_v37, %v3566_v27 }
 0x2c1   :  { %6632 = vmatpush2.bf16.msra.mxu0 %v8533_v60  ;;  %v3454_v39 = vld [vmem:[#allocation6 + $0x6a8] sm:$0xff] }
 0x2c2   :  { %6585 = vmatpush1.bf16.msra.mxu1 %v8293_v38  ;;  %6633 = vmatprep.subr.bf16.mxu0 %v8526_v53  ;;  %v8374_v6 = vcombine.high %v3450_v33, %v3454_v39  ;;  %v3442_v48 = vld [vmem:[#allocation6 + $0x648] sm:$0xff]  ;;  %v8485_v38 = vcombine.low %v3562_v37, %v3566_v27  ;;  %v8373_v53 = vcombine.low %v3450_v33, %v3454_v39  ;;  %v3259_v27 = vld [vmem:[#allocation6 + $0x90] sm:$0xff] }
 0x2c3   :  { %6586 = vmatprep.subr.bf16.mxu1 %v8414_v22  ;;  %v3446_v60 = vld [vmem:[#allocation6 + $0x668] sm:$0xff]  ;;  %v8224_v22 = vcombine.high %v3299_v44, %v3303_v55  ;;  %v3263_v33 = vld [vmem:[#allocation6 + $0xb0] sm:$0xff] }
 0x2c4   :  { %v8366_v54 = vcombine.high %v3442_v48, %v3446_v60  ;;  %v3434_v41 = vld [vmem:[#allocation6 + $0x608] sm:$0xff] }
 0x2c5   :  { %6634 = vmatpush2.bf16.msra.mxu0 %v8525_v62  ;;  %v3438_v62 = vld [vmem:[#allocation6 + $0x628] sm:$0xff] }
 0x2c6   :  { %6587 = vmatpush2.bf16.msra.mxu1 %v8413_v43  ;;  %6635 = vmatprep.subr.bf16.mxu0 %v8518_v36  ;;  %v8223_v43 = vcombine.low %v3299_v44, %v3303_v55  ;;  %v8365_v36 = vcombine.low %v3442_v48, %v3446_v60  ;;  %v8358_v28 = vcombine.high %v3434_v41, %v3438_v62  ;;  %v3682_v15 = vld [vmem:[#allocation6 + $0xdc8] sm:$0xff]  ;;  %v3251_v55 = vld [vmem:[#allocation6 + $0x50] sm:$0xff] }
 0x2c7   :  { %6588 = vmatprep.subr.bf16.mxu1 %v8406_v12  ;;  %v8216_v12 = vcombine.high %v3291_v30, %v3295_v58  ;;  %v3674_v13 = vld [vmem:[#allocation6 + $0xd88] sm:$0xff]  ;;  %v3255_v48 = vld [vmem:[#allocation6 + $0x70] sm:$0xff] }
 0x2c8   :  { %v3678_v14 = vld [vmem:[#allocation6 + $0xda8] sm:$0xff] }
 0x2c9   :  { %6636 = vmatpush2.bf16.msra.mxu0 %v8517_v1  ;;  %v3686_v1 = vld [vmem:[#allocation6 + $0xde8] sm:$0xff] }
 0x2ca   :  { %6589 = vmatpush2.bf16.msra.mxu1 %v8405_v2  ;;  %6637 = vmatprep.subr.bf16.mxu0 %v8510_v3  ;;  %v8215_v2 = vcombine.low %v3291_v30, %v3295_v58  ;;  %v8357_v3 = vcombine.low %v3434_v41, %v3438_v62  ;;  %v8606_v23 = vcombine.high %v3682_v15, %v3686_v1  ;;  %v3666_v17 = vld [vmem:[#allocation6 + $0xd48] sm:$0xff]  ;;  %v3243_v58 = vld [vmem:[#allocation6 + $0x10] sm:$0xff] }
 0x2cb   :  { %6590 = vmatprep.subr.bf16.mxu1 %v8398_v5  ;;  %v8208_v5 = vcombine.high %v3283_v63, %v3287_v0  ;;  %v3658_v39 = vld [vmem:[#allocation6 + $0xd08] sm:$0xff]  ;;  %v3247_v41 = vld [vmem:[#allocation6 + $0x30] sm:$0xff] }
 0x2cc   :  { %v3650_v60 = vld [vmem:[#allocation6 + $0xcc8] sm:$0xff] }
 0x2cd   :  { %6638 = vmatpush2.bf16.msra.mxu0 %v8509_v32  ;;  %v3279_v32 = vld [vmem:[#allocation6 + $0x130] sm:$0xff]  ;;  %v3642_v62 = vld [vmem:[#allocation6 + $0xc88] sm:$0xff] }
 0x2ce   :  { %6591 = vmatpush2.bf16.msra.mxu1 %v8397_v19  ;;  %6639 = vmatprep.subr.bf16.mxu0 %v8502_v52  ;;  %v8207_v19 = vcombine.low %v3283_v63, %v3287_v0  ;;  %v8605_v52 = vcombine.low %v3682_v15, %v3686_v1  ;;  %v8200_v26 = vcombine.high %v3275_v16, %v3279_v32  ;;  %v3363_v0 = vld [vmem:[#allocation6 + $0x3d0] sm:$0xff]  ;;  %v3634_v1 = vld [vmem:[#allocation6 + $0xc48] sm:$0xff] }
 0x2cf   :  { %6592 = vmatprep.subr.bf16.mxu1 %v8390_v21  ;;  %v8598_v21 = vcombine.high %v3674_v13, %v3678_v14  ;;  %v3367_v15 = vld [vmem:[#allocation6 + $0x3f0] sm:$0xff] }
 0x2d1   :  { %6640 = vmatpush2.bf16.msra.mxu0 %v8501_v34  ;;  %v3670_v34 = vld [vmem:[#allocation6 + $0xd68] sm:$0xff] }
 0x2d2   :  { %6593 = vmatpush2.bf16.msra.mxu1 %v8389_v35  ;;  %6641 = vmatprep.subr.bf16.mxu0 %v8494_v47  ;;  %v8199_v35 = vcombine.low %v3275_v16, %v3279_v32  ;;  %v8597_v47 = vcombine.low %v3674_v13, %v3678_v14  ;;  %v8590_v37 = vcombine.high %v3666_v17, %v3670_v34  ;;  %v3355_v14 = vld [vmem:[#allocation6 + $0x390] sm:$0xff]  ;;  %v3626_v32 = vld [vmem:[#allocation6 + $0xc08] sm:$0xff] }
 0x2d3   :  { %6594 = vmatprep.subr.bf16.mxu1 %v8382_v8  ;;  %v8192_v8 = vcombine.high %v3267_v61, %v3271_v31  ;;  %v3359_v16 = vld [vmem:[#allocation6 + $0x3b0] sm:$0xff] }
 0x2d5   :  { %6642 = vmatpush2.bf16.msra.mxu0 %v8493_v42  ;;  %v3662_v42 = vld [vmem:[#allocation6 + $0xd28] sm:$0xff] }
 0x2d6   :  { %6595 = vmatpush2.bf16.msra.mxu1 %v8381_v4  ;;  %6643 = vmatprep.subr.bf16.mxu0 %v8486_v45  ;;  %v8191_v4 = vcombine.low %v3267_v61, %v3271_v31  ;;  %v8589_v45 = vcombine.low %v3666_v17, %v3670_v34  ;;  %v8582_v44 = vcombine.high %v3658_v39, %v3662_v42  ;;  %v3347_v31 = vld [vmem:[#allocation6 + $0x350] sm:$0xff]  ;;  %v3746_v34 = vld [vmem:[#allocation6 + $0xfc8] sm:$0xff] }
 0x2d7   :  { %6596 = vmatprep.subr.bf16.mxu1 %v8374_v6  ;;  %v8184_v6 = vcombine.high %v3259_v27, %v3263_v33  ;;  %v3351_v17 = vld [vmem:[#allocation6 + $0x370] sm:$0xff] }
 0x2d9   :  { %6644 = vmatpush2.bf16.msra.mxu0 %v8485_v38  ;;  %v3654_v38 = vld [vmem:[#allocation6 + $0xce8] sm:$0xff] }
 0x2da   :  { %6597 = vmatpush2.bf16.msra.mxu1 %v8373_v53  ;;  %6699 = vmatprep.subr.bf16.mxu0 %v8224_v22  ;;  %v8183_v53 = vcombine.low %v3259_v27, %v3263_v33  ;;  %v8581_v22 = vcombine.low %v3658_v39, %v3662_v42  ;;  %v8574_v30 = vcombine.high %v3650_v60, %v3654_v38  ;;  %v3339_v33 = vld [vmem:[#allocation6 + $0x310] sm:$0xff]  ;;  %v3738_v42 = vld [vmem:[#allocation6 + $0xf88] sm:$0xff] }
 0x2db   :  { %6598 = vmatprep.subr.bf16.mxu1 %v8366_v54  ;;  %v8176_v54 = vcombine.high %v3251_v55, %v3255_v48  ;;  %v3343_v39 = vld [vmem:[#allocation6 + $0x330] sm:$0xff] }
 0x2dc   :  { %6646 = vmatmul.mubr.bf16.vlgmr.msra.gmra.mxu0 %v9318_v10 }
 0x2dd   :  { %6700 = vmatpush1.bf16.msra.mxu0 %v8223_v43  ;;  %6731 = vmatprep.mubr.bf16.mxu0 %v9269_v11  ;;  %v3646_v43 = vld [vmem:[#allocation6 + $0xca8] sm:$0xff] }
 0x2de   :  { %6599 = vmatpush2.bf16.msra.mxu1 %v8365_v36  ;;  %6701 = vmatprep.subr.bf16.mxu0 %v8216_v12  ;;  %v8175_v36 = vcombine.low %v3251_v55, %v3255_v48  ;;  %v8573_v12 = vcombine.low %v3650_v60, %v3654_v38  ;;  %v8566_v63 = vcombine.high %v3642_v62, %v3646_v43  ;;  %v3331_v48 = vld [vmem:[#allocation6 + $0x2d0] sm:$0xff]  ;;  %v3730_v38 = vld [vmem:[#allocation6 + $0xf48] sm:$0xff] }
 0x2df   :  { %6600 = vmatprep.subr.bf16.mxu1 %v8358_v28  ;;  %v8168_v28 = vcombine.high %v3243_v58, %v3247_v41  ;;  %v3335_v60 = vld [vmem:[#allocation6 + $0x2f0] sm:$0xff] }
 0x2e1   :  { %6702 = vmatpush1.bf16.msra.mxu0 %v8215_v2  ;;  %v3638_v2 = vld [vmem:[#allocation6 + $0xc68] sm:$0xff] }
 0x2e2   :  { %6601 = vmatpush2.bf16.msra.mxu1 %v8357_v3  ;;  %6703 = vmatprep.subr.bf16.mxu0 %v8208_v5  ;;  %v8167_v3 = vcombine.low %v3243_v58, %v3247_v41  ;;  %v8565_v5 = vcombine.low %v3642_v62, %v3646_v43  ;;  %v8558_v13 = vcombine.high %v3634_v1, %v3638_v2  ;;  %v3323_v41 = vld [vmem:[#allocation6 + $0x290] sm:$0xff]  ;;  %v3722_v43 = vld [vmem:[#allocation6 + $0xf08] sm:$0xff] }
 0x2e3   :  { %6656 = vmatprep.subr.bf16.mxu1 %v8606_v23  ;;  %v8288_v23 = vcombine.high %v3363_v0, %v3367_v15  ;;  %v3327_v62 = vld [vmem:[#allocation6 + $0x2b0] sm:$0xff] }
 0x2e5   :  { %6603 = vmatmul.mubr.bf16.vlgmr.msra.gmra.mxu1 %v9288_v56  ;;  %6704 = vmatpush1.bf16.msra.mxu0 %v8207_v19  ;;  %v3630_v19 = vld [vmem:[#allocation6 + $0xc28] sm:$0xff] }
 0x2e6   :  { %6657 = vmatpush1.bf16.msra.mxu1 %v8605_v52  ;;  %6688 = vmatprep.mubr.bf16.mxu1 %v9333_v40  ;;  %v8287_v52 = vcombine.low %v3363_v0, %v3367_v15  ;;  %v8550_v61 = vcombine.high %v3626_v32, %v3630_v19  ;;  %v3315_v15 = vld [vmem:[#allocation6 + $0x250] sm:$0xff] }
 0x2e7   :  { %6658 = vmatprep.subr.bf16.mxu1 %v8598_v21  ;;  %6705 = vmatprep.subr.bf16.mxu0 %v8200_v26  ;;  %v8557_v21 = vcombine.low %v3634_v1, %v3638_v2  ;;  %v8280_v26 = vcombine.high %v3355_v14, %v3359_v16  ;;  %v3319_v1 = vld [vmem:[#allocation6 + $0x270] sm:$0xff]  ;;  %v3714_v2 = vld [vmem:[#allocation6 + $0xec8] sm:$0xff] }
 0x2e9   :  { %6706 = vmatpush1.bf16.msra.mxu0 %v8199_v35  ;;  %v3750_v35 = vld [vmem:[#allocation6 + $0xfe8] sm:$0xff] }
 0x2ea   :  { %6659 = vmatpush1.bf16.msra.mxu1 %v8597_v47  ;;  %6707 = vmatprep.subr.bf16.mxu0 %v8192_v8  ;;  %v8279_v47 = vcombine.low %v3355_v14, %v3359_v16  ;;  %v8549_v8 = vcombine.low %v3626_v32, %v3630_v19  ;;  %v8670_v27 = vcombine.high %v3746_v34, %v3750_v35  ;;  %v3307_v16 = vld [vmem:[#allocation6 + $0x210] sm:$0xff]  ;;  %v3706_v19 = vld [vmem:[#allocation6 + $0xe88] sm:$0xff] }
 0x2eb   :  { %6660 = vmatprep.subr.bf16.mxu1 %v8590_v37  ;;  %v8272_v37 = vcombine.high %v3347_v31, %v3351_v17  ;;  %v3311_v32 = vld [vmem:[#allocation6 + $0x230] sm:$0xff] }
 0x2ed   :  { %6708 = vmatpush1.bf16.msra.mxu0 %v8191_v4  ;;  %v3742_v4 = vld [vmem:[#allocation6 + $0xfa8] sm:$0xff] }
 0x2ee   :  { %6661 = vmatpush1.bf16.msra.mxu1 %v8589_v45  ;;  %6709 = vmatprep.subr.bf16.mxu0 %v8184_v6  ;;  %v8271_v45 = vcombine.low %v3347_v31, %v3351_v17  ;;  %v8669_v6 = vcombine.low %v3746_v34, %v3750_v35  ;;  %v8662_v55 = vcombine.high %v3738_v42, %v3742_v4  ;;  %v3555_v17 = vld [vmem:[#allocation6 + $0x9d0] sm:$0xff]  ;;  %v3698_v35 = vld [vmem:[#allocation6 + $0xe48] sm:$0xff] }
 0x2ef   :  { %6662 = vmatprep.subr.bf16.mxu1 %v8582_v44  ;;  %v8264_v44 = vcombine.high %v3339_v33, %v3343_v39  ;;  %v3559_v34 = vld [vmem:[#allocation6 + $0x9f0] sm:$0xff] }
 0x2f1   :  { %6710 = vmatpush1.bf16.msra.mxu0 %v8183_v53  ;;  %v3734_v53 = vld [vmem:[#allocation6 + $0xf68] sm:$0xff] }
 0x2f2   :  { %6663 = vmatpush1.bf16.msra.mxu1 %v8581_v22  ;;  %6711 = vmatprep.subr.bf16.mxu0 %v8176_v54  ;;  %v8263_v22 = vcombine.low %v3339_v33, %v3343_v39  ;;  %v8661_v54 = vcombine.low %v3738_v42, %v3742_v4  ;;  %v8654_v58 = vcombine.high %v3730_v38, %v3734_v53  ;;  %v3547_v39 = vld [vmem:[#allocation6 + $0x990] sm:$0xff]  ;;  %v3690_v4 = vld [vmem:[#allocation6 + $0xe08] sm:$0xff] }
 0x2f3   :  { %6664 = vmatprep.subr.bf16.mxu1 %v8574_v30  ;;  %v8256_v30 = vcombine.high %v3331_v48, %v3335_v60  ;;  %v3551_v42 = vld [vmem:[#allocation6 + $0x9b0] sm:$0xff] }
 0x2f5   :  { %6712 = vmatpush1.bf16.msra.mxu0 %v8175_v36  ;;  %v3726_v36 = vld [vmem:[#allocation6 + $0xf28] sm:$0xff] }
 0x2f6   :  { %6665 = vmatpush1.bf16.msra.mxu1 %v8573_v12  ;;  %6713 = vmatprep.subr.bf16.mxu0 %v8168_v28  ;;  %v8255_v12 = vcombine.low %v3331_v48, %v3335_v60  ;;  %v8653_v28 = vcombine.low %v3730_v38, %v3734_v53  ;;  %v8646_v0 = vcombine.high %v3722_v43, %v3726_v36  ;;  %v3539_v60 = vld [vmem:[#allocation6 + $0x950] sm:$0xff] }
 0x2f7   :  { %6666 = vmatprep.subr.bf16.mxu1 %v8566_v63  ;;  %v8248_v63 = vcombine.high %v3323_v41, %v3327_v62  ;;  %v3543_v38 = vld [vmem:[#allocation6 + $0x970] sm:$0xff] }
 0x2f8   :  { %v3427_v53 = vld [vmem:[#allocation6 + $0x5d0] sm:$0xff] }
 0x2f9   :  { %6714 = vmatpush1.bf16.msra.mxu0 %v8167_v3  ;;  %v3718_v3 = vld [vmem:[#allocation6 + $0xee8] sm:$0xff] }
 0x2fa   :  { %6667 = vmatpush1.bf16.msra.mxu1 %v8565_v5  ;;  %6715 = vmatprep.subr.bf16.mxu0 %v8288_v23  ;;  %v8247_v5 = vcombine.low %v3323_v41, %v3327_v62  ;;  %v8645_v23 = vcombine.low %v3722_v43, %v3726_v36  ;;  %v8638_v14 = vcombine.high %v3714_v2, %v3718_v3  ;;  %v3419_v62 = vld [vmem:[#allocation6 + $0x590] sm:$0xff] }
 0x2fb   :  { %6668 = vmatprep.subr.bf16.mxu1 %v8558_v13  ;;  %v8240_v13 = vcombine.high %v3315_v15, %v3319_v1  ;;  %v3423_v43 = vld [vmem:[#allocation6 + $0x5b0] sm:$0xff] }
 0x2fc   :  { %v3531_v36 = vld [vmem:[#allocation6 + $0x910] sm:$0xff] }
 0x2fd   :  { %6716 = vmatpush2.bf16.msra.mxu0 %v8287_v52  ;;  %v3710_v52 = vld [vmem:[#allocation6 + $0xea8] sm:$0xff] }
 0x2fe   :  { %6669 = vmatpush1.bf16.msra.mxu1 %v8557_v21  ;;  %6717 = vmatprep.subr.bf16.mxu0 %v8280_v26  ;;  %v8239_v21 = vcombine.low %v3315_v15, %v3319_v1  ;;  %v8637_v26 = vcombine.low %v3714_v2, %v3718_v3  ;;  %v8630_v31 = vcombine.high %v3706_v19, %v3710_v52  ;;  %v3523_v1 = vld [vmem:[#allocation6 + $0x8d0] sm:$0xff] }
 0x2ff   :  { %6670 = vmatprep.subr.bf16.mxu1 %v8550_v61  ;;  %v8232_v61 = vcombine.high %v3307_v16, %v3311_v32  ;;  %v3527_v2 = vld [vmem:[#allocation6 + $0x8f0] sm:$0xff] }
 0x300   :  { %v3411_v3 = vld [vmem:[#allocation6 + $0x550] sm:$0xff] }
 0x301   :  { %6718 = vmatpush2.bf16.msra.mxu0 %v8279_v47  ;;  %v3702_v47 = vld [vmem:[#allocation6 + $0xe68] sm:$0xff] }
 0x302   :  { %6671 = vmatpush1.bf16.msra.mxu1 %v8549_v8  ;;  %6719 = vmatprep.subr.bf16.mxu0 %v8272_v37  ;;  %v8231_v8 = vcombine.low %v3307_v16, %v3311_v32  ;;  %v8629_v37 = vcombine.low %v3706_v19, %v3710_v52  ;;  %v8622_v33 = vcombine.high %v3698_v35, %v3702_v47  ;;  %v3515_v32 = vld [vmem:[#allocation6 + $0x890] sm:$0xff] }
 0x303   :  { %6672 = vmatprep.subr.bf16.mxu1 %v8670_v27  ;;  %v8480_v27 = vcombine.high %v3555_v17, %v3559_v34  ;;  %v3519_v19 = vld [vmem:[#allocation6 + $0x8b0] sm:$0xff] }
 0x304   :  { %v3403_v52 = vld [vmem:[#allocation6 + $0x510] sm:$0xff] }
 0x305   :  { %6720 = vmatpush2.bf16.msra.mxu0 %v8271_v45  ;;  %v3694_v45 = vld [vmem:[#allocation6 + $0xe28] sm:$0xff] }
 0x306   :  { %6673 = vmatpush2.bf16.msra.mxu1 %v8669_v6  ;;  %6721 = vmatprep.subr.bf16.mxu0 %v8264_v44  ;;  %v8479_v6 = vcombine.low %v3555_v17, %v3559_v34  ;;  %v8621_v44 = vcombine.low %v3698_v35, %v3702_v47  ;;  %v8614_v48 = vcombine.high %v3690_v4, %v3694_v45  ;;  %v3507_v34 = vld [vmem:[#allocation6 + $0x850] sm:$0xff] }
 0x307   :  { %6674 = vmatprep.subr.bf16.mxu1 %v8662_v55  ;;  %v8472_v55 = vcombine.high %v3547_v39, %v3551_v42  ;;  %v3511_v35 = vld [vmem:[#allocation6 + $0x870] sm:$0xff] }
 0x308   :  { %v3395_v47 = vld [vmem:[#allocation6 + $0x4d0] sm:$0xff] }
 0x309   :  { %6722 = vmatpush2.bf16.msra.mxu0 %v8263_v22  ;;  %v3431_v22 = vld [vmem:[#allocation6 + $0x5f0] sm:$0xff] }
 0x30a   :  { %6675 = vmatpush2.bf16.msra.mxu1 %v8661_v54  ;;  %6723 = vmatprep.subr.bf16.mxu0 %v8256_v30  ;;  %v8471_v54 = vcombine.low %v3547_v39, %v3551_v42  ;;  %v8613_v30 = vcombine.low %v3690_v4, %v3694_v45  ;;  %v8352_v41 = vcombine.high %v3427_v53, %v3431_v22  ;;  %v3499_v42 = vld [vmem:[#allocation6 + $0x810] sm:$0xff] }
 0x30b   :  { %6676 = vmatprep.subr.bf16.mxu1 %v8654_v58  ;;  %v8464_v58 = vcombine.high %v3539_v60, %v3543_v38  ;;  %v3503_v4 = vld [vmem:[#allocation6 + $0x830] sm:$0xff] }
 0x30c   :  { %v3387_v45 = vld [vmem:[#allocation6 + $0x490] sm:$0xff] }
 0x30d   :  { %6724 = vmatpush2.bf16.msra.mxu0 %v8255_v12  ;;  %v3535_v12 = vld [vmem:[#allocation6 + $0x930] sm:$0xff] }
 0x30e   :  { %6677 = vmatpush2.bf16.msra.mxu1 %v8653_v28  ;;  %6725 = vmatprep.subr.bf16.mxu0 %v8248_v63  ;;  %v8463_v28 = vcombine.low %v3539_v60, %v3543_v38  ;;  %v8351_v63 = vcombine.low %v3427_v53, %v3431_v22  ;;  %v8456_v15 = vcombine.high %v3531_v36, %v3535_v12  ;;  %v3619_v38 = vld [vmem:[#allocation6 + $0xbd0] sm:$0xff] }
 0x30f   :  { %6678 = vmatprep.subr.bf16.mxu1 %v8646_v0  ;;  %v8344_v0 = vcombine.high %v3419_v62, %v3423_v43  ;;  %v3623_v53 = vld [vmem:[#allocation6 + $0xbf0] sm:$0xff] }
 0x310   :  { %v3379_v22 = vld [vmem:[#allocation6 + $0x450] sm:$0xff] }
 0x311   :  { %6726 = vmatpush2.bf16.msra.mxu0 %v8247_v5  ;;  %v3415_v5 = vld [vmem:[#allocation6 + $0x570] sm:$0xff] }
 0x312   :  { %6679 = vmatpush2.bf16.msra.mxu1 %v8645_v23  ;;  %6727 = vmatprep.subr.bf16.mxu0 %v8240_v13  ;;  %v8455_v23 = vcombine.low %v3531_v36, %v3535_v12  ;;  %v8343_v13 = vcombine.low %v3419_v62, %v3423_v43  ;;  %v8336_v16 = vcombine.high %v3411_v3, %v3415_v5  ;;  %v3611_v43 = vld [vmem:[#allocation6 + $0xb90] sm:$0xff] }
 0x313   :  { %6680 = vmatprep.subr.bf16.mxu1 %v8638_v14  ;;  %v8448_v14 = vcombine.high %v3523_v1, %v3527_v2  ;;  %v3615_v36 = vld [vmem:[#allocation6 + $0xbb0] sm:$0xff] }
 0x314   :  { %v3371_v12 = vld [vmem:[#allocation6 + $0x410] sm:$0xff] }
 0x315   :  { %6728 = vmatpush2.bf16.msra.mxu0 %v8239_v21  ;;  %v3407_v21 = vld [vmem:[#allocation6 + $0x530] sm:$0xff] }
 0x316   :  { %6681 = vmatpush2.bf16.msra.mxu1 %v8637_v26  ;;  %6729 = vmatprep.subr.bf16.mxu0 %v8232_v61  ;;  %v8447_v26 = vcombine.low %v3523_v1, %v3527_v2  ;;  %v8335_v61 = vcombine.low %v3411_v3, %v3415_v5  ;;  %v8328_v17 = vcombine.high %v3403_v52, %v3407_v21  ;;  %v3603_v2 = vld [vmem:[#allocation6 + $0xb50] sm:$0xff] }
 0x317   :  { %6682 = vmatprep.subr.bf16.mxu1 %v8630_v31  ;;  %v8440_v31 = vcombine.high %v3515_v32, %v3519_v19  ;;  %v3607_v3 = vld [vmem:[#allocation6 + $0xb70] sm:$0xff] }
 0x318   :  { %v3491_v5 = vld [vmem:[#allocation6 + $0x7d0] sm:$0xff] }
 0x319   :  { %6730 = vmatpush2.bf16.msra.mxu0 %v8231_v8  ;;  %v3399_v8 = vld [vmem:[#allocation6 + $0x4f0] sm:$0xff] }
 0x31a   :  { %6683 = vmatpush2.bf16.msra.mxu1 %v8629_v37  ;;  %6785 = vmatprep.subr.bf16.mxu0 %v8480_v27  ;;  %v8439_v37 = vcombine.low %v3515_v32, %v3519_v19  ;;  %v8327_v27 = vcombine.low %v3403_v52, %v3407_v21  ;;  %v8320_v39 = vcombine.high %v3395_v47, %v3399_v8  ;;  %v3595_v19 = vld [vmem:[#allocation6 + $0xb10] sm:$0xff] }
 0x31b   :  { %6684 = vmatprep.subr.bf16.mxu1 %v8622_v33  ;;  %v8432_v33 = vcombine.high %v3507_v34, %v3511_v35  ;;  %v3599_v52 = vld [vmem:[#allocation6 + $0xb30] sm:$0xff] }
 0x31c   :  { %6732 = vmatmul.mubr.bf16.vlgmr.msra.gmra.mxu0 %v9215_v51  ;;  %v3483_v21 = vld [vmem:[#allocation6 + $0x790] sm:$0xff] }
 0x31d   :  { %6786 = vmatpush1.bf16.msra.mxu0 %v8479_v6  ;;  %6817 = vmatprep.mubr.bf16.mxu0 %v9316_v9  ;;  %v3391_v6 = vld [vmem:[#allocation6 + $0x4b0] sm:$0xff] }
 0x31e   :  { %6685 = vmatpush2.bf16.msra.mxu1 %v8621_v44  ;;  %6787 = vmatprep.subr.bf16.mxu0 %v8472_v55  ;;  %v8431_v44 = vcombine.low %v3507_v34, %v3511_v35  ;;  %v8319_v55 = vcombine.low %v3395_v47, %v3399_v8  ;;  %v8312_v60 = vcombine.high %v3387_v45, %v3391_v6  ;;  %v3587_v35 = vld [vmem:[#allocation6 + $0xad0] sm:$0xff] }
 0x31f   :  { %6686 = vmatprep.subr.bf16.mxu1 %v8614_v48  ;;  %v8424_v48 = vcombine.high %v3499_v42, %v3503_v4  ;;  %v3591_v47 = vld [vmem:[#allocation6 + $0xaf0] sm:$0xff] }
 0x320   :  { %v3475_v8 = vld [vmem:[#allocation6 + $0x750] sm:$0xff] }
 0x321   :  { %6788 = vmatpush1.bf16.msra.mxu0 %v8471_v54  ;;  %v3383_v54 = vld [vmem:[#allocation6 + $0x470] sm:$0xff] }
 0x322   :  { %6687 = vmatpush2.bf16.msra.mxu1 %v8613_v30  ;;  %6789 = vmatprep.subr.bf16.mxu0 %v8464_v58  ;;  %v8423_v30 = vcombine.low %v3499_v42, %v3503_v4  ;;  %v8311_v58 = vcombine.low %v3387_v45, %v3391_v6  ;;  %v8304_v62 = vcombine.high %v3379_v22, %v3383_v54  ;;  %v3579_v4 = vld [vmem:[#allocation6 + $0xa90] sm:$0xff] }
 0x323   :  { %6742 = vmatprep.subr.bf16.mxu1 %v8352_v41  ;;  %v8544_v41 = vcombine.high %v3619_v38, %v3623_v53  ;;  %v3583_v45 = vld [vmem:[#allocation6 + $0xab0] sm:$0xff] }
 0x324   :  { %v3467_v6 = vld [vmem:[#allocation6 + $0x710] sm:$0xff] }
 0x325   :  { %6689 = vmatmul.mubr.bf16.vlgmr.msra.gmra.mxu1 %v9335_v24  ;;  %6790 = vmatpush1.bf16.msra.mxu0 %v8463_v28  ;;  %v3375_v28 = vld [vmem:[#allocation6 + $0x430] sm:$0xff] }
 0x326   :  { %6743 = vmatpush1.bf16.msra.mxu1 %v8351_v63  ;;  %6774 = vmatprep.mubr.bf16.mxu1 %v9277_v59  ;;  %v8543_v63 = vcombine.low %v3619_v38, %v3623_v53  ;;  %v8296_v1 = vcombine.high %v3371_v12, %v3375_v28  ;;  %v3571_v53 = vld [vmem:[#allocation6 + $0xa50] sm:$0xff] }
 0x327   :  { %6744 = vmatprep.subr.bf16.mxu1 %v8344_v0  ;;  %6791 = vmatprep.subr.bf16.mxu0 %v8456_v15  ;;  %v8303_v0 = vcombine.low %v3379_v22, %v3383_v54  ;;  %v8536_v15 = vcombine.high %v3611_v43, %v3615_v36  ;;  %v3575_v22 = vld [vmem:[#allocation6 + $0xa70] sm:$0xff] }
 0x328   :  { %v3459_v54 = vld [vmem:[#allocation6 + $0x6d0] sm:$0xff] }
 0x329   :  { %6792 = vmatpush1.bf16.msra.mxu0 %v8455_v23  ;;  %v3495_v23 = vld [vmem:[#allocation6 + $0x7f0] sm:$0xff] }
 0x32a   :  { %6745 = vmatpush1.bf16.msra.mxu1 %v8343_v13  ;;  %6793 = vmatprep.subr.bf16.mxu0 %v8448_v14  ;;  %v8535_v13 = vcombine.low %v3611_v43, %v3615_v36  ;;  %v8295_v14 = vcombine.low %v3371_v12, %v3375_v28  ;;  %v8416_v32 = vcombine.high %v3491_v5, %v3495_v23  ;;  %v3563_v36 = vld [vmem:[#allocation6 + $0xa10] sm:$0xff] }
 0x32b   :  { %6746 = vmatprep.subr.bf16.mxu1 %v8336_v16  ;;  %v8528_v16 = vcombine.high %v3603_v2, %v3607_v3  ;;  %v3567_v12 = vld [vmem:[#allocation6 + $0xa30] sm:$0xff] }
 0x32c   :  { %v3451_v28 = vld [vmem:[#allocation6 + $0x690] sm:$0xff] }
 0x32d   :  { %6794 = vmatpush1.bf16.msra.mxu0 %v8447_v26  ;;  %v3487_v26 = vld [vmem:[#allocation6 + $0x7b0] sm:$0xff] }
 0x32e   :  { %6747 = vmatpush1.bf16.msra.mxu1 %v8335_v61  ;;  %6795 = vmatprep.subr.bf16.mxu0 %v8440_v31  ;;  %v8527_v61 = vcombine.low %v3603_v2, %v3607_v3  ;;  %v8415_v31 = vcombine.low %v3491_v5, %v3495_v23  ;;  %v8408_v34 = vcombine.high %v3483_v21, %v3487_v26  ;;  %v3300_v3 = vld [vmem:[#allocation6 + $0x1d8] sm:$0xff]  ;;  %v3443_v23 = vld [vmem:[#allocation6 + $0x650] sm:$0xff] }
 0x32f   :  { %6748 = vmatprep.subr.bf16.mxu1 %v8328_v17  ;;  %v8520_v17 = vcombine.high %v3595_v19, %v3599_v52  ;;  %v3304_v5 = vld [vmem:[#allocation6 + $0x1f8] sm:$0xff] }
 0x331   :  { %6796 = vmatpush1.bf16.msra.mxu0 %v8439_v37  ;;  %v3479_v37 = vld [vmem:[#allocation6 + $0x770] sm:$0xff] }
 0x332   :  { %6749 = vmatpush1.bf16.msra.mxu1 %v8327_v27  ;;  %6797 = vmatprep.subr.bf16.mxu0 %v8432_v33  ;;  %v8519_v27 = vcombine.low %v3595_v19, %v3599_v52  ;;  %v8407_v33 = vcombine.low %v3483_v21, %v3487_v26  ;;  %v8400_v42 = vcombine.high %v3475_v8, %v3479_v37  ;;  %v3292_v52 = vld [vmem:[#allocation6 + $0x198] sm:$0xff]  ;;  %v3435_v26 = vld [vmem:[#allocation6 + $0x610] sm:$0xff] }
 0x333   :  { %6750 = vmatprep.subr.bf16.mxu1 %v8320_v39  ;;  %v8512_v39 = vcombine.high %v3587_v35, %v3591_v47  ;;  %v3296_v21 = vld [vmem:[#allocation6 + $0x1b8] sm:$0xff] }
 0x335   :  { %6798 = vmatpush1.bf16.msra.mxu0 %v8431_v44  ;;  %v3471_v44 = vld [vmem:[#allocation6 + $0x730] sm:$0xff] }
 0x336   :  { %6751 = vmatpush1.bf16.msra.mxu1 %v8319_v55  ;;  %6799 = vmatprep.subr.bf16.mxu0 %v8424_v48  ;;  %v8511_v55 = vcombine.low %v3587_v35, %v3591_v47  ;;  %v8399_v48 = vcombine.low %v3475_v8, %v3479_v37  ;;  %v8392_v38 = vcombine.high %v3467_v6, %v3471_v44  ;;  %v3284_v47 = vld [vmem:[#allocation6 + $0x158] sm:$0xff]  ;;  %v3683_v37 = vld [vmem:[#allocation6 + $0xdd0] sm:$0xff] }
 0x337   :  { %6752 = vmatprep.subr.bf16.mxu1 %v8312_v60  ;;  %v8504_v60 = vcombine.high %v3579_v4, %v3583_v45  ;;  %v3288_v8 = vld [vmem:[#allocation6 + $0x178] sm:$0xff] }
 0x339   :  { %6800 = vmatpush1.bf16.msra.mxu0 %v8423_v30  ;;  %v3463_v30 = vld [vmem:[#allocation6 + $0x6f0] sm:$0xff] }
 0x33a   :  { %6753 = vmatpush1.bf16.msra.mxu1 %v8311_v58  ;;  %6801 = vmatprep.subr.bf16.mxu0 %v8544_v41  ;;  %v8503_v58 = vcombine.low %v3579_v4, %v3583_v45  ;;  %v8391_v41 = vcombine.low %v3467_v6, %v3471_v44  ;;  %v8384_v43 = vcombine.high %v3459_v54, %v3463_v30  ;;  %v3675_v45 = vld [vmem:[#allocation6 + $0xd90] sm:$0xff]  ;;  %v3276_v44 = vld [vmem:[#allocation6 + $0x118] sm:$0xff] }
 0x33b   :  { %6754 = vmatprep.subr.bf16.mxu1 %v8304_v62  ;;  %v8496_v62 = vcombine.high %v3571_v53, %v3575_v22  ;;  %v3679_v6 = vld [vmem:[#allocation6 + $0xdb0] sm:$0xff] }
 0x33d   :  { %6802 = vmatpush2.bf16.msra.mxu0 %v8543_v63  ;;  %v3455_v63 = vld [vmem:[#allocation6 + $0x6b0] sm:$0xff] }
 0x33e   :  { %6755 = vmatpush1.bf16.msra.mxu1 %v8303_v0  ;;  %6803 = vmatprep.subr.bf16.mxu0 %v8536_v15  ;;  %v8495_v0 = vcombine.low %v3571_v53, %v3575_v22  ;;  %v8383_v15 = vcombine.low %v3459_v54, %v3463_v30  ;;  %v8376_v2 = vcombine.high %v3451_v28, %v3455_v63  ;;  %v3272_v22 = vld [vmem:[#allocation6 + $0xf8] sm:$0xff]  ;;  %v3667_v54 = vld [vmem:[#allocation6 + $0xd50] sm:$0xff] }
 0x33f   :  { %6756 = vmatprep.subr.bf16.mxu1 %v8296_v1  ;;  %v8488_v1 = vcombine.high %v3563_v36, %v3567_v12  ;;  %v3671_v30 = vld [vmem:[#allocation6 + $0xd70] sm:$0xff] }
 0x341   :  { %6804 = vmatpush2.bf16.msra.mxu0 %v8535_v13  ;;  %v3447_v13 = vld [vmem:[#allocation6 + $0x670] sm:$0xff] }
 0x342   :  { %6757 = vmatpush1.bf16.msra.mxu1 %v8295_v14  ;;  %6805 = vmatprep.subr.bf16.mxu0 %v8528_v16  ;;  %v8487_v14 = vcombine.low %v3563_v36, %v3567_v12  ;;  %v8375_v16 = vcombine.low %v3451_v28, %v3455_v63  ;;  %v8368_v19 = vcombine.high %v3443_v23, %v3447_v13  ;;  %v3260_v36 = vld [vmem:[#allocation6 + $0x98] sm:$0xff]  ;;  %v3659_v28 = vld [vmem:[#allocation6 + $0xd10] sm:$0xff] }
 0x343   :  { %6758 = vmatprep.subr.bf16.mxu1 %v8416_v32  ;;  %v8226_v32 = vcombine.high %v3300_v3, %v3304_v5  ;;  %v3264_v12 = vld [vmem:[#allocation6 + $0xb8] sm:$0xff]  ;;  %v3663_v63 = vld [vmem:[#allocation6 + $0xd30] sm:$0xff] }
 0x345   :  { %6806 = vmatpush2.bf16.msra.mxu0 %v8527_v61  ;;  %v3439_v61 = vld [vmem:[#allocation6 + $0x630] sm:$0xff] }
 0x346   :  { %6759 = vmatpush2.bf16.msra.mxu1 %v8415_v31  ;;  %6807 = vmatprep.subr.bf16.mxu0 %v8520_v17  ;;  %v8225_v31 = vcombine.low %v3300_v3, %v3304_v5  ;;  %v8367_v17 = vcombine.low %v3443_v23, %v3447_v13  ;;  %v8360_v35 = vcombine.high %v3435_v26, %v3439_v61  ;;  %v3252_v3 = vld [vmem:[#allocation6 + $0x58] sm:$0xff]  ;;  %v3651_v23 = vld [vmem:[#allocation6 + $0xcd0] sm:$0xff] }
 0x347   :  { %6760 = vmatprep.subr.bf16.mxu1 %v8408_v34  ;;  %v8218_v34 = vcombine.high %v3292_v52, %v3296_v21  ;;  %v3256_v5 = vld [vmem:[#allocation6 + $0x78] sm:$0xff]  ;;  %v3655_v13 = vld [vmem:[#allocation6 + $0xcf0] sm:$0xff] }
 0x349   :  { %6808 = vmatpush2.bf16.msra.mxu0 %v8519_v27  ;;  %v3687_v27 = vld [vmem:[#allocation6 + $0xdf0] sm:$0xff] }
 0x34a   :  { %6761 = vmatpush2.bf16.msra.mxu1 %v8407_v33  ;;  %6809 = vmatprep.subr.bf16.mxu0 %v8512_v39  ;;  %v8217_v33 = vcombine.low %v3292_v52, %v3296_v21  ;;  %v8359_v39 = vcombine.low %v3435_v26, %v3439_v61  ;;  %v8608_v4 = vcombine.high %v3683_v37, %v3687_v27  ;;  %v3244_v52 = vld [vmem:[#allocation6 + $0x18] sm:$0xff]  ;;  %v3643_v26 = vld [vmem:[#allocation6 + $0xc90] sm:$0xff] }
 0x34b   :  { %6762 = vmatprep.subr.bf16.mxu1 %v8400_v42  ;;  %v8210_v42 = vcombine.high %v3284_v47, %v3288_v8  ;;  %v3248_v21 = vld [vmem:[#allocation6 + $0x38] sm:$0xff]  ;;  %v3647_v61 = vld [vmem:[#allocation6 + $0xcb0] sm:$0xff] }
 0x34d   :  { %6810 = vmatpush2.bf16.msra.mxu0 %v8511_v55  ;;  %v3280_v55 = vld [vmem:[#allocation6 + $0x138] sm:$0xff] }
 0x34e   :  { %6763 = vmatpush2.bf16.msra.mxu1 %v8399_v48  ;;  %6811 = vmatprep.subr.bf16.mxu0 %v8504_v60  ;;  %v8209_v48 = vcombine.low %v3284_v47, %v3288_v8  ;;  %v8607_v60 = vcombine.low %v3683_v37, %v3687_v27  ;;  %v8202_v53 = vcombine.high %v3276_v44, %v3280_v55  ;;  %v3364_v47 = vld [vmem:[#allocation6 + $0x3d8] sm:$0xff]  ;;  %v3635_v37 = vld [vmem:[#allocation6 + $0xc50] sm:$0xff] }
 0x34f   :  { %6764 = vmatprep.subr.bf16.mxu1 %v8392_v38  ;;  %v8600_v38 = vcombine.high %v3675_v45, %v3679_v6  ;;  %v3368_v8 = vld [vmem:[#allocation6 + $0x3f8] sm:$0xff]  ;;  %v3639_v27 = vld [vmem:[#allocation6 + $0xc70] sm:$0xff] }
 0x351   :  { %6812 = vmatpush2.bf16.msra.mxu0 %v8503_v58  ;;  %v8201_v58 = vcombine.low %v3276_v44, %v3280_v55  ;;  %v3627_v44 = vld [vmem:[#allocation6 + $0xc10] sm:$0xff] }
 0x352   :  { %6765 = vmatpush2.bf16.msra.mxu1 %v8391_v41  ;;  %6813 = vmatprep.subr.bf16.mxu0 %v8496_v62  ;;  %v8599_v41 = vcombine.low %v3675_v45, %v3679_v6  ;;  %v3356_v45 = vld [vmem:[#allocation6 + $0x398] sm:$0xff]  ;;  %v3631_v55 = vld [vmem:[#allocation6 + $0xc30] sm:$0xff] }
 0x353   :  { %6766 = vmatprep.subr.bf16.mxu1 %v8384_v43  ;;  %v8592_v43 = vcombine.high %v3667_v54, %v3671_v30  ;;  %v3360_v6 = vld [vmem:[#allocation6 + $0x3b8] sm:$0xff] }
 0x355   :  { %6814 = vmatpush2.bf16.msra.mxu0 %v8495_v0 }
 0x356   :  { %6767 = vmatpush2.bf16.msra.mxu1 %v8383_v15  ;;  %6815 = vmatprep.subr.bf16.mxu0 %v8488_v1  ;;  %v8591_v15 = vcombine.low %v3667_v54, %v3671_v30  ;;  %v8186_v1 = vcombine.high %v3260_v36, %v3264_v12  ;;  %v3747_v54 = vld [vmem:[#allocation6 + $0xfd0] sm:$0xff] }
 0x357   :  { %6768 = vmatprep.subr.bf16.mxu1 %v8376_v2  ;;  %v8584_v2 = vcombine.high %v3659_v28, %v3663_v63  ;;  %v3751_v30 = vld [vmem:[#allocation6 + $0xff0] sm:$0xff] }
 0x359   :  { %6816 = vmatpush2.bf16.msra.mxu0 %v8487_v14  ;;  %v8185_v14 = vcombine.low %v3260_v36, %v3264_v12  ;;  %v3340_v36 = vld [vmem:[#allocation6 + $0x318] sm:$0xff] }
 0x35a   :  { %6769 = vmatpush2.bf16.msra.mxu1 %v8375_v16  ;;  %6871 = vmatprep.subr.bf16.mxu0 %v8226_v32  ;;  %v8583_v16 = vcombine.low %v3659_v28, %v3663_v63  ;;  %v8178_v32 = vcombine.high %v3252_v3, %v3256_v5  ;;  %v3344_v12 = vld [vmem:[#allocation6 + $0x338] sm:$0xff]  ;;  %v3739_v28 = vld [vmem:[#allocation6 + $0xf90] sm:$0xff] }
 0x35b   :  { %6770 = vmatprep.subr.bf16.mxu1 %v8368_v19  ;;  %v8576_v19 = vcombine.high %v3651_v23, %v3655_v13  ;;  %v3743_v63 = vld [vmem:[#allocation6 + $0xfb0] sm:$0xff] }
 0x35c   :  { %6818 = vmatmul.mubr.bf16.vlgmr.msra.gmra.mxu0 %v9318_v10 }
 0x35d   :  { %6872 = vmatpush1.bf16.msra.mxu0 %v8225_v31  ;;  %6903 = vmatprep.mubr.bf16.mxu0 %v9269_v11  ;;  %v3268_v11 = vld [vmem:[#allocation6 + $0xd8] sm:$0xff]  ;;  %v8177_v31 = vcombine.low %v3252_v3, %v3256_v5 }
 0x35e   :  { %6771 = vmatpush2.bf16.msra.mxu1 %v8367_v17  ;;  %6873 = vmatprep.subr.bf16.mxu0 %v8218_v34  ;;  %v8194_v62 = vcombine.high %v3268_v11, %v3272_v22  ;;  %v8193_v0 = vcombine.low %v3268_v11, %v3272_v22  ;;  %v8575_v17 = vcombine.low %v3651_v23, %v3655_v13  ;;  %v3348_v11 = vld [vmem:[#allocation6 + $0x358] sm:$0xff]  ;;  %v3731_v23 = vld [vmem:[#allocation6 + $0xf50] sm:$0xff] }
 0x35f   :  { %6772 = vmatprep.subr.bf16.mxu1 %v8360_v35  ;;  %v8170_v34 = vcombine.high %v3244_v52, %v3248_v21  ;;  %v8568_v35 = vcombine.high %v3643_v26, %v3647_v61  ;;  %v3352_v22 = vld [vmem:[#allocation6 + $0x378] sm:$0xff]  ;;  %v3735_v13 = vld [vmem:[#allocation6 + $0xf70] sm:$0xff] }
 0x360   :  { %v3332_v3 = vld [vmem:[#allocation6 + $0x2d8] sm:$0xff] }
 0x361   :  { %6874 = vmatpush1.bf16.msra.mxu0 %v8217_v33  ;;  %v8169_v33 = vcombine.low %v3244_v52, %v3248_v21  ;;  %v3336_v5 = vld [vmem:[#allocation6 + $0x2f8] sm:$0xff] }
 0x362   :  { %6773 = vmatpush2.bf16.msra.mxu1 %v8359_v39  ;;  %6875 = vmatprep.subr.bf16.mxu0 %v8210_v42  ;;  %v8567_v39 = vcombine.low %v3643_v26, %v3647_v61  ;;  %v8290_v42 = vcombine.high %v3364_v47, %v3368_v8  ;;  %v3324_v52 = vld [vmem:[#allocation6 + $0x298] sm:$0xff]  ;;  %v3723_v26 = vld [vmem:[#allocation6 + $0xf10] sm:$0xff] }
 0x363   :  { %6828 = vmatprep.subr.bf16.mxu1 %v8608_v4  ;;  %v8560_v4 = vcombine.high %v3635_v37, %v3639_v27  ;;  %v3328_v21 = vld [vmem:[#allocation6 + $0x2b8] sm:$0xff]  ;;  %v3727_v61 = vld [vmem:[#allocation6 + $0xf30] sm:$0xff] }
 0x365   :  { %6775 = vmatmul.mubr.bf16.vlgmr.msra.gmra.mxu1 %v9288_v56  ;;  %6876 = vmatpush1.bf16.msra.mxu0 %v8209_v48  ;;  %v8289_v48 = vcombine.low %v3364_v47, %v3368_v8  ;;  %v3316_v47 = vld [vmem:[#allocation6 + $0x258] sm:$0xff] }
 0x366   :  { %6829 = vmatpush1.bf16.msra.mxu1 %v8607_v60  ;;  %6860 = vmatprep.mubr.bf16.mxu1 %v9333_v40  ;;  %v8559_v60 = vcombine.low %v3635_v37, %v3639_v27  ;;  %v3320_v8 = vld [vmem:[#allocation6 + $0x278] sm:$0xff]  ;;  %v3715_v37 = vld [vmem:[#allocation6 + $0xed0] sm:$0xff] }
 0x367   :  { %6830 = vmatprep.subr.bf16.mxu1 %v8600_v38  ;;  %6877 = vmatprep.subr.bf16.mxu0 %v8202_v53  ;;  %v8282_v38 = vcombine.high %v3356_v45, %v3360_v6  ;;  %v8552_v53 = vcombine.high %v3627_v44, %v3631_v55  ;;  %v3719_v27 = vld [vmem:[#allocation6 + $0xef0] sm:$0xff] }
 0x369   :  { %6878 = vmatpush1.bf16.msra.mxu0 %v8201_v58  ;;  %v8281_v58 = vcombine.low %v3356_v45, %v3360_v6  ;;  %v3308_v45 = vld [vmem:[#allocation6 + $0x218] sm:$0xff] }
 0x36a   :  { %6831 = vmatpush1.bf16.msra.mxu1 %v8599_v41  ;;  %6879 = vmatprep.subr.bf16.mxu0 %v8194_v62  ;;  %v8551_v41 = vcombine.low %v3627_v44, %v3631_v55  ;;  %v8274_v62 = vcombine.high %v3348_v11, %v3352_v22  ;;  %v3312_v6 = vld [vmem:[#allocation6 + $0x238] sm:$0xff]  ;;  %v3707_v44 = vld [vmem:[#allocation6 + $0xe90] sm:$0xff] }
 0x36b   :  { %6832 = vmatprep.subr.bf16.mxu1 %v8592_v43  ;;  %v8672_v43 = vcombine.high %v3747_v54, %v3751_v30  ;;  %v3711_v55 = vld [vmem:[#allocation6 + $0xeb0] sm:$0xff] }
 0x36d   :  { %6880 = vmatpush1.bf16.msra.mxu0 %v8193_v0  ;;  %v8273_v0 = vcombine.low %v3348_v11, %v3352_v22  ;;  %v3556_v11 = vld [vmem:[#allocation6 + $0x9d8] sm:$0xff] }
 0x36e   :  { %6833 = vmatpush1.bf16.msra.mxu1 %v8591_v15  ;;  %6881 = vmatprep.subr.bf16.mxu0 %v8186_v1  ;;  %v8671_v15 = vcombine.low %v3747_v54, %v3751_v30  ;;  %v8266_v1 = vcombine.high %v3340_v36, %v3344_v12  ;;  %v3560_v22 = vld [vmem:[#allocation6 + $0x9f8] sm:$0xff]  ;;  %v3699_v54 = vld [vmem:[#allocation6 + $0xe50] sm:$0xff] }
 0x36f   :  { %6834 = vmatprep.subr.bf16.mxu1 %v8584_v2  ;;  %v8664_v2 = vcombine.high %v3739_v28, %v3743_v63  ;;  %v3703_v30 = vld [vmem:[#allocation6 + $0xe70] sm:$0xff] }
 0x371   :  { %6882 = vmatpush1.bf16.msra.mxu0 %v8185_v14  ;;  %v8265_v14 = vcombine.low %v3340_v36, %v3344_v12  ;;  %v3548_v36 = vld [vmem:[#allocation6 + $0x998] sm:$0xff] }
 0x372   :  { %6835 = vmatpush1.bf16.msra.mxu1 %v8583_v16  ;;  %6883 = vmatprep.subr.bf16.mxu0 %v8178_v32  ;;  %v8663_v16 = vcombine.low %v3739_v28, %v3743_v63  ;;  %v8258_v32 = vcombine.high %v3332_v3, %v3336_v5  ;;  %v3552_v12 = vld [vmem:[#allocation6 + $0x9b8] sm:$0xff]  ;;  %v3691_v28 = vld [vmem:[#allocation6 + $0xe10] sm:$0xff] }
 0x373   :  { %6836 = vmatprep.subr.bf16.mxu1 %v8576_v19  ;;  %v8656_v19 = vcombine.high %v3731_v23, %v3735_v13  ;;  %v3695_v63 = vld [vmem:[#allocation6 + $0xe30] sm:$0xff] }
 0x375   :  { %6884 = vmatpush1.bf16.msra.mxu0 %v8177_v31  ;;  %v8257_v31 = vcombine.low %v3332_v3, %v3336_v5  ;;  %v3540_v3 = vld [vmem:[#allocation6 + $0x958] sm:$0xff] }
 0x376   :  { %6837 = vmatpush1.bf16.msra.mxu1 %v8575_v17  ;;  %6885 = vmatprep.subr.bf16.mxu0 %v8170_v34  ;;  %v8655_v17 = vcombine.low %v3731_v23, %v3735_v13  ;;  %v8250_v34 = vcombine.high %v3324_v52, %v3328_v21  ;;  %v3544_v5 = vld [vmem:[#allocation6 + $0x978] sm:$0xff] }
 0x377   :  { %6838 = vmatprep.subr.bf16.mxu1 %v8568_v35  ;;  %v8648_v35 = vcombine.high %v3723_v26, %v3727_v61  ;;  %v3428_v23 = vld [vmem:[#allocation6 + $0x5d8] sm:$0xff] }
 0x378   :  { %v3432_v13 = vld [vmem:[#allocation6 + $0x5f8] sm:$0xff] }
 0x379   :  { %6886 = vmatpush1.bf16.msra.mxu0 %v8169_v33  ;;  %v8249_v33 = vcombine.low %v3324_v52, %v3328_v21  ;;  %v3420_v52 = vld [vmem:[#allocation6 + $0x598] sm:$0xff] }
 0x37a   :  { %6839 = vmatpush1.bf16.msra.mxu1 %v8567_v39  ;;  %6887 = vmatprep.subr.bf16.mxu0 %v8290_v42  ;;  %v8647_v39 = vcombine.low %v3723_v26, %v3727_v61  ;;  %v8242_v42 = vcombine.high %v3316_v47, %v3320_v8  ;;  %v3424_v21 = vld [vmem:[#allocation6 + $0x5b8] sm:$0xff] }
 0x37b   :  { %6840 = vmatprep.subr.bf16.mxu1 %v8560_v4  ;;  %v8640_v4 = vcombine.high %v3715_v37, %v3719_v27  ;;  %v3532_v26 = vld [vmem:[#allocation6 + $0x918] sm:$0xff] }
 0x37c   :  { %v3536_v61 = vld [vmem:[#allocation6 + $0x938] sm:$0xff] }
 0x37d   :  { %6888 = vmatpush2.bf16.msra.mxu0 %v8289_v48  ;;  %v8241_v48 = vcombine.low %v3316_v47, %v3320_v8  ;;  %v3412_v47 = vld [vmem:[#allocation6 + $0x558] sm:$0xff] }
 0x37e   :  { %6841 = vmatpush1.bf16.msra.mxu1 %v8559_v60  ;;  %6889 = vmatprep.subr.bf16.mxu0 %v8282_v38  ;;  %v8639_v60 = vcombine.low %v3715_v37, %v3719_v27  ;;  %v8234_v38 = vcombine.high %v3308_v45, %v3312_v6  ;;  %v3416_v8 = vld [vmem:[#allocation6 + $0x578] sm:$0xff]  ;;  %v8457_v37 = vcombine.low %v3532_v26, %v3536_v61 }
 0x37f   :  { %6842 = vmatprep.subr.bf16.mxu1 %v8552_v53  ;;  %v8632_v53 = vcombine.high %v3707_v44, %v3711_v55  ;;  %v8345_v27 = vcombine.low %v3420_v52, %v3424_v21 }
 0x381   :  { %6890 = vmatpush2.bf16.msra.mxu0 %v8281_v58  ;;  %v8233_v58 = vcombine.low %v3308_v45, %v3312_v6  ;;  %v3404_v45 = vld [vmem:[#allocation6 + $0x518] sm:$0xff] }
 0x382   :  { %6843 = vmatpush1.bf16.msra.mxu1 %v8551_v41  ;;  %6891 = vmatprep.subr.bf16.mxu0 %v8274_v62  ;;  %v8631_v41 = vcombine.low %v3707_v44, %v3711_v55  ;;  %v8482_v62 = vcombine.high %v3556_v11, %v3560_v22  ;;  %v3408_v6 = vld [vmem:[#allocation6 + $0x538] sm:$0xff]  ;;  %v8337_v55 = vcombine.low %v3412_v47, %v3416_v8 }
 0x383   :  { %6844 = vmatprep.subr.bf16.mxu1 %v8672_v43  ;;  %v8624_v43 = vcombine.high %v3699_v54, %v3703_v30 }
 0x385   :  { %6892 = vmatpush2.bf16.msra.mxu0 %v8273_v0  ;;  %v8481_v0 = vcombine.low %v3556_v11, %v3560_v22  ;;  %v3400_v11 = vld [vmem:[#allocation6 + $0x4f8] sm:$0xff] }
 0x386   :  { %6845 = vmatpush2.bf16.msra.mxu1 %v8671_v15  ;;  %6893 = vmatprep.subr.bf16.mxu0 %v8266_v1  ;;  %v8623_v15 = vcombine.low %v3699_v54, %v3703_v30  ;;  %v8474_v1 = vcombine.high %v3548_v36, %v3552_v12  ;;  %v8329_v54 = vcombine.low %v3404_v45, %v3408_v6 }
 0x387   :  { %6846 = vmatprep.subr.bf16.mxu1 %v8664_v2  ;;  %v8616_v2 = vcombine.high %v3691_v28, %v3695_v63 }
 0x389   :  { %6894 = vmatpush2.bf16.msra.mxu0 %v8265_v14  ;;  %v8473_v14 = vcombine.low %v3548_v36, %v3552_v12  ;;  %v3392_v36 = vld [vmem:[#allocation6 + $0x4b8] sm:$0xff] }
 0x38a   :  { %6847 = vmatpush2.bf16.msra.mxu1 %v8663_v16  ;;  %6895 = vmatprep.subr.bf16.mxu0 %v8258_v32  ;;  %v8615_v16 = vcombine.low %v3691_v28, %v3695_v63  ;;  %v8466_v32 = vcombine.high %v3540_v3, %v3544_v5 }
 0x38b   :  { %6848 = vmatprep.subr.bf16.mxu1 %v8656_v19  ;;  %v8354_v19 = vcombine.high %v3428_v23, %v3432_v13 }
 0x38d   :  { %6896 = vmatpush2.bf16.msra.mxu0 %v8257_v31  ;;  %v8465_v31 = vcombine.low %v3540_v3, %v3544_v5  ;;  %v3380_v3 = vld [vmem:[#allocation6 + $0x458] sm:$0xff] }
 0x38e   :  { %6849 = vmatpush2.bf16.msra.mxu1 %v8655_v17  ;;  %6897 = vmatprep.subr.bf16.mxu0 %v8250_v34  ;;  %v8346_v17 = vcombine.high %v3420_v52, %v3424_v21  ;;  %v8458_v34 = vcombine.high %v3532_v26, %v3536_v61  ;;  %v3384_v5 = vld [vmem:[#allocation6 + $0x478] sm:$0xff] }
 0x38f   :  { %6850 = vmatprep.subr.bf16.mxu1 %v8648_v35  ;;  %v3528_v35 = vld [vmem:[#allocation6 + $0x8f8] sm:$0xff] }
 0x390   :  { %v3616_v52 = vld [vmem:[#allocation6 + $0xbb8] sm:$0xff] }
 0x391   :  { %6898 = vmatpush2.bf16.msra.mxu0 %v8249_v33  ;;  %v3372_v26 = vld [vmem:[#allocation6 + $0x418] sm:$0xff] }
 0x392   :  { %6851 = vmatpush2.bf16.msra.mxu1 %v8647_v39  ;;  %6899 = vmatprep.subr.bf16.mxu0 %v8242_v42  ;;  %v8338_v39 = vcombine.high %v3412_v47, %v3416_v8  ;;  %v3516_v42 = vld [vmem:[#allocation6 + $0x898] sm:$0xff] }
 0x393   :  { %6852 = vmatprep.subr.bf16.mxu1 %v8640_v4  ;;  %v3520_v4 = vld [vmem:[#allocation6 + $0x8b8] sm:$0xff] }
 0x394   :  { %v8441_v22 = vcombine.low %v3516_v42, %v3520_v4  ;;  %v3376_v61 = vld [vmem:[#allocation6 + $0x438] sm:$0xff] }
 0x395   :  { %6900 = vmatpush2.bf16.msra.mxu0 %v8241_v48  ;;  %v8442_v48 = vcombine.high %v3516_v42, %v3520_v4  ;;  %v3608_v47 = vld [vmem:[#allocation6 + $0xb78] sm:$0xff]  ;;  %v8297_v42 = vcombine.low %v3372_v26, %v3376_v61 }
 0x396   :  { %6853 = vmatpush2.bf16.msra.mxu1 %v8639_v60  ;;  %6901 = vmatprep.subr.bf16.mxu0 %v8234_v38  ;;  %v8330_v60 = vcombine.high %v3404_v45, %v3408_v6  ;;  %v3508_v38 = vld [vmem:[#allocation6 + $0x858] sm:$0xff] }
 0x397   :  { %6854 = vmatprep.subr.bf16.mxu1 %v8632_v53  ;;  %v3512_v53 = vld [vmem:[#allocation6 + $0x878] sm:$0xff] }
 0x398   :  { %v8434_v30 = vcombine.high %v3508_v38, %v3512_v53  ;;  %v8433_v12 = vcombine.low %v3508_v38, %v3512_v53  ;;  %v3596_v6 = vld [vmem:[#allocation6 + $0xb18] sm:$0xff] }
 0x399   :  { %6902 = vmatpush2.bf16.msra.mxu0 %v8233_v58 }
 0x39a   :  { %6855 = vmatpush2.bf16.msra.mxu1 %v8631_v41  ;;  %6957 = vmatprep.subr.bf16.mxu0 %v8482_v62  ;;  %v3500_v41 = vld [vmem:[#allocation6 + $0x818] sm:$0xff] }
 0x39b   :  { %6856 = vmatprep.subr.bf16.mxu1 %v8624_v43  ;;  %v3504_v62 = vld [vmem:[#allocation6 + $0x838] sm:$0xff] }
 0x39c   :  { %6904 = vmatmul.mubr.bf16.vlgmr.msra.gmra.mxu0 %v9215_v51  ;;  %v8353_v51 = vcombine.low %v3428_v23, %v3432_v13  ;;  %v3388_v43 = vld [vmem:[#allocation6 + $0x498] sm:$0xff]  ;;  %v8426_v63 = vcombine.high %v3500_v41, %v3504_v62  ;;  %v8425_v23 = vcombine.low %v3500_v41, %v3504_v62  ;;  %v9361_v13 = vpop.f32.mrf.mxu1 }
 0x39d   :  { %6958 = vmatpush1.bf16.msra.mxu0 %v8481_v0  ;;  %6989 = vmatprep.mubr.bf16.mxu0 %v9316_v9  ;;  %v3524_v9 = vld [vmem:[#allocation6 + $0x8d8] sm:$0xff]  ;;  %v8314_v0 = vcombine.high %v3388_v43, %v3392_v36 }
 0x39e   :  { %6857 = vmatpush2.bf16.msra.mxu1 %v8623_v15  ;;  %6959 = vmatprep.subr.bf16.mxu0 %v8474_v1  ;;  %v8450_v33 = vcombine.high %v3524_v9, %v3528_v35  ;;  %v8449_v44 = vcombine.low %v3524_v9, %v3528_v35  ;;  %v3620_v15 = vld [vmem:[#allocation6 + $0xbd8] sm:$0xff]  ;;  %v8298_v9 = vcombine.high %v3372_v26, %v3376_v61 }
 0x39f   :  { %6858 = vmatprep.subr.bf16.mxu1 %v8616_v2  ;;  %v3624_v1 = vld [vmem:[#allocation6 + $0xbf8] sm:$0xff]  ;;  %v9359_v2 = vpop.f32.mrf.mxu0 }
 0x3a0   :  { %v3604_v35 = vld [vmem:[#allocation6 + $0xb58] sm:$0xff] }
 0x3a1   :  { %6960 = vmatpush1.bf16.msra.mxu0 %v8473_v14  ;;  %v8313_v14 = vcombine.low %v3388_v43, %v3392_v36  ;;  %v9363_v21 = vpop.f32.mrf.mxu0  ;;  %v8530_v4 = vcombine.high %v3604_v35, %v3608_v47  ;;  %v8529_v38 = vcombine.low %v3604_v35, %v3608_v47  ;;  %v3476_v62 = vld [vmem:[#allocation6 + $0x758] sm:$0xff] }
 0x3a2   :  { %6859 = vmatpush2.bf16.msra.mxu1 %v8615_v16  ;;  %6961 = vmatprep.subr.bf16.mxu0 %v8466_v32  ;;  %v8546_v16 = vcombine.high %v3620_v15, %v3624_v1  ;;  %v8306_v32 = vcombine.high %v3380_v3, %v3384_v5  ;;  %v3480_v43 = vld [vmem:[#allocation6 + $0x778] sm:$0xff] }
 0x3a3   :  { %6914 = vmatprep.subr.bf16.mxu1 %v8354_v19  ;;  %v3612_v19 = vld [vmem:[#allocation6 + $0xb98] sm:$0xff]  ;;  %v9367_v8 = vpop.f32.mrf.mxu0 }
 0x3a4   :  { %v3460_v35 = vld [vmem:[#allocation6 + $0x6d8] sm:$0xff] }
 0x3a5   :  { %6861 = vmatmul.mubr.bf16.vlgmr.msra.gmra.mxu1 %v9335_v24  ;;  %6962 = vmatpush1.bf16.msra.mxu0 %v8465_v31  ;;  %v8545_v31 = vcombine.low %v3620_v15, %v3624_v1  ;;  %v3580_v15 = vld [vmem:[#allocation6 + $0xa98] sm:$0xff] }
 0x3a6   :  { %6915 = vmatpush1.bf16.msra.mxu1 %v8353_v51  ;;  %6946 = vmatprep.mubr.bf16.mxu1 %v9277_v59  ;;  %v3396_v59 = vld [vmem:[#allocation6 + $0x4d8] sm:$0xff]  ;;  %v9365_v51 = vpop.f32.mrf.mxu1 }
 0x3a7   :  { %6916 = vmatprep.subr.bf16.mxu1 %v8346_v17  ;;  %6963 = vmatprep.subr.bf16.mxu0 %v8458_v34  ;;  %v8322_v58 = vcombine.high %v3396_v59, %v3400_v11  ;;  %v8321_v28 = vcombine.low %v3396_v59, %v3400_v11  ;;  %v8305_v17 = vcombine.low %v3380_v3, %v3384_v5  ;;  %v3584_v1 = vld [vmem:[#allocation6 + $0xab8] sm:$0xff]  ;;  %v9375_v3 = vld [vmem:[#allocation7] sm:$0xff] }
 0x3a8   :  { %v8538_v34 = vcombine.high %v3612_v19, %v3616_v52  ;;  %v8506_v26 = vcombine.high %v3580_v15, %v3584_v1  ;;  %v3464_v47 = vld [vmem:[#allocation6 + $0x6f8] sm:$0xff] }
 0x3a9   :  { %6964 = vmatpush1.bf16.msra.mxu0 %v8457_v37  ;;  %v3492_v37 = vld [vmem:[#allocation6 + $0x7d8] sm:$0xff] }
 0x3aa   :  { %6917 = vmatpush1.bf16.msra.mxu1 %v8345_v27  ;;  %6965 = vmatprep.subr.bf16.mxu0 %v8450_v33  ;;  %v3496_v27 = vld [vmem:[#allocation6 + $0x7f8] sm:$0xff]  ;;  %v8537_v33 = vcombine.low %v3612_v19, %v3616_v52  ;;  %v8401_v52 = vcombine.low %v3476_v62, %v3480_v43 }
 0x3ab   :  { %6918 = vmatprep.subr.bf16.mxu1 %v8338_v39  ;;  %v9369_v39 = vpop.f32.mrf.mxu1  ;;  %v8418_v45 = vcombine.high %v3492_v37, %v3496_v27  ;;  %v8417_v11 = vcombine.low %v3492_v37, %v3496_v27 }
 0x3ad   :  { %6966 = vmatpush1.bf16.msra.mxu0 %v8449_v44  ;;  %v3600_v44 = vld [vmem:[#allocation6 + $0xb38] sm:$0xff]  ;;  %v6438_v53 = vpop.f32.mrf.mxu1 }
 0x3ae   :  { %6919 = vmatpush1.bf16.msra.mxu1 %v8337_v55  ;;  %6967 = vmatprep.subr.bf16.mxu0 %v8442_v48  ;;  %v6395_v55 = vpop.f32.mrf.mxu0  ;;  %v3484_v48 = vld [vmem:[#allocation6 + $0x798] sm:$0xff]  ;;  %v8521_v36 = vcombine.low %v3596_v6, %v3600_v44 }
 0x3af   :  { %6920 = vmatprep.subr.bf16.mxu1 %v8330_v60  ;;  %v3488_v60 = vld [vmem:[#allocation6 + $0x7b8] sm:$0xff]  ;;  %v9373_v41 = vpop.f32.mrf.mxu1 }
 0x3b0   :  { %v9371_v59 = vpop.f32.mrf.mxu0 }
 0x3b1   :  { %6968 = vmatpush1.bf16.msra.mxu0 %v8441_v22  ;;  %v8522_v22 = vcombine.high %v3596_v6, %v3600_v44  ;;  %v6520_v5 = vpop.f32.mrf.mxu1  ;;  %v3564_v6 = vld [vmem:[#allocation6 + $0xa18] sm:$0xff] }
 0x3b2   :  { %6921 = vmatpush1.bf16.msra.mxu1 %v8329_v54  ;;  %6969 = vmatprep.subr.bf16.mxu0 %v8434_v30  ;;  %v8410_v54 = vcombine.high %v3484_v48, %v3488_v60  ;;  %v3588_v30 = vld [vmem:[#allocation6 + $0xad8] sm:$0xff] }
 0x3b3   :  { %6922 = vmatprep.subr.bf16.mxu1 %v8322_v58  ;;  %v3592_v58 = vld [vmem:[#allocation6 + $0xaf8] sm:$0xff] }
 0x3b4   :  { %v3568_v44 = vld [vmem:[#allocation6 + $0xa38] sm:$0xff] }
 0x3b5   :  { %6970 = vmatpush1.bf16.msra.mxu0 %v8433_v12  ;;  %v6477_v12 = vpop.f32.mrf.mxu0 }
 0x3b6   :  { %6923 = vmatpush1.bf16.msra.mxu1 %v8321_v28  ;;  %6971 = vmatprep.subr.bf16.mxu0 %v8426_v63  ;;  %v8409_v28 = vcombine.low %v3484_v48, %v3488_v60  ;;  %v8514_v63 = vcombine.high %v3588_v30, %v3592_v58  ;;  %v3452_v48 = vld [vmem:[#allocation6 + $0x698] sm:$0xff] }
 0x3b7   :  { %6924 = vmatprep.subr.bf16.mxu1 %v8314_v0  ;;  %v8402_v0 = vcombine.high %v3476_v62, %v3480_v43  ;;  %v9380_v19 = vpop.f32.mrf.mxu0  ;;  %v3456_v60 = vld [vmem:[#allocation6 + $0x6b8] sm:$0xff] }
 0x3b8   :  { %v3444_v62 = vld [vmem:[#allocation6 + $0x658] sm:$0xff] }
 0x3b9   :  { %6972 = vmatpush1.bf16.msra.mxu0 %v8425_v23  ;;  %v3468_v23 = vld [vmem:[#allocation6 + $0x718] sm:$0xff]  ;;  %v6481_v27 = vpop.f32.mrf.mxu0 }
 0x3ba   :  { %6925 = vmatpush1.bf16.msra.mxu1 %v8313_v14  ;;  %6973 = vmatprep.subr.bf16.mxu0 %v8546_v16  ;;  %v3472_v14 = vld [vmem:[#allocation6 + $0x738] sm:$0xff]  ;;  %v3762_v16 = vrot.slane %v9375_v3, %v496_v46  ;;  %v8505_v46 = vcombine.low %v3580_v15, %v3584_v1 }
 0x3bb   :  { %6926 = vmatprep.subr.bf16.mxu1 %v8306_v32  ;;  %v8513_v32 = vcombine.low %v3588_v30, %v3592_v58  ;;  %v3448_v43 = vld [vmem:[#allocation6 + $0x678] sm:$0xff] }
 0x3bc   :  { %v6396_v61 = vadd.f32 %v6395_v55, %v3762_v16  ;;  %v6392_v37 = vadd.f32 %v9363_v21, %v3762_v16  ;;  %v8370_v15 = vcombine.high %v3444_v62, %v3448_v43  ;;  %v3436_v1 = vld [vmem:[#allocation6 + $0x618] sm:$0xff]  ;;  %v8369_v16 = vcombine.low %v3444_v62, %v3448_v43  ;;  %v8868_v43 = vld [vmem:[#allocation9 + $0x48] sm:$0xff]  }
 0x3bd   :  { %6974 = vmatpush2.bf16.msra.mxu0 %v8545_v31  ;;  %v8394_v31 = vcombine.high %v3468_v23, %v3472_v14 }
 0x3be   :  { %6927 = vmatpush1.bf16.msra.mxu1 %v8305_v17  ;;  %6975 = vmatprep.subr.bf16.mxu0 %v8538_v34  ;;  %v3572_v17 = vld [vmem:[#allocation6 + $0xa58] sm:$0xff] }
 0x3bf   :  { %6928 = vmatprep.subr.bf16.mxu1 %v8298_v9  ;;  %v3576_v34 = vld [vmem:[#allocation6 + $0xa78] sm:$0xff]  ;;  %v9382_v9 = vpop.f32.mrf.mxu1 }
 0x3c0   :  { %v8497_v21 = vcombine.low %v3572_v17, %v3576_v34 }
 0x3c1   :  { %6976 = vmatpush2.bf16.msra.mxu0 %v8537_v33  ;;  %v8393_v33 = vcombine.low %v3468_v23, %v3472_v14  ;;  %v6524_v55 = vpop.f32.mrf.mxu1  ;;  %v3440_v23 = vld [vmem:[#allocation6 + $0x638] sm:$0xff] }
 0x3c2   :  { %6929 = vmatpush1.bf16.msra.mxu1 %v8297_v42  ;;  %6977 = vmatprep.subr.bf16.mxu0 %v8530_v4  ;;  %v8498_v42 = vcombine.high %v3572_v17, %v3576_v34  ;;  %v6439_v4 = vadd.f32 %v6438_v53, %v6396_v61  ;;  %v8378_v53 = vcombine.high %v3452_v48, %v3456_v60  ;;  %v3688_v61 = vld [vmem:[#allocation6 + $0xdf8] sm:$0xff]  ;;  %v8860_v34 = vld [vmem:[#allocation9 + $0x68] sm:$0xff]  }
 0x3c3   :  { %6930 = vmatprep.subr.bf16.mxu1 %v8418_v45  ;;  %v8386_v45 = vcombine.high %v3460_v35, %v3464_v47  ;;  %v8361_v17 = vcombine.low %v3436_v1, %v3440_v23 }
 0x3c5   :  { %6978 = vmatpush2.bf16.msra.mxu0 %v8529_v38  ;;  %v6435_v38 = vadd.f32 %v9365_v51, %v6392_v37  ;;  %v8856_v51 = vld [vmem:[#allocation9 + $0x78] sm:$0xff]   ;;  %v3680_v37 = vld [vmem:[#allocation6 + $0xdb8] sm:$0xff] }
 0x3c6   :  { %6931 = vmatpush2.bf16.msra.mxu1 %v8417_v11  ;;  %6979 = vmatprep.subr.bf16.mxu0 %v8522_v22  ;;  %v6482_v11 = vadd.f32 %v6481_v27, %v6439_v4  ;;  %v8385_v22 = vcombine.low %v3460_v35, %v3464_v47  ;;  %v3676_v47 = vld [vmem:[#allocation6 + $0xd98] sm:$0xff] }
 0x3c7   :  { %6932 = vmatprep.subr.bf16.mxu1 %v8410_v54  ;;  %v8490_v54 = vcombine.high %v3564_v6, %v3568_v44  ;;  %v6478_v30 = vadd.f32 %v6477_v12, %v6435_v38  ;;  %v8857_v12 = vld [vmem:[#allocation9 + $0x38] sm:$0xff]   ;;  %v3672_v4 = vld [vmem:[#allocation6 + $0xd78] sm:$0xff] }
 0x3c8   :  { %v6525_v58 = vadd.f32 %v6524_v55, %v6482_v11  ;;  %v3664_v38 = vld [vmem:[#allocation6 + $0xd38] sm:$0xff]  ;;  %v8865_v11 = vld [vmem:[#allocation9 + $0x18] sm:$0xff]  }
 0x3c9   :  { %6980 = vmatpush2.bf16.msra.mxu0 %v8521_v36  ;;  %v6521_v36 = vadd.f32 %v6520_v5, %v6478_v30  ;;  %v8362_v5 = vcombine.high %v3436_v1, %v3440_v23  ;;  %v3652_v30 = vld [vmem:[#allocation6 + $0xcd8] sm:$0xff]  ;;  %v8870_v1 = vld [vmem:[#allocation9 + $0x40] sm:$0xff]  }
 0x3ca   :  { %6933 = vmatpush2.bf16.msra.mxu1 %v8409_v28  ;;  %6981 = vmatprep.subr.bf16.mxu0 %v8514_v63  ;;  %v8489_v28 = vcombine.low %v3564_v6, %v3568_v44  ;;  %v8377_v63 = vcombine.low %v3452_v48, %v3456_v60  ;;  %v8601_v6 = vcombine.low %v3676_v47, %v3680_v37  ;;  %v8864_v44 = vld [vmem:[#allocation9 + $0x58] sm:$0xff]   ;;  %v3660_v60 = vld [vmem:[#allocation6 + $0xd18] sm:$0xff] }
 0x3cb   :  { %6934 = vmatprep.subr.bf16.mxu1 %v8402_v0  ;;  %v7052_v0 = vmax.f32 %v6525_v58, 0.0  ;;  %v7044_v14 = vmax.f32 %v6521_v36, 0.0  ;;  %v3758_v48 = vrot.slane %v9375_v3, %v492_v29  ;;  %v3656_v58 = vld [vmem:[#allocation6 + $0xcf8] sm:$0xff]  ;;  %v8585_v62 = vcombine.low %v3660_v60, %v3664_v38 }
 0x3cd   :  { %6982 = vmatpush2.bf16.msra.mxu0 %v8513_v32  ;;  %v8858_v32 = vld [vmem:[#allocation9 + $0x70] sm:$0xff]  }
 0x3ce   :  { %6935 = vmatpush2.bf16.msra.mxu1 %v8401_v52  ;;  %6983 = vmatprep.subr.bf16.mxu0 %v8506_v26  ;;  %v7060_v52 = vpack.c.bf16 %v7052_v0, %v7044_v14  ;;  %v3684_v26 = vld [vmem:[#allocation6 + $0xdd8] sm:$0xff] }
 0x3cf   :  { %6936 = vmatprep.subr.bf16.mxu1 %v8394_v31  ;;  %v8859_v31 = vld [vmem:[#allocation9 + $0x30] sm:$0xff]   ;;  %v8610_v35 = vcombine.high %v3684_v26, %v3688_v61  ;;  %v8609_v27 = vcombine.low %v3684_v26, %v3688_v61  ;;  %v8889_v61 = vld [vmem:[#allocation9 + $0x138] sm:$0xff]  }
 0x3d0   :  { %v3632_v26 = vld [vmem:[#allocation6 + $0xc38] sm:$0xff] }
 0x3d1   :  { %6984 = vmatpush2.bf16.msra.mxu0 %v8505_v46  ;;  %v8861_v46 = vld [vmem:[#allocation9 + $0x28] sm:$0xff]  }
 0x3d2   :  { %6937 = vmatpush2.bf16.msra.mxu1 %v8393_v33  ;;  %6985 = vmatprep.subr.bf16.mxu0 %v8498_v42  ;;  %v8862_v33 = vld [vmem:[#allocation9 + $0x60] sm:$0xff]   ;;  %v3668_v42 = vld [vmem:[#allocation6 + $0xd58] sm:$0xff] }
 0x3d3   :  { %6938 = vmatprep.subr.bf16.mxu1 %v8386_v45  ;;  %v8863_v45 = vld [vmem:[#allocation9 + $0x20] sm:$0xff]   ;;  %v8594_v55 = vcombine.high %v3668_v42, %v3672_v4 }
 0x3d5   :  { %6986 = vmatpush2.bf16.msra.mxu0 %v8497_v21  ;;  %v8593_v21 = vcombine.low %v3668_v42, %v3672_v4  ;;  %v3740_v4 = vld [vmem:[#allocation6 + $0xf98] sm:$0xff] }
 0x3d6   :  { %6939 = vmatpush2.bf16.msra.mxu1 %v8385_v22  ;;  %6987 = vmatprep.subr.bf16.mxu0 %v8490_v54  ;;  %v8866_v22 = vld [vmem:[#allocation9 + $0x50] sm:$0xff]   ;;  %v6390_v54 = vadd.f32 %v9359_v2, %v3758_v48  ;;  %v8869_v2 = vld [vmem:[#allocation9 + $0x8] sm:$0xff]  }
 0x3d7   :  { %6940 = vmatprep.subr.bf16.mxu1 %v8378_v53  ;;  %v8867_v53 = vld [vmem:[#allocation9 + $0x10] sm:$0xff]  }
 0x3d8   :  { %v6433_v36 = vadd.f32 %v9361_v13, %v6390_v54  ;;  %v3640_v13 = vld [vmem:[#allocation6 + $0xc78] sm:$0xff] }
 0x3d9   :  { %6988 = vmatpush2.bf16.msra.mxu0 %v8489_v28 }
 0x3da   :  { %6941 = vmatpush2.bf16.msra.mxu1 %v8377_v63  ;;  %8748 = vmatprep.subr.bf16.mxu0 %v8856_v51  ;;  %v3644_v63 = vld [vmem:[#allocation6 + $0xc98] sm:$0xff]  ;;  %v6476_v0 = vadd.f32 %v9371_v59, %v6433_v36 }
 0x3db   :  { %6942 = vmatprep.subr.bf16.mxu1 %v8370_v15  ;;  %v3648_v51 = vld [vmem:[#allocation6 + $0xcb8] sm:$0xff] }
 0x3dc   :  { %6990 = vmatmul.mubr.bf16.vlgmr.msra.gmra.mxu0 %v9318_v10  ;;  %v8602_v10 = vcombine.high %v3676_v47, %v3680_v37  ;;  %v8570_v23 = vcombine.high %v3644_v63, %v3648_v51  ;;  %v6519_v14 = vadd.f32 %v9373_v41, %v6476_v0  ;;  %v8890_v41 = vld [vmem:[#allocation9 + $0x170] sm:$0xff]  }
 0x3dd   :  { %8749 = vmatpush3.bf16.msra.mxu0 %v8857_v12  ;;  %7611 = vmatprep.mubr.bf16.mxu0 %v7060_v52  ;;  %v3636_v12 = vld [vmem:[#allocation6 + $0xc58] sm:$0xff]  ;;  %v8888_v52 = vld [vmem:[#allocation9 + $0x178] sm:$0xff]  }
 0x3de   :  { %6943 = vmatpush2.bf16.msra.mxu1 %v8369_v16  ;;  %8750 = vmatprep.subr.bf16.mxu0 %v8858_v32  ;;  %v8569_v32 = vcombine.low %v3644_v63, %v3648_v51  ;;  %v8562_v59 = vcombine.high %v3636_v12, %v3640_v13  ;;  %v3752_v47 = vld [vmem:[#allocation6 + $0xff8] sm:$0xff] }
 0x3df   :  { %6944 = vmatprep.subr.bf16.mxu1 %v8362_v5  ;;  %v3628_v5 = vld [vmem:[#allocation6 + $0xc18] sm:$0xff] }
 0x3e0   :  { %v8891_v37 = vld [vmem:[#allocation9 + $0x130] sm:$0xff]  }
 0x3e1   :  { %8751 = vmatpush3.bf16.msra.mxu0 %v8859_v31  ;;  %v3716_v51 = vld [vmem:[#allocation6 + $0xed8] sm:$0xff] }
 0x3e2   :  { %6945 = vmatpush2.bf16.msra.mxu1 %v8361_v17  ;;  %8752 = vmatprep.subr.bf16.mxu0 %v8860_v34  ;;  %v8561_v17 = vcombine.low %v3636_v12, %v3640_v13  ;;  %v8554_v34 = vcombine.high %v3628_v5, %v3632_v26  ;;  %v3708_v12 = vld [vmem:[#allocation6 + $0xe98] sm:$0xff] }
 0x3e3   :  { %7000 = vmatprep.subr.bf16.mxu1 %v8610_v35  ;;  %v3748_v35 = vld [vmem:[#allocation6 + $0xfd8] sm:$0xff] }
 0x3e4   :  { %v8674_v42 = vcombine.high %v3748_v35, %v3752_v47  ;;  %v3712_v13 = vld [vmem:[#allocation6 + $0xeb8] sm:$0xff] }
 0x3e5   :  { %6947 = vmatmul.mubr.bf16.vlgmr.msra.gmra.mxu1 %v9288_v56  ;;  %8753 = vmatpush3.bf16.msra.mxu0 %v8861_v46  ;;  %v6394_v56 = vadd.f32 %v9367_v8, %v3758_v48  ;;  %v8578_v8 = vcombine.high %v3652_v30, %v3656_v58  ;;  %v8553_v46 = vcombine.low %v3628_v5, %v3632_v26 }
 0x3e6   :  { %7001 = vmatpush1.bf16.msra.mxu1 %v8609_v27  ;;  %7032 = vmatprep.mubr.bf16.mxu1 %v9333_v40  ;;  %v8586_v40 = vcombine.high %v3660_v60, %v3664_v38  ;;  %v8892_v27 = vld [vmem:[#allocation9 + $0x168] sm:$0xff]   ;;  %v8634_v5 = vcombine.high %v3708_v12, %v3712_v13 }
 0x3e7   :  { %7002 = vmatprep.subr.bf16.mxu1 %v8602_v10  ;;  %8754 = vmatprep.subr.bf16.mxu0 %v8862_v33  ;;  %v6437_v29 = vadd.f32 %v9369_v39, %v6394_v56  ;;  %v8577_v39 = vcombine.low %v3652_v30, %v3656_v58  ;;  %v9400_v10 = vpop.f32.mrf.mxu0  ;;  %v9402_v33 = vpop.f32.mrf.mxu1  ;;  %v3736_v56 = vld [vmem:[#allocation6 + $0xf78] sm:$0xff] }
 0x3e9   :  { %8755 = vmatpush3.bf16.msra.mxu0 %v8863_v45  ;;  %v6480_v28 = vadd.f32 %v9380_v19, %v6437_v29  ;;  %v8871_v19 = vld [vmem:[#allocation9] sm:$0xff]   ;;  %v3744_v45 = vld [vmem:[#allocation6 + $0xfb8] sm:$0xff]  ;;  %v6563_v48 = vpop.f32.mrf.mxu0  ;;  %v9404_v60 = vpop.f32.mrf.mxu1 }
 0x3ea   :  { %7003 = vmatpush1.bf16.msra.mxu1 %v8601_v6  ;;  %8756 = vmatprep.subr.bf16.mxu0 %v8864_v44  ;;  %v8893_v6 = vld [vmem:[#allocation9 + $0x128] sm:$0xff]   ;;  %v8673_v44 = vcombine.low %v3748_v35, %v3752_v47  ;;  %v8666_v38 = vcombine.high %v3740_v4, %v3744_v45  ;;  %v3728_v29 = vld [vmem:[#allocation6 + $0xf38] sm:$0xff] }
 0x3eb   :  { %7004 = vmatprep.subr.bf16.mxu1 %v8594_v55  ;;  %v6523_v15 = vadd.f32 %v9382_v9, %v6480_v28  ;;  %v7043_v9 = vmax.f32 %v6519_v14, 0.0  ;;  %v8894_v55 = vld [vmem:[#allocation9 + $0x160] sm:$0xff]   ;;  %v9406_v54 = vpop.f32.mrf.mxu0  ;;  %v9408_v30 = vpop.f32.mrf.mxu1 }
 0x3ed   :  { %8757 = vmatpush3.bf16.msra.mxu0 %v8865_v11  ;;  %v7051_v16 = vmax.f32 %v6523_v15, 0.0  ;;  %v3732_v11 = vld [vmem:[#allocation6 + $0xf58] sm:$0xff]  ;;  %v6567_v36 = vpop.f32.mrf.mxu0  ;;  %v6610_v28 = vpop.f32.mrf.mxu1 }
 0x3ee   :  { %7005 = vmatpush1.bf16.msra.mxu1 %v8593_v21  ;;  %8758 = vmatprep.subr.bf16.mxu0 %v8866_v22  ;;  %v8895_v21 = vld [vmem:[#allocation9 + $0x120] sm:$0xff]   ;;  %v8665_v22 = vcombine.low %v3740_v4, %v3744_v45  ;;  %v8658_v58 = vcombine.high %v3732_v11, %v3736_v56 }
 0x3ef   :  { %7006 = vmatprep.subr.bf16.mxu1 %v8586_v40  ;;  %v7059_v31 = vpack.c.bf16 %v7051_v16, %v7043_v9  ;;  %v8896_v40 = vld [vmem:[#allocation9 + $0x158] sm:$0xff]   ;;  %v9410_v0 = vpop.f32.mrf.mxu0  ;;  %v9412_v15 = vpop.f32.mrf.mxu1  ;;  %v8902_v9 = vld [vmem:[#allocation9 + $0x140] sm:$0xff]  }
 0x3f1   :  { %8759 = vmatpush3.bf16.msra.mxu0 %v8867_v53  ;;  %v3724_v53 = vld [vmem:[#allocation6 + $0xf18] sm:$0xff]  ;;  %v6692_v16 = vpop.f32.mrf.mxu1 }
 0x3f2   :  { %7007 = vmatpush1.bf16.msra.mxu1 %v8585_v62  ;;  %8760 = vmatprep.subr.bf16.mxu0 %v8868_v43  ;;  %v8897_v62 = vld [vmem:[#allocation9 + $0x118] sm:$0xff]   ;;  %v8657_v43 = vcombine.low %v3732_v11, %v3736_v56  ;;  %v8650_v63 = vcombine.high %v3724_v53, %v3728_v29 }
 0x3f3   :  { %7008 = vmatprep.subr.bf16.mxu1 %v8578_v8  ;;  %v8898_v8 = vld [vmem:[#allocation9 + $0x150] sm:$0xff]  }
 0x3f5   :  { %8761 = vmatpush3.bf16.msra.mxu0 %v8869_v2  ;;  %v3720_v2 = vld [vmem:[#allocation6 + $0xef8] sm:$0xff] }
 0x3f6   :  { %7009 = vmatpush1.bf16.msra.mxu1 %v8577_v39  ;;  %8762 = vmatprep.subr.bf16.mxu0 %v8870_v1  ;;  %v8899_v39 = vld [vmem:[#allocation9 + $0x110] sm:$0xff]   ;;  %v8649_v1 = vcombine.low %v3724_v53, %v3728_v29  ;;  %v8642_v14 = vcombine.high %v3716_v51, %v3720_v2 }
 0x3f7   :  { %7010 = vmatprep.subr.bf16.mxu1 %v8570_v23  ;;  %v8900_v23 = vld [vmem:[#allocation9 + $0x148] sm:$0xff]   ;;  %v8875_v29 = vld [vmem:[#allocation9 + $0xb0] sm:$0xff]  }
 0x3f9   :  { %8763 = vmatpush3.bf16.msra.mxu0 %v8871_v19  ;;  %v6649_v19 = vpop.f32.mrf.mxu0 }
 0x3fa   :  { %7011 = vmatpush1.bf16.msra.mxu1 %v8569_v32  ;;  %8792 = vmatprep.subr.bf16.mxu0 %v8888_v52  ;;  %v8901_v32 = vld [vmem:[#allocation9 + $0x108] sm:$0xff]   ;;  %v3770_v52 = vrot.slane %v9375_v3, %v504_v7 }
 0x3fb   :  { %7012 = vmatprep.subr.bf16.mxu1 %v8562_v59  ;;  %v8641_v59 = vcombine.low %v3716_v51, %v3720_v2  ;;  %v8881_v51 = vld [vmem:[#allocation9 + $0x98] sm:$0xff]   ;;  %v8882_v2 = vld [vmem:[#allocation9 + $0xd0] sm:$0xff]  }
 0x3fc   :  { %7612 = vmatmul.mubr.bf16.vlgmr.msra.gmra.mxu0 %v7059_v31  ;;  %v6568_v26 = vadd.f32 %v6567_v36, %v3770_v52  ;;  %v3704_v31 = vld [vmem:[#allocation6 + $0xe78] sm:$0xff]  ;;  %v6564_v35 = vadd.f32 %v6563_v48, %v3770_v52  ;;  %v8879_v36 = vld [vmem:[#allocation9 + $0xa0] sm:$0xff]  }
 0x3fd   :  { %8793 = vmatpush3.bf16.msra.mxu0 %v8889_v61  ;;  %v3700_v61 = vld [vmem:[#allocation6 + $0xe58] sm:$0xff] }
 0x3fe   :  { %7013 = vmatpush1.bf16.msra.mxu1 %v8561_v17  ;;  %8794 = vmatprep.subr.bf16.mxu0 %v8890_v41  ;;  %v9417_v17 = vpop.f32.mrf.mxu0  ;;  %v9419_v41 = vpop.f32.mrf.mxu1  ;;  %v6611_v47 = vadd.f32 %v6610_v28, %v6568_v26  ;;  %v8626_v7 = vcombine.high %v3700_v61, %v3704_v31  ;;  %v8880_v28 = vld [vmem:[#allocation9 + $0xd8] sm:$0xff]   ;;  %v8908_v26 = vld [vmem:[#allocation9 + $0x1e8] sm:$0xff]  }
 0x3ff   :  { %7014 = vmatprep.subr.bf16.mxu1 %v8554_v34  ;;  %v8903_v34 = vld [vmem:[#allocation9 + $0x100] sm:$0xff]  }
 0x400   :  { %v6653_v4 = vpop.f32.mrf.mxu0  ;;  %v6696_v45 = vpop.f32.mrf.mxu1 }
 0x401   :  { %8795 = vmatpush3.bf16.msra.mxu0 %v8891_v37  ;;  %v8633_v37 = vcombine.low %v3708_v12, %v3712_v13  ;;  %v8884_v12 = vld [vmem:[#allocation9 + $0xc8] sm:$0xff]  }
 0x402   :  { %7015 = vmatpush1.bf16.msra.mxu1 %v8553_v46  ;;  %8796 = vmatprep.subr.bf16.mxu0 %v8892_v27  ;;  %v6607_v46 = vadd.f32 %v9404_v60, %v6564_v35  ;;  %v3692_v27 = vld [vmem:[#allocation6 + $0xe18] sm:$0xff]  ;;  %v8873_v60 = vld [vmem:[#allocation9 + $0xb8] sm:$0xff]  }
 0x403   :  { %7016 = vmatprep.subr.bf16.mxu1 %v8674_v42  ;;  %v3696_v42 = vld [vmem:[#allocation6 + $0xe38] sm:$0xff] }
 0x404   :  { %v8617_v56 = vcombine.low %v3692_v27, %v3696_v42 }
 0x405   :  { %8797 = vmatpush3.bf16.msra.mxu0 %v8893_v6  ;;  %v6654_v6 = vadd.f32 %v6653_v4, %v6611_v47  ;;  %v3774_v4 = vrot.slane %v9375_v3, %v508_v50 }
 0x406   :  { %7017 = vmatpush2.bf16.msra.mxu1 %v8673_v44  ;;  %8798 = vmatprep.subr.bf16.mxu0 %v8894_v55  ;;  %v8625_v44 = vcombine.low %v3700_v61, %v3704_v31  ;;  %v8618_v55 = vcombine.high %v3692_v27, %v3696_v42  ;;  %v8909_v61 = vld [vmem:[#allocation9 + $0x1a8] sm:$0xff]   ;;  %v8911_v31 = vld [vmem:[#allocation9 + $0x1a0] sm:$0xff]   ;;  %v3778_v42 = vrot.slane %v9375_v3, %v512_v49 }
 0x407   :  { %7018 = vmatprep.subr.bf16.mxu1 %v8666_v38  ;;  %v6650_v38 = vadd.f32 %v6649_v19, %v6607_v46  ;;  %v6697_v48 = vadd.f32 %v6696_v45, %v6654_v6 }
 0x409   :  { %8799 = vmatpush3.bf16.msra.mxu0 %v8895_v21  ;;  %v6693_v11 = vadd.f32 %v6692_v16, %v6650_v38  ;;  %v8872_v21 = vld [vmem:[#allocation9 + $0xf8] sm:$0xff]   ;;  %v8886_v16 = vld [vmem:[#allocation9 + $0xc0] sm:$0xff]  }
 0x40a   :  { %7019 = vmatpush2.bf16.msra.mxu1 %v8665_v22  ;;  %8800 = vmatprep.subr.bf16.mxu0 %v8896_v40  ;;  %v7054_v22 = vmax.f32 %v6697_v48, 0.0 }
 0x40b   :  { %7020 = vmatprep.subr.bf16.mxu1 %v8658_v58  ;;  %v7046_v40 = vmax.f32 %v6693_v11, 0.0  ;;  %v8874_v58 = vld [vmem:[#allocation9 + $0xf0] sm:$0xff]  }
 0x40d   :  { %8801 = vmatpush3.bf16.msra.mxu0 %v8897_v62  ;;  %v7062_v53 = vpack.c.bf16 %v7054_v22, %v7046_v40  ;;  %v8876_v62 = vld [vmem:[#allocation9 + $0xe8] sm:$0xff]  }
 0x40e   :  { %7021 = vmatpush2.bf16.msra.mxu1 %v8657_v43  ;;  %8802 = vmatprep.subr.bf16.mxu0 %v8898_v8  ;;  %v8877_v43 = vld [vmem:[#allocation9 + $0xa8] sm:$0xff]   ;;  %v8878_v8 = vld [vmem:[#allocation9 + $0xe0] sm:$0xff]  }
 0x40f   :  { %7022 = vmatprep.subr.bf16.mxu1 %v8650_v63  ;;  %v3766_v63 = vrot.slane %v9375_v3, %v500_v57  ;;  %v8885_v57 = vld [vmem:[#allocation9 + $0x88] sm:$0xff]  }
 0x411   :  { %8803 = vmatpush3.bf16.msra.mxu0 %v8899_v39  ;;  %v6562_v39 = vadd.f32 %v9400_v10, %v3766_v63 }
 0x412   :  { %7023 = vmatpush2.bf16.msra.mxu1 %v8649_v1  ;;  %8804 = vmatprep.subr.bf16.mxu0 %v8900_v23  ;;  %v8883_v23 = vld [vmem:[#allocation9 + $0x90] sm:$0xff]  }
 0x413   :  { %7024 = vmatprep.subr.bf16.mxu1 %v8642_v14  ;;  %v6605_v14 = vadd.f32 %v9402_v33, %v6562_v39 }
 0x415   :  { %8805 = vmatpush3.bf16.msra.mxu0 %v8901_v32  ;;  %v6648_v19 = vadd.f32 %v9410_v0, %v6605_v14  ;;  %v8907_v0 = vld [vmem:[#allocation9 + $0x1b0] sm:$0xff]  }
 0x416   :  { %7025 = vmatpush2.bf16.msra.mxu1 %v8641_v59  ;;  %8806 = vmatprep.subr.bf16.mxu0 %v8902_v9  ;;  %v8904_v59 = vld [vmem:[#allocation9 + $0x1f8] sm:$0xff]  }
 0x417   :  { %7026 = vmatprep.subr.bf16.mxu1 %v8634_v5  ;;  %v6691_v10 = vadd.f32 %v9412_v15, %v6648_v19  ;;  %v8905_v9 = vld [vmem:[#allocation9 + $0x1b8] sm:$0xff]   ;;  %v8906_v5 = vld [vmem:[#allocation9 + $0x1f0] sm:$0xff]   ;;  %v8910_v15 = vld [vmem:[#allocation9 + $0x1e0] sm:$0xff]  }
 0x418   :  { %v8919_v19 = vld [vmem:[#allocation9 + $0x180] sm:$0xff]  }
 0x419   :  { %8807 = vmatpush3.bf16.msra.mxu0 %v8903_v34  ;;  %v7045_v52 = vmax.f32 %v6691_v10, 0.0  ;;  %v8913_v34 = vld [vmem:[#allocation9 + $0x198] sm:$0xff]  }
 0x41a   :  { %7027 = vmatpush2.bf16.msra.mxu1 %v8633_v37 }
 0x41b   :  { %7028 = vmatprep.subr.bf16.mxu1 %v8626_v7 }
 0x41e   :  { %7029 = vmatpush2.bf16.msra.mxu1 %v8625_v44 }
 0x41f   :  { %7030 = vmatprep.subr.bf16.mxu1 %v8618_v55 }
 0x422   :  { %7031 = vmatpush2.bf16.msra.mxu1 %v8617_v56 }
 0x423   :  { %8770 = vmatprep.subr.bf16.mxu1 %v8872_v21 }
 0x425   :  { %7033 = vmatmul.mubr.bf16.vlgmr.msra.gmra.mxu1 %v9335_v24  ;;  %v6566_v24 = vadd.f32 %v9406_v54, %v3766_v63  ;;  %v6776_v37 = vpop.f32.mrf.mxu1 }
 0x426   :  { %8771 = vmatpush3.bf16.msra.mxu1 %v8873_v60  ;;  %7652 = vmatprep.mubr.bf16.mxu1 %v7062_v53 }
 0x427   :  { %8772 = vmatprep.subr.bf16.mxu1 %v8874_v58  ;;  %v6609_v1 = vadd.f32 %v9408_v30, %v6566_v24  ;;  %v8887_v30 = vld [vmem:[#allocation9 + $0x80] sm:$0xff]   ;;  %v6778_v46 = vpop.f32.mrf.mxu1  ;;  %v8914_v58 = vld [vmem:[#allocation9 + $0x1d0] sm:$0xff]  }
 0x429   :  { %v6652_v13 = vadd.f32 %v9417_v17, %v6609_v1  ;;  %v6733_v17 = vpop.f32.mrf.mxu0  ;;  %v6780_v45 = vpop.f32.mrf.mxu1 }
 0x42a   :  { %8773 = vmatpush3.bf16.msra.mxu1 %v8875_v29  ;;  %v6734_v38 = vadd.f32 %v6733_v17, %v3774_v4  ;;  %v8915_v29 = vld [vmem:[#allocation9 + $0x190] sm:$0xff]  }
 0x42b   :  { %8774 = vmatprep.subr.bf16.mxu1 %v8876_v62  ;;  %v6695_v54 = vadd.f32 %v9419_v41, %v6652_v13  ;;  %v8912_v41 = vld [vmem:[#allocation9 + $0x1d8] sm:$0xff]   ;;  %v6735_v35 = vpop.f32.mrf.mxu0  ;;  %v6782_v48 = vpop.f32.mrf.mxu1 }
 0x42c   :  { %v6736_v44 = vadd.f32 %v6735_v35, %v3778_v42  ;;  %v6777_v40 = vadd.f32 %v6776_v37, %v6734_v38 }
 0x42d   :  { %v7053_v32 = vmax.f32 %v6695_v54, 0.0  ;;  %v6737_v47 = vpop.f32.mrf.mxu0 }
 0x42e   :  { %8775 = vmatpush3.bf16.msra.mxu1 %v8877_v43  ;;  %v6738_v55 = vadd.f32 %v6737_v47, %v3774_v4  ;;  %v6779_v56 = vadd.f32 %v6778_v46, %v6736_v44 }
 0x42f   :  { %8776 = vmatprep.subr.bf16.mxu1 %v8878_v8  ;;  %v7061_v33 = vpack.c.bf16 %v7053_v32, %v7045_v52  ;;  %v6739_v7 = vpop.f32.mrf.mxu0 }
 0x430   :  { %v6740_v11 = vadd.f32 %v6739_v7, %v3778_v42  ;;  %v6781_v21 = vadd.f32 %v6780_v45, %v6738_v55 }
 0x431   :  { %v6819_v27 = vpop.f32.mrf.mxu0 }
 0x432   :  { %8777 = vmatpush3.bf16.msra.mxu1 %v8879_v36  ;;  %v6783_v53 = vadd.f32 %v6782_v48, %v6740_v11  ;;  %v6820_v8 = vadd.f32 %v6819_v27, %v6777_v40 }
 0x433   :  { %8778 = vmatprep.subr.bf16.mxu1 %v8880_v28  ;;  %v6821_v6 = vpop.f32.mrf.mxu0  ;;  %v8916_v28 = vld [vmem:[#allocation9 + $0x1c8] sm:$0xff]  }
 0x434   :  { %v6822_v62 = vadd.f32 %v6821_v6, %v6779_v56 }
 0x435   :  { %v6823_v22 = vpop.f32.mrf.mxu0 }
 0x436   :  { %8779 = vmatpush3.bf16.msra.mxu1 %v8881_v51  ;;  %v6824_v43 = vadd.f32 %v6823_v22, %v6781_v21 }
 0x437   :  { %8780 = vmatprep.subr.bf16.mxu1 %v8882_v2  ;;  %v6825_v50 = vpop.f32.mrf.mxu0  ;;  %v8917_v2 = vld [vmem:[#allocation9 + $0x188] sm:$0xff]  }
 0x438   :  { %v6826_v24 = vadd.f32 %v6825_v50, %v6783_v53 }
 0x43a   :  { %8781 = vmatpush3.bf16.msra.mxu1 %v8883_v23 }
 0x43b   :  { %8782 = vmatprep.subr.bf16.mxu1 %v8884_v12  ;;  %v8918_v12 = vld [vmem:[#allocation9 + $0x1c0] sm:$0xff]  }
 0x43e   :  { %8783 = vmatpush3.bf16.msra.mxu1 %v8885_v57 }
 0x43f   :  { %8784 = vmatprep.subr.bf16.mxu1 %v8886_v16 }
 0x442   :  { %8785 = vmatpush3.bf16.msra.mxu1 %v8887_v30 }
 0x443   :  { %8814 = vmatprep.subr.bf16.mxu1 %v8904_v59 }
 0x445   :  { %7653 = vmatmul.mubr.bf16.vlgmr.msra.gmra.mxu1 %v7061_v33 }
 0x446   :  { %8815 = vmatpush3.bf16.msra.mxu1 %v8905_v9 }
 0x447   :  { %8816 = vmatprep.subr.bf16.mxu1 %v8906_v5 }
 0x44a   :  { %8817 = vmatpush3.bf16.msra.mxu1 %v8907_v0  ;;  %v3786_v0 = vrot.slane %v9375_v3, %v520_v20 }
 0x44b   :  { %8818 = vmatprep.subr.bf16.mxu1 %v8908_v26  ;;  %v3782_v26 = vrot.slane %v9375_v3, %v516_v25 }
 0x44e   :  { %8819 = vmatpush3.bf16.msra.mxu1 %v8909_v61 }
 0x44f   :  { %8820 = vmatprep.subr.bf16.mxu1 %v8910_v15 }
 0x452   :  { %8821 = vmatpush3.bf16.msra.mxu1 %v8911_v31 }
 0x453   :  { %8822 = vmatprep.subr.bf16.mxu1 %v8912_v41 }
 0x456   :  { %8823 = vmatpush3.bf16.msra.mxu1 %v8913_v34 }
 0x457   :  { %8824 = vmatprep.subr.bf16.mxu1 %v8914_v58 }
 0x45a   :  { %8825 = vmatpush3.bf16.msra.mxu1 %v8915_v29 }
 0x45b   :  { %8826 = vmatprep.subr.bf16.mxu1 %v8916_v28 }
 0x45c   :  { %v6905_v30 = vpop.f32.mrf.mxu0 }
 0x45d   :  { %v6906_v41 = vadd.f32 %v6905_v30, %v3782_v26 }
 0x45e   :  { %8827 = vmatpush3.bf16.msra.mxu1 %v8917_v2  ;;  %v6907_v32 = vpop.f32.mrf.mxu0 }
 0x45f   :  { %8828 = vmatprep.subr.bf16.mxu1 %v8918_v12  ;;  %v6908_v31 = vadd.f32 %v6907_v32, %v3786_v0 }
 0x460   :  { %v6909_v52 = vpop.f32.mrf.mxu0 }
 0x461   :  { %v6910_v17 = vadd.f32 %v6909_v52, %v3782_v26 }
 0x462   :  { %8829 = vmatpush3.bf16.msra.mxu1 %v8919_v19  ;;  %v6911_v59 = vpop.f32.mrf.mxu0 }
 0x463   :  { %v6912_v35 = vadd.f32 %v6911_v59, %v3786_v0 }
 0x465   :  { %v6862_v60 = vpop.f32.mrf.mxu1 }
 0x466   :  { %v6863_v39 = vadd.f32 %v6862_v60, %v6820_v8 }
 0x467   :  { %v6864_v49 = vpop.f32.mrf.mxu1 }
 0x468   :  { %v6865_v63 = vadd.f32 %v6864_v49, %v6822_v62  ;;  %v7047_v54 = vmax.f32 %v6863_v39, 0.0 }
 0x469   :  { %v6866_v36 = vpop.f32.mrf.mxu1 }
 0x46a   :  { %v6867_v51 = vadd.f32 %v6866_v36, %v6824_v43  ;;  %v7048_v13 = vmax.f32 %v6865_v63, 0.0 }
 0x46b   :  { %v6868_v1 = vpop.f32.mrf.mxu1 }
 0x46c   :  { %v6869_v23 = vadd.f32 %v6868_v1, %v6826_v24  ;;  %v7055_v14 = vmax.f32 %v6867_v51, 0.0 }
 0x46e   :  { %v7056_v57 = vmax.f32 %v6869_v23, 0.0  ;;  %v7063_v10 = vpack.c.bf16 %v7055_v14, %v7047_v54 }
 0x470   :  { %v7064_v16 = vpack.c.bf16 %v7056_v57, %v7048_v13 }
 0x472   :  { %7693 = vmatprep.mubr.bf16.mxu0 %v7064_v16 }
 0x473   :  { %7694 = vmatmul.mubr.bf16.vlgmr.msra.gmra.mxu0 %v7063_v10 }
 0x49c   :  { %v6991_v5 = vpop.f32.mrf.mxu0 }
 0x49e   :  { %v6993_v15 = vpop.f32.mrf.mxu0 }
 0x4a0   :  { %v6995_v7 = vpop.f32.mrf.mxu0 }
 0x4a2   :  { %v6997_v6 = vpop.f32.mrf.mxu0 }
 0x4a5   :  { %v6948_v33 = vpop.f32.mrf.mxu1 }
 0x4a6   :  { %v6949_v46 = vadd.f32 %v6948_v33, %v6906_v41 }
 0x4a7   :  { %v6950_v9 = vpop.f32.mrf.mxu1 }
 0x4a8   :  { %v6951_v47 = vadd.f32 %v6950_v9, %v6908_v31  ;;  %v6992_v18 = vadd.f32 %v6991_v5, %v6949_v46 }
 0x4a9   :  { %v6952_v61 = vpop.f32.mrf.mxu1 }
 0x4aa   :  { %v6953_v37 = vadd.f32 %v6952_v61, %v6910_v17  ;;  %v6994_v45 = vadd.f32 %v6993_v15, %v6951_v47 }
 0x4ab   :  { %v6954_v34 = vpop.f32.mrf.mxu1 }
 0x4ac   :  { %v6955_v42 = vadd.f32 %v6954_v34, %v6912_v35  ;;  %v6996_v20 = vadd.f32 %v6995_v7, %v6953_v37 }
 0x4ae   :  { %v6998_v55 = vadd.f32 %v6997_v6, %v6955_v42 }
 0x4bc   :  { %v8764_v53 = vpop.f32.mrf.mxu0 }
 0x4be   :  { %v8765_v29 = vpop.f32.mrf.mxu0 }
 0x4bf   :  { %v8766_v14 = vadd.f32 %v8765_v29, %v8764_v53 }
 0x4c0   :  { %v8767_v49 = vpop.f32.mrf.mxu0 }
 0x4c2   :  { %v8768_v62 = vpop.f32.mrf.mxu0 }
 0x4c3   :  { %v8769_v12 = vadd.f32 %v8768_v62, %v8767_v49 }
 0x4e5   :  { %v7034_v27 = vpop.f32.mrf.mxu1 }
 0x4e6   :  { %v7035_v38 = vadd.f32 %v7034_v27, %v6992_v18 }
 0x4e7   :  { %v7036_v4 = vpop.f32.mrf.mxu1 }
 0x4e8   :  { %v7037_v25 = vadd.f32 %v7036_v4, %v6994_v45  ;;  %v7049_v40 = vmax.f32 %v7035_v38, 0.0 }
 0x4e9   :  { %v7038_v44 = vpop.f32.mrf.mxu1 }
 0x4ea   :  { %v7039_v3 = vadd.f32 %v7038_v44, %v6996_v20  ;;  %v7050_v21 = vmax.f32 %v7037_v25, 0.0 }
 0x4eb   :  { %v7040_v48 = vpop.f32.mrf.mxu1 }
 0x4ec   :  { %v7041_v11 = vadd.f32 %v7040_v48, %v6998_v55  ;;  %v7057_v56 = vmax.f32 %v7039_v3, 0.0 }
 0x4ee   :  { %v7058_v22 = vmax.f32 %v7041_v11, 0.0  ;;  %v7065_v58 = vpack.c.bf16 %v7057_v56, %v7049_v40 }
 0x4f0   :  { %v7066_v60 = vpack.c.bf16 %v7058_v22, %v7050_v21 }
 0x4f2   :  { %7734 = vmatprep.mubr.bf16.mxu1 %v7066_v60 }
 0x4f3   :  { %7735 = vmatmul.mubr.bf16.vlgmr.msra.gmra.mxu1 %v7065_v58 }
 0x505   :  { %v8786_v43 = vpop.f32.mrf.mxu1 }
 0x507   :  { %v8787_v8 = vpop.f32.mrf.mxu1 }
 0x508   :  { %v8788_v39 = vadd.f32 %v8787_v8, %v8786_v43 }
 0x509   :  { %v8789_v28 = vpop.f32.mrf.mxu1 }
 0x50a   :  { %v7655_v54 = vadd.f32 %v8788_v39, %v8766_v14 }
 0x50b   :  { %v8790_v51 = vpop.f32.mrf.mxu1 }
 0x50c   :  { %v8791_v1 = vadd.f32 %v8790_v51, %v8789_v28 }
 0x50e   :  { %v7658_v16 = vadd.f32 %v8791_v1, %v8769_v12 }
 0x533   :  { %v8808_v50 = vpop.f32.mrf.mxu0 }
 0x535   :  { %v8809_v36 = vpop.f32.mrf.mxu0 }
 0x536   :  { %v8810_v13 = vadd.f32 %v8809_v36, %v8808_v50 }
 0x537   :  { %v8811_v63 = vpop.f32.mrf.mxu0 }
 0x538   :  { %v7696_v32 = vadd.f32 %v8810_v13, %v7655_v54 }
 0x539   :  { %v8812_v24 = vpop.f32.mrf.mxu0 }
 0x53a   :  { %v8813_v57 = vadd.f32 %v8812_v24, %v8811_v63 }
 0x53c   :  { %v7699_v52 = vadd.f32 %v8813_v57, %v7658_v16 }
 0x5b3   :  { %v8830_v2 = vpop.f32.mrf.mxu1 }
 0x5b5   :  { %v8831_v23 = vpop.f32.mrf.mxu1 }
 0x5b6   :  { %v8832_v10 = vadd.f32 %v8831_v23, %v8830_v2 }
 0x5b7   :  { %v8833_v19 = vpop.f32.mrf.mxu1 }
 0x5b8   :  { %v7737_v59 = vadd.f32 %v8832_v10, %v7696_v32 }
 0x5b9   :  { %v8834_v30 = vpop.f32.mrf.mxu1 }
 0x5ba   :  { %v8835_v33 = vadd.f32 %v8834_v30, %v8833_v19 }
 0x5bc   :  { %v7740_v9 = vadd.f32 %v8835_v33, %v7699_v52 }
 0x5be   :  { %v8746_v5 = vpack.c.bf16 %v7740_v9, %v7737_v59 }
 0x5c0   :  { %8747 = vst [vmem:[%s9455_s6] sm:$0xff] %v8746_v5  }
 0x5c1   :  { %7757 = vsyncpa [#allocation3], 1 }
 0x5c2   :  { %7758 = vsyncpa [#allocation5], 1 }
 0x5c3   :  { %7759 = vsyncpa [#allocation8], 1 }

</bundles_post_ra>
